<compile_context>
chip_gen: v7x
topology: tpu7x:2x2x1
jax: 0.10.0
libtpu: 0.0.40
codegen_flags: <defaults>
</compile_context>

<pallas_src>
import functools

import jax
import jax.numpy as jnp
from jax.experimental import pallas as pl
from jax.experimental.pallas import tpu as pltpu

NEG_SLOPE = 0.01  # torch.nn.LeakyReLU default negative_slope


def _conv3d_slab_kernel(x_ref, w_ref, b_ref, o_ref, *, H, W, C_in, C_out,
                        apply_lrelu, neg_slope):
    """Compute one (n, d) output slab of a 3x3x3 'SAME' conv as 27 MXU taps."""
    d = pl.program_id(1)
    acc = jnp.zeros((H * W, C_out), jnp.float32)
    for kd in range(3):
        for kh in range(3):
            for kw in range(3):
                # (H, W, C_in) shifted window of the padded input at depth d+kd.
                xs = x_ref[d + kd, kh:kh + H, kw:kw + W, :]
                xs = xs.reshape(H * W, C_in)           # lanes (C_in) unchanged
                wk = w_ref[kd * 9 + kh * 3 + kw]       # (C_in, C_out), static
                acc = acc + jnp.dot(xs, wk, preferred_element_type=jnp.float32)
    acc = acc + b_ref[...]                             # bias once per tile
    if apply_lrelu:
        acc = jnp.where(acc >= 0, acc, jnp.float32(neg_slope) * acc)
    o_ref[...] = acc.reshape(H, W, C_out).astype(o_ref.dtype)


def conv3d_3x3x3_same(x, w_dhwio, b, *, apply_lrelu, neg_slope=NEG_SLOPE):
    """Conv3d(k=3, s=1, p=1) in NDHWC layout with optional fused LeakyReLU.

    x       : (N, D, H, W, C_in) float32
    w_dhwio : (3, 3, 3, C_in, C_out)   (== torch weight.permute(2, 3, 4, 1, 0))
    b       : (C_out,)
    """
    N, D, H, W, C_in = x.shape
    C_out = w_dhwio.shape[-1]

    x_pad = jnp.pad(x, ((0, 0), (1, 1), (1, 1), (1, 1), (0, 0)))
    w_taps = w_dhwio.reshape(27, C_in, C_out)          # layout-preserving
    b2 = b.reshape(1, C_out)

    kernel = functools.partial(
        _conv3d_slab_kernel, H=H, W=W, C_in=C_in, C_out=C_out,
        apply_lrelu=apply_lrelu, neg_slope=neg_slope)

    return pl.pallas_call(
        kernel,
        out_shape=jax.ShapeDtypeStruct((N, D, H, W, C_out), x.dtype),
        grid_spec=pltpu.PrefetchScalarGridSpec(
            num_scalar_prefetch=0,
            grid=(N, D),
            in_specs=[
                # Padded volume of batch element n — resident across the d axis
                # (block index constant while d iterates -> one DMA per n).
                pl.BlockSpec((None, D + 2, H + 2, W + 2, C_in),
                             lambda n, d: (n, 0, 0, 0, 0)),
                # All 27 weight taps — resident.
                pl.BlockSpec((27, C_in, C_out), lambda n, d: (0, 0, 0)),
                # Bias — resident.
                pl.BlockSpec((1, C_out), lambda n, d: (0, 0)),
            ],
            out_specs=pl.BlockSpec((None, None, H, W, C_out),
                                   lambda n, d: (n, d, 0, 0, 0)),
        ),
        compiler_params=pltpu.CompilerParams(
            dimension_semantics=("parallel", "arbitrary")),
    )(x_pad, w_taps, b2)


def plain_conv3d_channel_shrink(x, weights, biases):
    """Forward pass of PlainConv3dChannelShrink (NDHWC).

    weights[i]: (3, 3, 3, C_in_i, C_out_i) DHWIO; biases[i]: (C_out_i,).
    LeakyReLU after every layer except the last, matching the PyTorch module.
    """
    n_layers = len(weights)
    for li in range(n_layers):
        x = conv3d_3x3x3_same(x, weights[li], biases[li],
                              apply_lrelu=(li < n_layers - 1))
    return x


# ----------------------------- pure-JAX reference ---------------------------
def _conv3d_ref(x, w_dhwio, b, apply_lrelu, neg_slope=NEG_SLOPE):
    out = jax.lax.conv_general_dilated(
        x, w_dhwio, window_strides=(1, 1, 1), padding="SAME",
        dimension_numbers=("NDHWC", "DHWIO", "NDHWC"),
        precision=jax.lax.Precision.HIGHEST)
    out = out + b.reshape(1, 1, 1, 1, -1)
    if apply_lrelu:
        out = jnp.where(out >= 0, out, neg_slope * out)
    return out


def plain_conv3d_channel_shrink_ref(x, weights, biases):
    n_layers = len(weights)
    for li in range(n_layers):
        x = _conv3d_ref(x, weights[li], biases[li], li < n_layers - 1)
    return x


if __name__ == "__main__":
    key = jax.random.PRNGKey(0)

    # Small shapes consistent with the module (3-D conv stack on a volume).
    N, y_channel, z_channel, layers = 2, 4, 8, 3
    D = H = W = 8      # W a multiple of 8 keeps the sublane layout clean

    keys = jax.random.split(key, 1 + 2 * layers)
    x = jax.random.normal(keys[0], (N, D, H, W, y_channel), dtype=jnp.float32)

    weights, biases = [], []
    c_in = y_channel
    for li in range(layers):
        c_out = z_channel
        w = jax.random.normal(keys[1 + 2 * li], (3, 3, 3, c_in, c_out),
                              dtype=jnp.float32) * 0.1
        bb = jax.random.normal(keys[2 + 2 * li], (c_out,),
                               dtype=jnp.float32) * 0.1
        weights.append(w)
        biases.append(bb)
        c_in = c_out

    fwd = jax.jit(plain_conv3d_channel_shrink)
    out = jax.block_until_ready(fwd(x, weights, biases))

    ref = plain_conv3d_channel_shrink_ref(x, weights, biases)
    assert out.shape == (N, D, H, W, z_channel)
    max_err = float(jnp.max(jnp.abs(out - ref)))
    assert jnp.allclose(out, ref, atol=1e-3, rtol=1e-3), max_err

    print("KERNEL_OK")
</pallas_src>

<mosaic_0001>
module attributes {stable_mosaic.version = 11 : i64} {
  func.func @_conv3d_slab_kernel(%arg0: i32, %arg1: i32, %arg2: memref<1x10x10x10x4xf32, #tpu.memory_space<vmem>>, %arg3: memref<27x4x8xf32, #tpu.memory_space<vmem>>, %arg4: memref<1x8xf32, #tpu.memory_space<vmem>>, %arg5: memref<1x1x8x8x8xf32, #tpu.memory_space<vmem>>) attributes {dimension_semantics = [#tpu.dimension_semantics<parallel>, #tpu.dimension_semantics<arbitrary>], iteration_bounds = array<i64: 2, 8>, scalar_prefetch = 0 : i64, scratch_operands = 0 : i64, tpu.core_type = #tpu.core_type<tc>, window_params = [{transform_indices = @transform_0, window_bounds = array<i64: 1, 10, 10, 10, 4>}, {pipeline_mode = #tpu.pipeline_mode<synchronous>, transform_indices = @transform_1, window_bounds = array<i64: 27, 4, 8>}, {pipeline_mode = #tpu.pipeline_mode<synchronous>, transform_indices = @transform_2, window_bounds = array<i64: 1, 8>}, {transform_indices = @transform_3, window_bounds = array<i64: 1, 1, 8, 8, 8>}]} {
    %cst = arith.constant 0.000000e+00 : f32
    %0 = vector.broadcast %cst : f32 to vector<64x8xf32>
    %c0_i32 = arith.constant 0 : i32
    %1 = arith.addi %arg1, %c0_i32 : i32
    %c0 = arith.constant 0 : index
    %2 = arith.index_cast %1 : i32 to index
    %c0_0 = arith.constant 0 : index
    %c0_1 = arith.constant 0 : index
    %c0_2 = arith.constant 0 : index
    %3 = vector.load %arg2[%c0, %2, %c0_0, %c0_1, %c0_2] : memref<1x10x10x10x4xf32, #tpu.memory_space<vmem>>, vector<1x1x8x8x4xf32>
    %4 = vector.shape_cast %3 : vector<1x1x8x8x4xf32> to vector<8x8x4xf32>
    %5 = vector.shape_cast %4 : vector<8x8x4xf32> to vector<64x4xf32>
    %c0_3 = arith.constant 0 : index
    %c0_4 = arith.constant 0 : index
    %c0_5 = arith.constant 0 : index
    %6 = vector.load %arg3[%c0_3, %c0_4, %c0_5] : memref<27x4x8xf32, #tpu.memory_space<vmem>>, vector<1x4x8xf32>
    %7 = vector.shape_cast %6 : vector<1x4x8xf32> to vector<4x8xf32>
    %cst_6 = arith.constant dense<0.000000e+00> : vector<64x8xf32>
    %8 = tpu.matmul %5, %7, %cst_6 {dimension_numbers = #tpu.dot_dimension_numbers<[1], [0], [0], [1], [0, 0, 1, 1], [], []>} : vector<64x4xf32>, vector<4x8xf32>, vector<64x8xf32> -> vector<64x8xf32>
    %9 = arith.addf %0, %8 : vector<64x8xf32>
    %c0_i32_7 = arith.constant 0 : i32
    %10 = arith.addi %arg1, %c0_i32_7 : i32
    %c0_8 = arith.constant 0 : index
    %11 = arith.index_cast %10 : i32 to index
    %c0_9 = arith.constant 0 : index
    %c1 = arith.constant 1 : index
    %c0_10 = arith.constant 0 : index
    %12 = vector.load %arg2[%c0_8, %11, %c0_9, %c1, %c0_10] : memref<1x10x10x10x4xf32, #tpu.memory_space<vmem>>, vector<1x1x8x8x4xf32>
    %13 = vector.shape_cast %12 : vector<1x1x8x8x4xf32> to vector<8x8x4xf32>
    %14 = vector.shape_cast %13 : vector<8x8x4xf32> to vector<64x4xf32>
    %c1_11 = arith.constant 1 : index
    %c0_12 = arith.constant 0 : index
    %c0_13 = arith.constant 0 : index
    %15 = vector.load %arg3[%c1_11, %c0_12, %c0_13] : memref<27x4x8xf32, #tpu.memory_space<vmem>>, vector<1x4x8xf32>
    %16 = vector.shape_cast %15 : vector<1x4x8xf32> to vector<4x8xf32>
    %cst_14 = arith.constant dense<0.000000e+00> : vector<64x8xf32>
    %17 = tpu.matmul %14, %16, %cst_14 {dimension_numbers = #tpu.dot_dimension_numbers<[1], [0], [0], [1], [0, 0, 1, 1], [], []>} : vector<64x4xf32>, vector<4x8xf32>, vector<64x8xf32> -> vector<64x8xf32>
    %18 = arith.addf %9, %17 : vector<64x8xf32>
    %c0_i32_15 = arith.constant 0 : i32
    %19 = arith.addi %arg1, %c0_i32_15 : i32
    %c0_16 = arith.constant 0 : index
    %20 = arith.index_cast %19 : i32 to index
    %c0_17 = arith.constant 0 : index
    %c2 = arith.constant 2 : index
    %c0_18 = arith.constant 0 : index
    %21 = vector.load %arg2[%c0_16, %20, %c0_17, %c2, %c0_18] : memref<1x10x10x10x4xf32, #tpu.memory_space<vmem>>, vector<1x1x8x8x4xf32>
    %22 = vector.shape_cast %21 : vector<1x1x8x8x4xf32> to vector<8x8x4xf32>
    %23 = vector.shape_cast %22 : vector<8x8x4xf32> to vector<64x4xf32>
    %c2_19 = arith.constant 2 : index
    %c0_20 = arith.constant 0 : index
    %c0_21 = arith.constant 0 : index
    %24 = vector.load %arg3[%c2_19, %c0_20, %c0_21] : memref<27x4x8xf32, #tpu.memory_space<vmem>>, vector<1x4x8xf32>
    %25 = vector.shape_cast %24 : vector<1x4x8xf32> to vector<4x8xf32>
    %cst_22 = arith.constant dense<0.000000e+00> : vector<64x8xf32>
    %26 = tpu.matmul %23, %25, %cst_22 {dimension_numbers = #tpu.dot_dimension_numbers<[1], [0], [0], [1], [0, 0, 1, 1], [], []>} : vector<64x4xf32>, vector<4x8xf32>, vector<64x8xf32> -> vector<64x8xf32>
    %27 = arith.addf %18, %26 : vector<64x8xf32>
    %c0_i32_23 = arith.constant 0 : i32
    %28 = arith.addi %arg1, %c0_i32_23 : i32
    %c0_24 = arith.constant 0 : index
    %29 = arith.index_cast %28 : i32 to index
    %c1_25 = arith.constant 1 : index
    %c0_26 = arith.constant 0 : index
    %c0_27 = arith.constant 0 : index
    %30 = vector.load %arg2[%c0_24, %29, %c1_25, %c0_26, %c0_27] : memref<1x10x10x10x4xf32, #tpu.memory_space<vmem>>, vector<1x1x8x8x4xf32>
    %31 = vector.shape_cast %30 : vector<1x1x8x8x4xf32> to vector<8x8x4xf32>
    %32 = vector.shape_cast %31 : vector<8x8x4xf32> to vector<64x4xf32>
    %c3 = arith.constant 3 : index
    %c0_28 = arith.constant 0 : index
    %c0_29 = arith.constant 0 : index
    %33 = vector.load %arg3[%c3, %c0_28, %c0_29] : memref<27x4x8xf32, #tpu.memory_space<vmem>>, vector<1x4x8xf32>
    %34 = vector.shape_cast %33 : vector<1x4x8xf32> to vector<4x8xf32>
    %cst_30 = arith.constant dense<0.000000e+00> : vector<64x8xf32>
    %35 = tpu.matmul %32, %34, %cst_30 {dimension_numbers = #tpu.dot_dimension_numbers<[1], [0], [0], [1], [0, 0, 1, 1], [], []>} : vector<64x4xf32>, vector<4x8xf32>, vector<64x8xf32> -> vector<64x8xf32>
    %36 = arith.addf %27, %35 : vector<64x8xf32>
    %c0_i32_31 = arith.constant 0 : i32
    %37 = arith.addi %arg1, %c0_i32_31 : i32
    %c0_32 = arith.constant 0 : index
    %38 = arith.index_cast %37 : i32 to index
    %c1_33 = arith.constant 1 : index
    %c1_34 = arith.constant 1 : index
    %c0_35 = arith.constant 0 : index
    %39 = vector.load %arg2[%c0_32, %38, %c1_33, %c1_34, %c0_35] : memref<1x10x10x10x4xf32, #tpu.memory_space<vmem>>, vector<1x1x8x8x4xf32>
    %40 = vector.shape_cast %39 : vector<1x1x8x8x4xf32> to vector<8x8x4xf32>
    %41 = vector.shape_cast %40 : vector<8x8x4xf32> to vector<64x4xf32>
    %c4 = arith.constant 4 : index
    %c0_36 = arith.constant 0 : index
    %c0_37 = arith.constant 0 : index
    %42 = vector.load %arg3[%c4, %c0_36, %c0_37] : memref<27x4x8xf32, #tpu.memory_space<vmem>>, vector<1x4x8xf32>
    %43 = vector.shape_cast %42 : vector<1x4x8xf32> to vector<4x8xf32>
    %cst_38 = arith.constant dense<0.000000e+00> : vector<64x8xf32>
    %44 = tpu.matmul %41, %43, %cst_38 {dimension_numbers = #tpu.dot_dimension_numbers<[1], [0], [0], [1], [0, 0, 1, 1], [], []>} : vector<64x4xf32>, vector<4x8xf32>, vector<64x8xf32> -> vector<64x8xf32>
    %45 = arith.addf %36, %44 : vector<64x8xf32>
    %c0_i32_39 = arith.constant 0 : i32
    %46 = arith.addi %arg1, %c0_i32_39 : i32
    %c0_40 = arith.constant 0 : index
    %47 = arith.index_cast %46 : i32 to index
    %c1_41 = arith.constant 1 : index
    %c2_42 = arith.constant 2 : index
    %c0_43 = arith.constant 0 : index
    %48 = vector.load %arg2[%c0_40, %47, %c1_41, %c2_42, %c0_43] : memref<1x10x10x10x4xf32, #tpu.memory_space<vmem>>, vector<1x1x8x8x4xf32>
    %49 = vector.shape_cast %48 : vector<1x1x8x8x4xf32> to vector<8x8x4xf32>
    %50 = vector.shape_cast %49 : vector<8x8x4xf32> to vector<64x4xf32>
    %c5 = arith.constant 5 : index
    %c0_44 = arith.constant 0 : index
    %c0_45 = arith.constant 0 : index
    %51 = vector.load %arg3[%c5, %c0_44, %c0_45] : memref<27x4x8xf32, #tpu.memory_space<vmem>>, vector<1x4x8xf32>
    %52 = vector.shape_cast %51 : vector<1x4x8xf32> to vector<4x8xf32>
    %cst_46 = arith.constant dense<0.000000e+00> : vector<64x8xf32>
    %53 = tpu.matmul %50, %52, %cst_46 {dimension_numbers = #tpu.dot_dimension_numbers<[1], [0], [0], [1], [0, 0, 1, 1], [], []>} : vector<64x4xf32>, vector<4x8xf32>, vector<64x8xf32> -> vector<64x8xf32>
    %54 = arith.addf %45, %53 : vector<64x8xf32>
    %c0_i32_47 = arith.constant 0 : i32
    %55 = arith.addi %arg1, %c0_i32_47 : i32
    %c0_48 = arith.constant 0 : index
    %56 = arith.index_cast %55 : i32 to index
    %c2_49 = arith.constant 2 : index
    %c0_50 = arith.constant 0 : index
    %c0_51 = arith.constant 0 : index
    %57 = vector.load %arg2[%c0_48, %56, %c2_49, %c0_50, %c0_51] : memref<1x10x10x10x4xf32, #tpu.memory_space<vmem>>, vector<1x1x8x8x4xf32>
    %58 = vector.shape_cast %57 : vector<1x1x8x8x4xf32> to vector<8x8x4xf32>
    %59 = vector.shape_cast %58 : vector<8x8x4xf32> to vector<64x4xf32>
    %c6 = arith.constant 6 : index
    %c0_52 = arith.constant 0 : index
    %c0_53 = arith.constant 0 : index
    %60 = vector.load %arg3[%c6, %c0_52, %c0_53] : memref<27x4x8xf32, #tpu.memory_space<vmem>>, vector<1x4x8xf32>
    %61 = vector.shape_cast %60 : vector<1x4x8xf32> to vector<4x8xf32>
    %cst_54 = arith.constant dense<0.000000e+00> : vector<64x8xf32>
    %62 = tpu.matmul %59, %61, %cst_54 {dimension_numbers = #tpu.dot_dimension_numbers<[1], [0], [0], [1], [0, 0, 1, 1], [], []>} : vector<64x4xf32>, vector<4x8xf32>, vector<64x8xf32> -> vector<64x8xf32>
    %63 = arith.addf %54, %62 : vector<64x8xf32>
    %c0_i32_55 = arith.constant 0 : i32
    %64 = arith.addi %arg1, %c0_i32_55 : i32
    %c0_56 = arith.constant 0 : index
    %65 = arith.index_cast %64 : i32 to index
    %c2_57 = arith.constant 2 : index
    %c1_58 = arith.constant 1 : index
    %c0_59 = arith.constant 0 : index
    %66 = vector.load %arg2[%c0_56, %65, %c2_57, %c1_58, %c0_59] : memref<1x10x10x10x4xf32, #tpu.memory_space<vmem>>, vector<1x1x8x8x4xf32>
    %67 = vector.shape_cast %66 : vector<1x1x8x8x4xf32> to vector<8x8x4xf32>
    %68 = vector.shape_cast %67 : vector<8x8x4xf32> to vector<64x4xf32>
    %c7 = arith.constant 7 : index
    %c0_60 = arith.constant 0 : index
    %c0_61 = arith.constant 0 : index
    %69 = vector.load %arg3[%c7, %c0_60, %c0_61] : memref<27x4x8xf32, #tpu.memory_space<vmem>>, vector<1x4x8xf32>
    %70 = vector.shape_cast %69 : vector<1x4x8xf32> to vector<4x8xf32>
    %cst_62 = arith.constant dense<0.000000e+00> : vector<64x8xf32>
    %71 = tpu.matmul %68, %70, %cst_62 {dimension_numbers = #tpu.dot_dimension_numbers<[1], [0], [0], [1], [0, 0, 1, 1], [], []>} : vector<64x4xf32>, vector<4x8xf32>, vector<64x8xf32> -> vector<64x8xf32>
    %72 = arith.addf %63, %71 : vector<64x8xf32>
    %c0_i32_63 = arith.constant 0 : i32
    %73 = arith.addi %arg1, %c0_i32_63 : i32
    %c0_64 = arith.constant 0 : index
    %74 = arith.index_cast %73 : i32 to index
    %c2_65 = arith.constant 2 : index
    %c2_66 = arith.constant 2 : index
    %c0_67 = arith.constant 0 : index
    %75 = vector.load %arg2[%c0_64, %74, %c2_65, %c2_66, %c0_67] : memref<1x10x10x10x4xf32, #tpu.memory_space<vmem>>, vector<1x1x8x8x4xf32>
    %76 = vector.shape_cast %75 : vector<1x1x8x8x4xf32> to vector<8x8x4xf32>
    %77 = vector.shape_cast %76 : vector<8x8x4xf32> to vector<64x4xf32>
    %c8 = arith.constant 8 : index
    %c0_68 = arith.constant 0 : index
    %c0_69 = arith.constant 0 : index
    %78 = vector.load %arg3[%c8, %c0_68, %c0_69] : memref<27x4x8xf32, #tpu.memory_space<vmem>>, vector<1x4x8xf32>
    %79 = vector.shape_cast %78 : vector<1x4x8xf32> to vector<4x8xf32>
    %cst_70 = arith.constant dense<0.000000e+00> : vector<64x8xf32>
    %80 = tpu.matmul %77, %79, %cst_70 {dimension_numbers = #tpu.dot_dimension_numbers<[1], [0], [0], [1], [0, 0, 1, 1], [], []>} : vector<64x4xf32>, vector<4x8xf32>, vector<64x8xf32> -> vector<64x8xf32>
    %81 = arith.addf %72, %80 : vector<64x8xf32>
    %c1_i32 = arith.constant 1 : i32
    %82 = arith.addi %arg1, %c1_i32 : i32
    %c0_71 = arith.constant 0 : index
    %83 = arith.index_cast %82 : i32 to index
    %c0_72 = arith.constant 0 : index
    %c0_73 = arith.constant 0 : index
    %c0_74 = arith.constant 0 : index
    %84 = vector.load %arg2[%c0_71, %83, %c0_72, %c0_73, %c0_74] : memref<1x10x10x10x4xf32, #tpu.memory_space<vmem>>, vector<1x1x8x8x4xf32>
    %85 = vector.shape_cast %84 : vector<1x1x8x8x4xf32> to vector<8x8x4xf32>
    %86 = vector.shape_cast %85 : vector<8x8x4xf32> to vector<64x4xf32>
    %c9 = arith.constant 9 : index
    %c0_75 = arith.constant 0 : index
    %c0_76 = arith.constant 0 : index
    %87 = vector.load %arg3[%c9, %c0_75, %c0_76] : memref<27x4x8xf32, #tpu.memory_space<vmem>>, vector<1x4x8xf32>
    %88 = vector.shape_cast %87 : vector<1x4x8xf32> to vector<4x8xf32>
    %cst_77 = arith.constant dense<0.000000e+00> : vector<64x8xf32>
    %89 = tpu.matmul %86, %88, %cst_77 {dimension_numbers = #tpu.dot_dimension_numbers<[1], [0], [0], [1], [0, 0, 1, 1], [], []>} : vector<64x4xf32>, vector<4x8xf32>, vector<64x8xf32> -> vector<64x8xf32>
    %90 = arith.addf %81, %89 : vector<64x8xf32>
    %c1_i32_78 = arith.constant 1 : i32
    %91 = arith.addi %arg1, %c1_i32_78 : i32
    %c0_79 = arith.constant 0 : index
    %92 = arith.index_cast %91 : i32 to index
    %c0_80 = arith.constant 0 : index
    %c1_81 = arith.constant 1 : index
    %c0_82 = arith.constant 0 : index
    %93 = vector.load %arg2[%c0_79, %92, %c0_80, %c1_81, %c0_82] : memref<1x10x10x10x4xf32, #tpu.memory_space<vmem>>, vector<1x1x8x8x4xf32>
    %94 = vector.shape_cast %93 : vector<1x1x8x8x4xf32> to vector<8x8x4xf32>
    %95 = vector.shape_cast %94 : vector<8x8x4xf32> to vector<64x4xf32>
    %c10 = arith.constant 10 : index
    %c0_83 = arith.constant 0 : index
    %c0_84 = arith.constant 0 : index
    %96 = vector.load %arg3[%c10, %c0_83, %c0_84] : memref<27x4x8xf32, #tpu.memory_space<vmem>>, vector<1x4x8xf32>
    %97 = vector.shape_cast %96 : vector<1x4x8xf32> to vector<4x8xf32>
    %cst_85 = arith.constant dense<0.000000e+00> : vector<64x8xf32>
    %98 = tpu.matmul %95, %97, %cst_85 {dimension_numbers = #tpu.dot_dimension_numbers<[1], [0], [0], [1], [0, 0, 1, 1], [], []>} : vector<64x4xf32>, vector<4x8xf32>, vector<64x8xf32> -> vector<64x8xf32>
    %99 = arith.addf %90, %98 : vector<64x8xf32>
    %c1_i32_86 = arith.constant 1 : i32
    %100 = arith.addi %arg1, %c1_i32_86 : i32
    %c0_87 = arith.constant 0 : index
    %101 = arith.index_cast %100 : i32 to index
    %c0_88 = arith.constant 0 : index
    %c2_89 = arith.constant 2 : index
    %c0_90 = arith.constant 0 : index
    %102 = vector.load %arg2[%c0_87, %101, %c0_88, %c2_89, %c0_90] : memref<1x10x10x10x4xf32, #tpu.memory_space<vmem>>, vector<1x1x8x8x4xf32>
    %103 = vector.shape_cast %102 : vector<1x1x8x8x4xf32> to vector<8x8x4xf32>
    %104 = vector.shape_cast %103 : vector<8x8x4xf32> to vector<64x4xf32>
    %c11 = arith.constant 11 : index
    %c0_91 = arith.constant 0 : index
    %c0_92 = arith.constant 0 : index
    %105 = vector.load %arg3[%c11, %c0_91, %c0_92] : memref<27x4x8xf32, #tpu.memory_space<vmem>>, vector<1x4x8xf32>
    %106 = vector.shape_cast %105 : vector<1x4x8xf32> to vector<4x8xf32>
    %cst_93 = arith.constant dense<0.000000e+00> : vector<64x8xf32>
    %107 = tpu.matmul %104, %106, %cst_93 {dimension_numbers = #tpu.dot_dimension_numbers<[1], [0], [0], [1], [0, 0, 1, 1], [], []>} : vector<64x4xf32>, vector<4x8xf32>, vector<64x8xf32> -> vector<64x8xf32>
    %108 = arith.addf %99, %107 : vector<64x8xf32>
    %c1_i32_94 = arith.constant 1 : i32
    %109 = arith.addi %arg1, %c1_i32_94 : i32
    %c0_95 = arith.constant 0 : index
    %110 = arith.index_cast %109 : i32 to index
    %c1_96 = arith.constant 1 : index
    %c0_97 = arith.constant 0 : index
    %c0_98 = arith.constant 0 : index
    %111 = vector.load %arg2[%c0_95, %110, %c1_96, %c0_97, %c0_98] : memref<1x10x10x10x4xf32, #tpu.memory_space<vmem>>, vector<1x1x8x8x4xf32>
    %112 = vector.shape_cast %111 : vector<1x1x8x8x4xf32> to vector<8x8x4xf32>
    %113 = vector.shape_cast %112 : vector<8x8x4xf32> to vector<64x4xf32>
    %c12 = arith.constant 12 : index
    %c0_99 = arith.constant 0 : index
    %c0_100 = arith.constant 0 : index
    %114 = vector.load %arg3[%c12, %c0_99, %c0_100] : memref<27x4x8xf32, #tpu.memory_space<vmem>>, vector<1x4x8xf32>
    %115 = vector.shape_cast %114 : vector<1x4x8xf32> to vector<4x8xf32>
    %cst_101 = arith.constant dense<0.000000e+00> : vector<64x8xf32>
    %116 = tpu.matmul %113, %115, %cst_101 {dimension_numbers = #tpu.dot_dimension_numbers<[1], [0], [0], [1], [0, 0, 1, 1], [], []>} : vector<64x4xf32>, vector<4x8xf32>, vector<64x8xf32> -> vector<64x8xf32>
    %117 = arith.addf %108, %116 : vector<64x8xf32>
    %c1_i32_102 = arith.constant 1 : i32
    %118 = arith.addi %arg1, %c1_i32_102 : i32
    %c0_103 = arith.constant 0 : index
    %119 = arith.index_cast %118 : i32 to index
    %c1_104 = arith.constant 1 : index
    %c1_105 = arith.constant 1 : index
    %c0_106 = arith.constant 0 : index
    %120 = vector.load %arg2[%c0_103, %119, %c1_104, %c1_105, %c0_106] : memref<1x10x10x10x4xf32, #tpu.memory_space<vmem>>, vector<1x1x8x8x4xf32>
    %121 = vector.shape_cast %120 : vector<1x1x8x8x4xf32> to vector<8x8x4xf32>
    %122 = vector.shape_cast %121 : vector<8x8x4xf32> to vector<64x4xf32>
    %c13 = arith.constant 13 : index
    %c0_107 = arith.constant 0 : index
    %c0_108 = arith.constant 0 : index
    %123 = vector.load %arg3[%c13, %c0_107, %c0_108] : memref<27x4x8xf32, #tpu.memory_space<vmem>>, vector<1x4x8xf32>
    %124 = vector.shape_cast %123 : vector<1x4x8xf32> to vector<4x8xf32>
    %cst_109 = arith.constant dense<0.000000e+00> : vector<64x8xf32>
    %125 = tpu.matmul %122, %124, %cst_109 {dimension_numbers = #tpu.dot_dimension_numbers<[1], [0], [0], [1], [0, 0, 1, 1], [], []>} : vector<64x4xf32>, vector<4x8xf32>, vector<64x8xf32> -> vector<64x8xf32>
    %126 = arith.addf %117, %125 : vector<64x8xf32>
    %c1_i32_110 = arith.constant 1 : i32
    %127 = arith.addi %arg1, %c1_i32_110 : i32
    %c0_111 = arith.constant 0 : index
    %128 = arith.index_cast %127 : i32 to index
    %c1_112 = arith.constant 1 : index
    %c2_113 = arith.constant 2 : index
    %c0_114 = arith.constant 0 : index
    %129 = vector.load %arg2[%c0_111, %128, %c1_112, %c2_113, %c0_114] : memref<1x10x10x10x4xf32, #tpu.memory_space<vmem>>, vector<1x1x8x8x4xf32>
    %130 = vector.shape_cast %129 : vector<1x1x8x8x4xf32> to vector<8x8x4xf32>
    %131 = vector.shape_cast %130 : vector<8x8x4xf32> to vector<64x4xf32>
    %c14 = arith.constant 14 : index
    %c0_115 = arith.constant 0 : index
    %c0_116 = arith.constant 0 : index
    %132 = vector.load %arg3[%c14, %c0_115, %c0_116] : memref<27x4x8xf32, #tpu.memory_space<vmem>>, vector<1x4x8xf32>
    %133 = vector.shape_cast %132 : vector<1x4x8xf32> to vector<4x8xf32>
    %cst_117 = arith.constant dense<0.000000e+00> : vector<64x8xf32>
    %134 = tpu.matmul %131, %133, %cst_117 {dimension_numbers = #tpu.dot_dimension_numbers<[1], [0], [0], [1], [0, 0, 1, 1], [], []>} : vector<64x4xf32>, vector<4x8xf32>, vector<64x8xf32> -> vector<64x8xf32>
    %135 = arith.addf %126, %134 : vector<64x8xf32>
    %c1_i32_118 = arith.constant 1 : i32
    %136 = arith.addi %arg1, %c1_i32_118 : i32
    %c0_119 = arith.constant 0 : index
    %137 = arith.index_cast %136 : i32 to index
    %c2_120 = arith.constant 2 : index
    %c0_121 = arith.constant 0 : index
    %c0_122 = arith.constant 0 : index
    %138 = vector.load %arg2[%c0_119, %137, %c2_120, %c0_121, %c0_122] : memref<1x10x10x10x4xf32, #tpu.memory_space<vmem>>, vector<1x1x8x8x4xf32>
    %139 = vector.shape_cast %138 : vector<1x1x8x8x4xf32> to vector<8x8x4xf32>
    %140 = vector.shape_cast %139 : vector<8x8x4xf32> to vector<64x4xf32>
    %c15 = arith.constant 15 : index
    %c0_123 = arith.constant 0 : index
    %c0_124 = arith.constant 0 : index
    %141 = vector.load %arg3[%c15, %c0_123, %c0_124] : memref<27x4x8xf32, #tpu.memory_space<vmem>>, vector<1x4x8xf32>
    %142 = vector.shape_cast %141 : vector<1x4x8xf32> to vector<4x8xf32>
    %cst_125 = arith.constant dense<0.000000e+00> : vector<64x8xf32>
    %143 = tpu.matmul %140, %142, %cst_125 {dimension_numbers = #tpu.dot_dimension_numbers<[1], [0], [0], [1], [0, 0, 1, 1], [], []>} : vector<64x4xf32>, vector<4x8xf32>, vector<64x8xf32> -> vector<64x8xf32>
    %144 = arith.addf %135, %143 : vector<64x8xf32>
    %c1_i32_126 = arith.constant 1 : i32
    %145 = arith.addi %arg1, %c1_i32_126 : i32
    %c0_127 = arith.constant 0 : index
    %146 = arith.index_cast %145 : i32 to index
    %c2_128 = arith.constant 2 : index
    %c1_129 = arith.constant 1 : index
    %c0_130 = arith.constant 0 : index
    %147 = vector.load %arg2[%c0_127, %146, %c2_128, %c1_129, %c0_130] : memref<1x10x10x10x4xf32, #tpu.memory_space<vmem>>, vector<1x1x8x8x4xf32>
    %148 = vector.shape_cast %147 : vector<1x1x8x8x4xf32> to vector<8x8x4xf32>
    %149 = vector.shape_cast %148 : vector<8x8x4xf32> to vector<64x4xf32>
    %c16 = arith.constant 16 : index
    %c0_131 = arith.constant 0 : index
    %c0_132 = arith.constant 0 : index
    %150 = vector.load %arg3[%c16, %c0_131, %c0_132] : memref<27x4x8xf32, #tpu.memory_space<vmem>>, vector<1x4x8xf32>
    %151 = vector.shape_cast %150 : vector<1x4x8xf32> to vector<4x8xf32>
    %cst_133 = arith.constant dense<0.000000e+00> : vector<64x8xf32>
    %152 = tpu.matmul %149, %151, %cst_133 {dimension_numbers = #tpu.dot_dimension_numbers<[1], [0], [0], [1], [0, 0, 1, 1], [], []>} : vector<64x4xf32>, vector<4x8xf32>, vector<64x8xf32> -> vector<64x8xf32>
    %153 = arith.addf %144, %152 : vector<64x8xf32>
    %c1_i32_134 = arith.constant 1 : i32
    %154 = arith.addi %arg1, %c1_i32_134 : i32
    %c0_135 = arith.constant 0 : index
    %155 = arith.index_cast %154 : i32 to index
    %c2_136 = arith.constant 2 : index
    %c2_137 = arith.constant 2 : index
    %c0_138 = arith.constant 0 : index
    %156 = vector.load %arg2[%c0_135, %155, %c2_136, %c2_137, %c0_138] : memref<1x10x10x10x4xf32, #tpu.memory_space<vmem>>, vector<1x1x8x8x4xf32>
    %157 = vector.shape_cast %156 : vector<1x1x8x8x4xf32> to vector<8x8x4xf32>
    %158 = vector.shape_cast %157 : vector<8x8x4xf32> to vector<64x4xf32>
    %c17 = arith.constant 17 : index
    %c0_139 = arith.constant 0 : index
    %c0_140 = arith.constant 0 : index
    %159 = vector.load %arg3[%c17, %c0_139, %c0_140] : memref<27x4x8xf32, #tpu.memory_space<vmem>>, vector<1x4x8xf32>
    %160 = vector.shape_cast %159 : vector<1x4x8xf32> to vector<4x8xf32>
    %cst_141 = arith.constant dense<0.000000e+00> : vector<64x8xf32>
    %161 = tpu.matmul %158, %160, %cst_141 {dimension_numbers = #tpu.dot_dimension_numbers<[1], [0], [0], [1], [0, 0, 1, 1], [], []>} : vector<64x4xf32>, vector<4x8xf32>, vector<64x8xf32> -> vector<64x8xf32>
    %162 = arith.addf %153, %161 : vector<64x8xf32>
    %c2_i32 = arith.constant 2 : i32
    %163 = arith.addi %arg1, %c2_i32 : i32
    %c0_142 = arith.constant 0 : index
    %164 = arith.index_cast %163 : i32 to index
    %c0_143 = arith.constant 0 : index
    %c0_144 = arith.constant 0 : index
    %c0_145 = arith.constant 0 : index
    %165 = vector.load %arg2[%c0_142, %164, %c0_143, %c0_144, %c0_145] : memref<1x10x10x10x4xf32, #tpu.memory_space<vmem>>, vector<1x1x8x8x4xf32>
    %166 = vector.shape_cast %165 : vector<1x1x8x8x4xf32> to vector<8x8x4xf32>
    %167 = vector.shape_cast %166 : vector<8x8x4xf32> to vector<64x4xf32>
    %c18 = arith.constant 18 : index
    %c0_146 = arith.constant 0 : index
    %c0_147 = arith.constant 0 : index
    %168 = vector.load %arg3[%c18, %c0_146, %c0_147] : memref<27x4x8xf32, #tpu.memory_space<vmem>>, vector<1x4x8xf32>
    %169 = vector.shape_cast %168 : vector<1x4x8xf32> to vector<4x8xf32>
    %cst_148 = arith.constant dense<0.000000e+00> : vector<64x8xf32>
    %170 = tpu.matmul %167, %169, %cst_148 {dimension_numbers = #tpu.dot_dimension_numbers<[1], [0], [0], [1], [0, 0, 1, 1], [], []>} : vector<64x4xf32>, vector<4x8xf32>, vector<64x8xf32> -> vector<64x8xf32>
    %171 = arith.addf %162, %170 : vector<64x8xf32>
    %c2_i32_149 = arith.constant 2 : i32
    %172 = arith.addi %arg1, %c2_i32_149 : i32
    %c0_150 = arith.constant 0 : index
    %173 = arith.index_cast %172 : i32 to index
    %c0_151 = arith.constant 0 : index
    %c1_152 = arith.constant 1 : index
    %c0_153 = arith.constant 0 : index
    %174 = vector.load %arg2[%c0_150, %173, %c0_151, %c1_152, %c0_153] : memref<1x10x10x10x4xf32, #tpu.memory_space<vmem>>, vector<1x1x8x8x4xf32>
    %175 = vector.shape_cast %174 : vector<1x1x8x8x4xf32> to vector<8x8x4xf32>
    %176 = vector.shape_cast %175 : vector<8x8x4xf32> to vector<64x4xf32>
    %c19 = arith.constant 19 : index
    %c0_154 = arith.constant 0 : index
    %c0_155 = arith.constant 0 : index
    %177 = vector.load %arg3[%c19, %c0_154, %c0_155] : memref<27x4x8xf32, #tpu.memory_space<vmem>>, vector<1x4x8xf32>
    %178 = vector.shape_cast %177 : vector<1x4x8xf32> to vector<4x8xf32>
    %cst_156 = arith.constant dense<0.000000e+00> : vector<64x8xf32>
    %179 = tpu.matmul %176, %178, %cst_156 {dimension_numbers = #tpu.dot_dimension_numbers<[1], [0], [0], [1], [0, 0, 1, 1], [], []>} : vector<64x4xf32>, vector<4x8xf32>, vector<64x8xf32> -> vector<64x8xf32>
    %180 = arith.addf %171, %179 : vector<64x8xf32>
    %c2_i32_157 = arith.constant 2 : i32
    %181 = arith.addi %arg1, %c2_i32_157 : i32
    %c0_158 = arith.constant 0 : index
    %182 = arith.index_cast %181 : i32 to index
    %c0_159 = arith.constant 0 : index
    %c2_160 = arith.constant 2 : index
    %c0_161 = arith.constant 0 : index
    %183 = vector.load %arg2[%c0_158, %182, %c0_159, %c2_160, %c0_161] : memref<1x10x10x10x4xf32, #tpu.memory_space<vmem>>, vector<1x1x8x8x4xf32>
    %184 = vector.shape_cast %183 : vector<1x1x8x8x4xf32> to vector<8x8x4xf32>
    %185 = vector.shape_cast %184 : vector<8x8x4xf32> to vector<64x4xf32>
    %c20 = arith.constant 20 : index
    %c0_162 = arith.constant 0 : index
    %c0_163 = arith.constant 0 : index
    %186 = vector.load %arg3[%c20, %c0_162, %c0_163] : memref<27x4x8xf32, #tpu.memory_space<vmem>>, vector<1x4x8xf32>
    %187 = vector.shape_cast %186 : vector<1x4x8xf32> to vector<4x8xf32>
    %cst_164 = arith.constant dense<0.000000e+00> : vector<64x8xf32>
    %188 = tpu.matmul %185, %187, %cst_164 {dimension_numbers = #tpu.dot_dimension_numbers<[1], [0], [0], [1], [0, 0, 1, 1], [], []>} : vector<64x4xf32>, vector<4x8xf32>, vector<64x8xf32> -> vector<64x8xf32>
    %189 = arith.addf %180, %188 : vector<64x8xf32>
    %c2_i32_165 = arith.constant 2 : i32
    %190 = arith.addi %arg1, %c2_i32_165 : i32
    %c0_166 = arith.constant 0 : index
    %191 = arith.index_cast %190 : i32 to index
    %c1_167 = arith.constant 1 : index
    %c0_168 = arith.constant 0 : index
    %c0_169 = arith.constant 0 : index
    %192 = vector.load %arg2[%c0_166, %191, %c1_167, %c0_168, %c0_169] : memref<1x10x10x10x4xf32, #tpu.memory_space<vmem>>, vector<1x1x8x8x4xf32>
    %193 = vector.shape_cast %192 : vector<1x1x8x8x4xf32> to vector<8x8x4xf32>
    %194 = vector.shape_cast %193 : vector<8x8x4xf32> to vector<64x4xf32>
    %c21 = arith.constant 21 : index
    %c0_170 = arith.constant 0 : index
    %c0_171 = arith.constant 0 : index
    %195 = vector.load %arg3[%c21, %c0_170, %c0_171] : memref<27x4x8xf32, #tpu.memory_space<vmem>>, vector<1x4x8xf32>
    %196 = vector.shape_cast %195 : vector<1x4x8xf32> to vector<4x8xf32>
    %cst_172 = arith.constant dense<0.000000e+00> : vector<64x8xf32>
    %197 = tpu.matmul %194, %196, %cst_172 {dimension_numbers = #tpu.dot_dimension_numbers<[1], [0], [0], [1], [0, 0, 1, 1], [], []>} : vector<64x4xf32>, vector<4x8xf32>, vector<64x8xf32> -> vector<64x8xf32>
    %198 = arith.addf %189, %197 : vector<64x8xf32>
    %c2_i32_173 = arith.constant 2 : i32
    %199 = arith.addi %arg1, %c2_i32_173 : i32
    %c0_174 = arith.constant 0 : index
    %200 = arith.index_cast %199 : i32 to index
    %c1_175 = arith.constant 1 : index
    %c1_176 = arith.constant 1 : index
    %c0_177 = arith.constant 0 : index
    %201 = vector.load %arg2[%c0_174, %200, %c1_175, %c1_176, %c0_177] : memref<1x10x10x10x4xf32, #tpu.memory_space<vmem>>, vector<1x1x8x8x4xf32>
    %202 = vector.shape_cast %201 : vector<1x1x8x8x4xf32> to vector<8x8x4xf32>
    %203 = vector.shape_cast %202 : vector<8x8x4xf32> to vector<64x4xf32>
    %c22 = arith.constant 22 : index
    %c0_178 = arith.constant 0 : index
    %c0_179 = arith.constant 0 : index
    %204 = vector.load %arg3[%c22, %c0_178, %c0_179] : memref<27x4x8xf32, #tpu.memory_space<vmem>>, vector<1x4x8xf32>
    %205 = vector.shape_cast %204 : vector<1x4x8xf32> to vector<4x8xf32>
    %cst_180 = arith.constant dense<0.000000e+00> : vector<64x8xf32>
    %206 = tpu.matmul %203, %205, %cst_180 {dimension_numbers = #tpu.dot_dimension_numbers<[1], [0], [0], [1], [0, 0, 1, 1], [], []>} : vector<64x4xf32>, vector<4x8xf32>, vector<64x8xf32> -> vector<64x8xf32>
    %207 = arith.addf %198, %206 : vector<64x8xf32>
    %c2_i32_181 = arith.constant 2 : i32
    %208 = arith.addi %arg1, %c2_i32_181 : i32
    %c0_182 = arith.constant 0 : index
    %209 = arith.index_cast %208 : i32 to index
    %c1_183 = arith.constant 1 : index
    %c2_184 = arith.constant 2 : index
    %c0_185 = arith.constant 0 : index
    %210 = vector.load %arg2[%c0_182, %209, %c1_183, %c2_184, %c0_185] : memref<1x10x10x10x4xf32, #tpu.memory_space<vmem>>, vector<1x1x8x8x4xf32>
    %211 = vector.shape_cast %210 : vector<1x1x8x8x4xf32> to vector<8x8x4xf32>
    %212 = vector.shape_cast %211 : vector<8x8x4xf32> to vector<64x4xf32>
    %c23 = arith.constant 23 : index
    %c0_186 = arith.constant 0 : index
    %c0_187 = arith.constant 0 : index
    %213 = vector.load %arg3[%c23, %c0_186, %c0_187] : memref<27x4x8xf32, #tpu.memory_space<vmem>>, vector<1x4x8xf32>
    %214 = vector.shape_cast %213 : vector<1x4x8xf32> to vector<4x8xf32>
    %cst_188 = arith.constant dense<0.000000e+00> : vector<64x8xf32>
    %215 = tpu.matmul %212, %214, %cst_188 {dimension_numbers = #tpu.dot_dimension_numbers<[1], [0], [0], [1], [0, 0, 1, 1], [], []>} : vector<64x4xf32>, vector<4x8xf32>, vector<64x8xf32> -> vector<64x8xf32>
    %216 = arith.addf %207, %215 : vector<64x8xf32>
    %c2_i32_189 = arith.constant 2 : i32
    %217 = arith.addi %arg1, %c2_i32_189 : i32
    %c0_190 = arith.constant 0 : index
    %218 = arith.index_cast %217 : i32 to index
    %c2_191 = arith.constant 2 : index
    %c0_192 = arith.constant 0 : index
    %c0_193 = arith.constant 0 : index
    %219 = vector.load %arg2[%c0_190, %218, %c2_191, %c0_192, %c0_193] : memref<1x10x10x10x4xf32, #tpu.memory_space<vmem>>, vector<1x1x8x8x4xf32>
    %220 = vector.shape_cast %219 : vector<1x1x8x8x4xf32> to vector<8x8x4xf32>
    %221 = vector.shape_cast %220 : vector<8x8x4xf32> to vector<64x4xf32>
    %c24 = arith.constant 24 : index
    %c0_194 = arith.constant 0 : index
    %c0_195 = arith.constant 0 : index
    %222 = vector.load %arg3[%c24, %c0_194, %c0_195] : memref<27x4x8xf32, #tpu.memory_space<vmem>>, vector<1x4x8xf32>
    %223 = vector.shape_cast %222 : vector<1x4x8xf32> to vector<4x8xf32>
    %cst_196 = arith.constant dense<0.000000e+00> : vector<64x8xf32>
    %224 = tpu.matmul %221, %223, %cst_196 {dimension_numbers = #tpu.dot_dimension_numbers<[1], [0], [0], [1], [0, 0, 1, 1], [], []>} : vector<64x4xf32>, vector<4x8xf32>, vector<64x8xf32> -> vector<64x8xf32>
    %225 = arith.addf %216, %224 : vector<64x8xf32>
    %c2_i32_197 = arith.constant 2 : i32
    %226 = arith.addi %arg1, %c2_i32_197 : i32
    %c0_198 = arith.constant 0 : index
    %227 = arith.index_cast %226 : i32 to index
    %c2_199 = arith.constant 2 : index
    %c1_200 = arith.constant 1 : index
    %c0_201 = arith.constant 0 : index
    %228 = vector.load %arg2[%c0_198, %227, %c2_199, %c1_200, %c0_201] : memref<1x10x10x10x4xf32, #tpu.memory_space<vmem>>, vector<1x1x8x8x4xf32>
    %229 = vector.shape_cast %228 : vector<1x1x8x8x4xf32> to vector<8x8x4xf32>
    %230 = vector.shape_cast %229 : vector<8x8x4xf32> to vector<64x4xf32>
    %c25 = arith.constant 25 : index
    %c0_202 = arith.constant 0 : index
    %c0_203 = arith.constant 0 : index
    %231 = vector.load %arg3[%c25, %c0_202, %c0_203] : memref<27x4x8xf32, #tpu.memory_space<vmem>>, vector<1x4x8xf32>
    %232 = vector.shape_cast %231 : vector<1x4x8xf32> to vector<4x8xf32>
    %cst_204 = arith.constant dense<0.000000e+00> : vector<64x8xf32>
    %233 = tpu.matmul %230, %232, %cst_204 {dimension_numbers = #tpu.dot_dimension_numbers<[1], [0], [0], [1], [0, 0, 1, 1], [], []>} : vector<64x4xf32>, vector<4x8xf32>, vector<64x8xf32> -> vector<64x8xf32>
    %234 = arith.addf %225, %233 : vector<64x8xf32>
    %c2_i32_205 = arith.constant 2 : i32
    %235 = arith.addi %arg1, %c2_i32_205 : i32
    %c0_206 = arith.constant 0 : index
    %236 = arith.index_cast %235 : i32 to index
    %c2_207 = arith.constant 2 : index
    %c2_208 = arith.constant 2 : index
    %c0_209 = arith.constant 0 : index
    %237 = vector.load %arg2[%c0_206, %236, %c2_207, %c2_208, %c0_209] : memref<1x10x10x10x4xf32, #tpu.memory_space<vmem>>, vector<1x1x8x8x4xf32>
    %238 = vector.shape_cast %237 : vector<1x1x8x8x4xf32> to vector<8x8x4xf32>
    %239 = vector.shape_cast %238 : vector<8x8x4xf32> to vector<64x4xf32>
    %c26 = arith.constant 26 : index
    %c0_210 = arith.constant 0 : index
    %c0_211 = arith.constant 0 : index
    %240 = vector.load %arg3[%c26, %c0_210, %c0_211] : memref<27x4x8xf32, #tpu.memory_space<vmem>>, vector<1x4x8xf32>
    %241 = vector.shape_cast %240 : vector<1x4x8xf32> to vector<4x8xf32>
    %cst_212 = arith.constant dense<0.000000e+00> : vector<64x8xf32>
    %242 = tpu.matmul %239, %241, %cst_212 {dimension_numbers = #tpu.dot_dimension_numbers<[1], [0], [0], [1], [0, 0, 1, 1], [], []>} : vector<64x4xf32>, vector<4x8xf32>, vector<64x8xf32> -> vector<64x8xf32>
    %243 = arith.addf %234, %242 : vector<64x8xf32>
    %c0_213 = arith.constant 0 : index
    %c0_214 = arith.constant 0 : index
    %244 = vector.load %arg4[%c0_213, %c0_214] : memref<1x8xf32, #tpu.memory_space<vmem>>, vector<1x8xf32>
    %245 = vector.broadcast %244 : vector<1x8xf32> to vector<64x8xf32>
    %246 = arith.addf %243, %245 : vector<64x8xf32>
    %cst_215 = arith.constant 0.000000e+00 : f32
    %247 = vector.broadcast %cst_215 : f32 to vector<64x8xf32>
    %248 = arith.cmpf oge, %246, %247 : vector<64x8xf32>
    %cst_216 = arith.constant 0.00999999977 : f32
    %249 = vector.broadcast %cst_216 : f32 to vector<64x8xf32>
    %250 = arith.mulf %249, %246 : vector<64x8xf32>
    %251 = arith.select %248, %246, %250 : vector<64x8xi1>, vector<64x8xf32>
    %252 = vector.shape_cast %251 : vector<64x8xf32> to vector<8x8x8xf32>
    %c0_217 = arith.constant 0 : index
    %c0_218 = arith.constant 0 : index
    %c0_219 = arith.constant 0 : index
    %c0_220 = arith.constant 0 : index
    %c0_221 = arith.constant 0 : index
    %253 = vector.load %arg5[%c0_217, %c0_218, %c0_219, %c0_220, %c0_221] : memref<1x1x8x8x8xf32, #tpu.memory_space<vmem>>, vector<1x1x8x8x8xf32>
    %254 = vector.shape_cast %253 : vector<1x1x8x8x8xf32> to vector<8x8x8xf32>
    %255 = vector.shape_cast %252 : vector<8x8x8xf32> to vector<1x1x8x8x8xf32>
    tpu.vector_store %arg5[%c0_217, %c0_218, %c0_219, %c0_220, %c0_221], %255 {strides = array<i32>} : memref<1x1x8x8x8xf32, #tpu.memory_space<vmem>>, vector<1x1x8x8x8xf32>,
    return
  }
  func.func @transform_0(%arg0: i32, %arg1: i32) -> (i32, i32, i32, i32, i32) {
    %c0_i32 = arith.constant 0 : i32
    %c0_i32_0 = arith.constant 0 : i32
    %c0_i32_1 = arith.constant 0 : i32
    %c0_i32_2 = arith.constant 0 : i32
    %c0_i32_3 = arith.constant 0 : i32
    return %arg0, %c0_i32, %c0_i32_0, %c0_i32_1, %c0_i32_2 : i32, i32, i32, i32, i32
  }
  func.func @transform_1(%arg0: i32, %arg1: i32) -> (i32, i32, i32) {
    %c0_i32 = arith.constant 0 : i32
    %c0_i32_0 = arith.constant 0 : i32
    %c0_i32_1 = arith.constant 0 : i32
    %c0_i32_2 = arith.constant 0 : i32
    return %c0_i32, %c0_i32_0, %c0_i32_1 : i32, i32, i32
  }
  func.func @transform_2(%arg0: i32, %arg1: i32) -> (i32, i32) {
    %c0_i32 = arith.constant 0 : i32
    %c0_i32_0 = arith.constant 0 : i32
    %c0_i32_1 = arith.constant 0 : i32
    return %c0_i32, %c0_i32_0 : i32, i32
  }
  func.func @transform_3(%arg0: i32, %arg1: i32) -> (i32, i32, i32, i32, i32) {
    %c0_i32 = arith.constant 0 : i32
    %c0_i32_0 = arith.constant 0 : i32
    %c0_i32_1 = arith.constant 0 : i32
    %c0_i32_2 = arith.constant 0 : i32
    return %arg0, %arg1, %c0_i32, %c0_i32_0, %c0_i32_1 : i32, i32, i32, i32, i32
  }
}

module attributes {stable_mosaic.version = 11 : i64} {
  func.func @_conv3d_slab_kernel(%arg0: i32, %arg1: i32, %arg2: memref<1x10x10x10x8xf32, #tpu.memory_space<vmem>>, %arg3: memref<27x8x8xf32, #tpu.memory_space<vmem>>, %arg4: memref<1x8xf32, #tpu.memory_space<vmem>>, %arg5: memref<1x1x8x8x8xf32, #tpu.memory_space<vmem>>) attributes {dimension_semantics = [#tpu.dimension_semantics<parallel>, #tpu.dimension_semantics<arbitrary>], iteration_bounds = array<i64: 2, 8>, scalar_prefetch = 0 : i64, scratch_operands = 0 : i64, tpu.core_type = #tpu.core_type<tc>, window_params = [{transform_indices = @transform_0, window_bounds = array<i64: 1, 10, 10, 10, 8>}, {pipeline_mode = #tpu.pipeline_mode<synchronous>, transform_indices = @transform_1, window_bounds = array<i64: 27, 8, 8>}, {pipeline_mode = #tpu.pipeline_mode<synchronous>, transform_indices = @transform_2, window_bounds = array<i64: 1, 8>}, {transform_indices = @transform_3, window_bounds = array<i64: 1, 1, 8, 8, 8>}]} {
    %cst = arith.constant 0.000000e+00 : f32
    %0 = vector.broadcast %cst : f32 to vector<64x8xf32>
    %c0_i32 = arith.constant 0 : i32
    %1 = arith.addi %arg1, %c0_i32 : i32
    %c0 = arith.constant 0 : index
    %2 = arith.index_cast %1 : i32 to index
    %c0_0 = arith.constant 0 : index
    %c0_1 = arith.constant 0 : index
    %c0_2 = arith.constant 0 : index
    %3 = vector.load %arg2[%c0, %2, %c0_0, %c0_1, %c0_2] : memref<1x10x10x10x8xf32, #tpu.memory_space<vmem>>, vector<1x1x8x8x8xf32>
    %4 = vector.shape_cast %3 : vector<1x1x8x8x8xf32> to vector<8x8x8xf32>
    %5 = vector.shape_cast %4 : vector<8x8x8xf32> to vector<64x8xf32>
    %c0_3 = arith.constant 0 : index
    %c0_4 = arith.constant 0 : index
    %c0_5 = arith.constant 0 : index
    %6 = vector.load %arg3[%c0_3, %c0_4, %c0_5] : memref<27x8x8xf32, #tpu.memory_space<vmem>>, vector<1x8x8xf32>
    %7 = vector.shape_cast %6 : vector<1x8x8xf32> to vector<8x8xf32>
    %cst_6 = arith.constant dense<0.000000e+00> : vector<64x8xf32>
    %8 = tpu.matmul %5, %7, %cst_6 {dimension_numbers = #tpu.dot_dimension_numbers<[1], [0], [0], [1], [0, 0, 1, 1], [], []>} : vector<64x8xf32>, vector<8x8xf32>, vector<64x8xf32> -> vector<64x8xf32>
    %9 = arith.addf %0, %8 : vector<64x8xf32>
    %c0_i32_7 = arith.constant 0 : i32
    %10 = arith.addi %arg1, %c0_i32_7 : i32
    %c0_8 = arith.constant 0 : index
    %11 = arith.index_cast %10 : i32 to index
    %c0_9 = arith.constant 0 : index
    %c1 = arith.constant 1 : index
    %c0_10 = arith.constant 0 : index
    %12 = vector.load %arg2[%c0_8, %11, %c0_9, %c1, %c0_10] : memref<1x10x10x10x8xf32, #tpu.memory_space<vmem>>, vector<1x1x8x8x8xf32>
    %13 = vector.shape_cast %12 : vector<1x1x8x8x8xf32> to vector<8x8x8xf32>
    %14 = vector.shape_cast %13 : vector<8x8x8xf32> to vector<64x8xf32>
    %c1_11 = arith.constant 1 : index
    %c0_12 = arith.constant 0 : index
    %c0_13 = arith.constant 0 : index
    %15 = vector.load %arg3[%c1_11, %c0_12, %c0_13] : memref<27x8x8xf32, #tpu.memory_space<vmem>>, vector<1x8x8xf32>
    %16 = vector.shape_cast %15 : vector<1x8x8xf32> to vector<8x8xf32>
    %cst_14 = arith.constant dense<0.000000e+00> : vector<64x8xf32>
    %17 = tpu.matmul %14, %16, %cst_14 {dimension_numbers = #tpu.dot_dimension_numbers<[1], [0], [0], [1], [0, 0, 1, 1], [], []>} : vector<64x8xf32>, vector<8x8xf32>, vector<64x8xf32> -> vector<64x8xf32>
    %18 = arith.addf %9, %17 : vector<64x8xf32>
    %c0_i32_15 = arith.constant 0 : i32
    %19 = arith.addi %arg1, %c0_i32_15 : i32
    %c0_16 = arith.constant 0 : index
    %20 = arith.index_cast %19 : i32 to index
    %c0_17 = arith.constant 0 : index
    %c2 = arith.constant 2 : index
    %c0_18 = arith.constant 0 : index
    %21 = vector.load %arg2[%c0_16, %20, %c0_17, %c2, %c0_18] : memref<1x10x10x10x8xf32, #tpu.memory_space<vmem>>, vector<1x1x8x8x8xf32>
    %22 = vector.shape_cast %21 : vector<1x1x8x8x8xf32> to vector<8x8x8xf32>
    %23 = vector.shape_cast %22 : vector<8x8x8xf32> to vector<64x8xf32>
    %c2_19 = arith.constant 2 : index
    %c0_20 = arith.constant 0 : index
    %c0_21 = arith.constant 0 : index
    %24 = vector.load %arg3[%c2_19, %c0_20, %c0_21] : memref<27x8x8xf32, #tpu.memory_space<vmem>>, vector<1x8x8xf32>
    %25 = vector.shape_cast %24 : vector<1x8x8xf32> to vector<8x8xf32>
    %cst_22 = arith.constant dense<0.000000e+00> : vector<64x8xf32>
    %26 = tpu.matmul %23, %25, %cst_22 {dimension_numbers = #tpu.dot_dimension_numbers<[1], [0], [0], [1], [0, 0, 1, 1], [], []>} : vector<64x8xf32>, vector<8x8xf32>, vector<64x8xf32> -> vector<64x8xf32>
    %27 = arith.addf %18, %26 : vector<64x8xf32>
    %c0_i32_23 = arith.constant 0 : i32
    %28 = arith.addi %arg1, %c0_i32_23 : i32
    %c0_24 = arith.constant 0 : index
    %29 = arith.index_cast %28 : i32 to index
    %c1_25 = arith.constant 1 : index
    %c0_26 = arith.constant 0 : index
    %c0_27 = arith.constant 0 : index
    %30 = vector.load %arg2[%c0_24, %29, %c1_25, %c0_26, %c0_27] : memref<1x10x10x10x8xf32, #tpu.memory_space<vmem>>, vector<1x1x8x8x8xf32>
    %31 = vector.shape_cast %30 : vector<1x1x8x8x8xf32> to vector<8x8x8xf32>
    %32 = vector.shape_cast %31 : vector<8x8x8xf32> to vector<64x8xf32>
    %c3 = arith.constant 3 : index
    %c0_28 = arith.constant 0 : index
    %c0_29 = arith.constant 0 : index
    %33 = vector.load %arg3[%c3, %c0_28, %c0_29] : memref<27x8x8xf32, #tpu.memory_space<vmem>>, vector<1x8x8xf32>
    %34 = vector.shape_cast %33 : vector<1x8x8xf32> to vector<8x8xf32>
    %cst_30 = arith.constant dense<0.000000e+00> : vector<64x8xf32>
    %35 = tpu.matmul %32, %34, %cst_30 {dimension_numbers = #tpu.dot_dimension_numbers<[1], [0], [0], [1], [0, 0, 1, 1], [], []>} : vector<64x8xf32>, vector<8x8xf32>, vector<64x8xf32> -> vector<64x8xf32>
    %36 = arith.addf %27, %35 : vector<64x8xf32>
    %c0_i32_31 = arith.constant 0 : i32
    %37 = arith.addi %arg1, %c0_i32_31 : i32
    %c0_32 = arith.constant 0 : index
    %38 = arith.index_cast %37 : i32 to index
    %c1_33 = arith.constant 1 : index
    %c1_34 = arith.constant 1 : index
    %c0_35 = arith.constant 0 : index
    %39 = vector.load %arg2[%c0_32, %38, %c1_33, %c1_34, %c0_35] : memref<1x10x10x10x8xf32, #tpu.memory_space<vmem>>, vector<1x1x8x8x8xf32>
    %40 = vector.shape_cast %39 : vector<1x1x8x8x8xf32> to vector<8x8x8xf32>
    %41 = vector.shape_cast %40 : vector<8x8x8xf32> to vector<64x8xf32>
    %c4 = arith.constant 4 : index
    %c0_36 = arith.constant 0 : index
    %c0_37 = arith.constant 0 : index
    %42 = vector.load %arg3[%c4, %c0_36, %c0_37] : memref<27x8x8xf32, #tpu.memory_space<vmem>>, vector<1x8x8xf32>
    %43 = vector.shape_cast %42 : vector<1x8x8xf32> to vector<8x8xf32>
    %cst_38 = arith.constant dense<0.000000e+00> : vector<64x8xf32>
    %44 = tpu.matmul %41, %43, %cst_38 {dimension_numbers = #tpu.dot_dimension_numbers<[1], [0], [0], [1], [0, 0, 1, 1], [], []>} : vector<64x8xf32>, vector<8x8xf32>, vector<64x8xf32> -> vector<64x8xf32>
    %45 = arith.addf %36, %44 : vector<64x8xf32>
    %c0_i32_39 = arith.constant 0 : i32
    %46 = arith.addi %arg1, %c0_i32_39 : i32
    %c0_40 = arith.constant 0 : index
    %47 = arith.index_cast %46 : i32 to index
    %c1_41 = arith.constant 1 : index
    %c2_42 = arith.constant 2 : index
    %c0_43 = arith.constant 0 : index
    %48 = vector.load %arg2[%c0_40, %47, %c1_41, %c2_42, %c0_43] : memref<1x10x10x10x8xf32, #tpu.memory_space<vmem>>, vector<1x1x8x8x8xf32>
    %49 = vector.shape_cast %48 : vector<1x1x8x8x8xf32> to vector<8x8x8xf32>
    %50 = vector.shape_cast %49 : vector<8x8x8xf32> to vector<64x8xf32>
    %c5 = arith.constant 5 : index
    %c0_44 = arith.constant 0 : index
    %c0_45 = arith.constant 0 : index
    %51 = vector.load %arg3[%c5, %c0_44, %c0_45] : memref<27x8x8xf32, #tpu.memory_space<vmem>>, vector<1x8x8xf32>
    %52 = vector.shape_cast %51 : vector<1x8x8xf32> to vector<8x8xf32>
    %cst_46 = arith.constant dense<0.000000e+00> : vector<64x8xf32>
    %53 = tpu.matmul %50, %52, %cst_46 {dimension_numbers = #tpu.dot_dimension_numbers<[1], [0], [0], [1], [0, 0, 1, 1], [], []>} : vector<64x8xf32>, vector<8x8xf32>, vector<64x8xf32> -> vector<64x8xf32>
    %54 = arith.addf %45, %53 : vector<64x8xf32>
    %c0_i32_47 = arith.constant 0 : i32
    %55 = arith.addi %arg1, %c0_i32_47 : i32
    %c0_48 = arith.constant 0 : index
    %56 = arith.index_cast %55 : i32 to index
    %c2_49 = arith.constant 2 : index
    %c0_50 = arith.constant 0 : index
    %c0_51 = arith.constant 0 : index
    %57 = vector.load %arg2[%c0_48, %56, %c2_49, %c0_50, %c0_51] : memref<1x10x10x10x8xf32, #tpu.memory_space<vmem>>, vector<1x1x8x8x8xf32>
    %58 = vector.shape_cast %57 : vector<1x1x8x8x8xf32> to vector<8x8x8xf32>
    %59 = vector.shape_cast %58 : vector<8x8x8xf32> to vector<64x8xf32>
    %c6 = arith.constant 6 : index
    %c0_52 = arith.constant 0 : index
    %c0_53 = arith.constant 0 : index
    %60 = vector.load %arg3[%c6, %c0_52, %c0_53] : memref<27x8x8xf32, #tpu.memory_space<vmem>>, vector<1x8x8xf32>
    %61 = vector.shape_cast %60 : vector<1x8x8xf32> to vector<8x8xf32>
    %cst_54 = arith.constant dense<0.000000e+00> : vector<64x8xf32>
    %62 = tpu.matmul %59, %61, %cst_54 {dimension_numbers = #tpu.dot_dimension_numbers<[1], [0], [0], [1], [0, 0, 1, 1], [], []>} : vector<64x8xf32>, vector<8x8xf32>, vector<64x8xf32> -> vector<64x8xf32>
    %63 = arith.addf %54, %62 : vector<64x8xf32>
    %c0_i32_55 = arith.constant 0 : i32
    %64 = arith.addi %arg1, %c0_i32_55 : i32
    %c0_56 = arith.constant 0 : index
    %65 = arith.index_cast %64 : i32 to index
    %c2_57 = arith.constant 2 : index
    %c1_58 = arith.constant 1 : index
    %c0_59 = arith.constant 0 : index
    %66 = vector.load %arg2[%c0_56, %65, %c2_57, %c1_58, %c0_59] : memref<1x10x10x10x8xf32, #tpu.memory_space<vmem>>, vector<1x1x8x8x8xf32>
    %67 = vector.shape_cast %66 : vector<1x1x8x8x8xf32> to vector<8x8x8xf32>
    %68 = vector.shape_cast %67 : vector<8x8x8xf32> to vector<64x8xf32>
    %c7 = arith.constant 7 : index
    %c0_60 = arith.constant 0 : index
    %c0_61 = arith.constant 0 : index
    %69 = vector.load %arg3[%c7, %c0_60, %c0_61] : memref<27x8x8xf32, #tpu.memory_space<vmem>>, vector<1x8x8xf32>
    %70 = vector.shape_cast %69 : vector<1x8x8xf32> to vector<8x8xf32>
    %cst_62 = arith.constant dense<0.000000e+00> : vector<64x8xf32>
    %71 = tpu.matmul %68, %70, %cst_62 {dimension_numbers = #tpu.dot_dimension_numbers<[1], [0], [0], [1], [0, 0, 1, 1], [], []>} : vector<64x8xf32>, vector<8x8xf32>, vector<64x8xf32> -> vector<64x8xf32>
    %72 = arith.addf %63, %71 : vector<64x8xf32>
    %c0_i32_63 = arith.constant 0 : i32
    %73 = arith.addi %arg1, %c0_i32_63 : i32
    %c0_64 = arith.constant 0 : index
    %74 = arith.index_cast %73 : i32 to index
    %c2_65 = arith.constant 2 : index
    %c2_66 = arith.constant 2 : index
    %c0_67 = arith.constant 0 : index
    %75 = vector.load %arg2[%c0_64, %74, %c2_65, %c2_66, %c0_67] : memref<1x10x10x10x8xf32, #tpu.memory_space<vmem>>, vector<1x1x8x8x8xf32>
    %76 = vector.shape_cast %75 : vector<1x1x8x8x8xf32> to vector<8x8x8xf32>
    %77 = vector.shape_cast %76 : vector<8x8x8xf32> to vector<64x8xf32>
    %c8 = arith.constant 8 : index
    %c0_68 = arith.constant 0 : index
    %c0_69 = arith.constant 0 : index
    %78 = vector.load %arg3[%c8, %c0_68, %c0_69] : memref<27x8x8xf32, #tpu.memory_space<vmem>>, vector<1x8x8xf32>
    %79 = vector.shape_cast %78 : vector<1x8x8xf32> to vector<8x8xf32>
    %cst_70 = arith.constant dense<0.000000e+00> : vector<64x8xf32>
    %80 = tpu.matmul %77, %79, %cst_70 {dimension_numbers = #tpu.dot_dimension_numbers<[1], [0], [0], [1], [0, 0, 1, 1], [], []>} : vector<64x8xf32>, vector<8x8xf32>, vector<64x8xf32> -> vector<64x8xf32>
    %81 = arith.addf %72, %80 : vector<64x8xf32>
    %c1_i32 = arith.constant 1 : i32
    %82 = arith.addi %arg1, %c1_i32 : i32
    %c0_71 = arith.constant 0 : index
    %83 = arith.index_cast %82 : i32 to index
    %c0_72 = arith.constant 0 : index
    %c0_73 = arith.constant 0 : index
    %c0_74 = arith.constant 0 : index
    %84 = vector.load %arg2[%c0_71, %83, %c0_72, %c0_73, %c0_74] : memref<1x10x10x10x8xf32, #tpu.memory_space<vmem>>, vector<1x1x8x8x8xf32>
    %85 = vector.shape_cast %84 : vector<1x1x8x8x8xf32> to vector<8x8x8xf32>
    %86 = vector.shape_cast %85 : vector<8x8x8xf32> to vector<64x8xf32>
    %c9 = arith.constant 9 : index
    %c0_75 = arith.constant 0 : index
    %c0_76 = arith.constant 0 : index
    %87 = vector.load %arg3[%c9, %c0_75, %c0_76] : memref<27x8x8xf32, #tpu.memory_space<vmem>>, vector<1x8x8xf32>
    %88 = vector.shape_cast %87 : vector<1x8x8xf32> to vector<8x8xf32>
    %cst_77 = arith.constant dense<0.000000e+00> : vector<64x8xf32>
    %89 = tpu.matmul %86, %88, %cst_77 {dimension_numbers = #tpu.dot_dimension_numbers<[1], [0], [0], [1], [0, 0, 1, 1], [], []>} : vector<64x8xf32>, vector<8x8xf32>, vector<64x8xf32> -> vector<64x8xf32>
    %90 = arith.addf %81, %89 : vector<64x8xf32>
    %c1_i32_78 = arith.constant 1 : i32
    %91 = arith.addi %arg1, %c1_i32_78 : i32
    %c0_79 = arith.constant 0 : index
    %92 = arith.index_cast %91 : i32 to index
    %c0_80 = arith.constant 0 : index
    %c1_81 = arith.constant 1 : index
    %c0_82 = arith.constant 0 : index
    %93 = vector.load %arg2[%c0_79, %92, %c0_80, %c1_81, %c0_82] : memref<1x10x10x10x8xf32, #tpu.memory_space<vmem>>, vector<1x1x8x8x8xf32>
    %94 = vector.shape_cast %93 : vector<1x1x8x8x8xf32> to vector<8x8x8xf32>
    %95 = vector.shape_cast %94 : vector<8x8x8xf32> to vector<64x8xf32>
    %c10 = arith.constant 10 : index
    %c0_83 = arith.constant 0 : index
    %c0_84 = arith.constant 0 : index
    %96 = vector.load %arg3[%c10, %c0_83, %c0_84] : memref<27x8x8xf32, #tpu.memory_space<vmem>>, vector<1x8x8xf32>
    %97 = vector.shape_cast %96 : vector<1x8x8xf32> to vector<8x8xf32>
    %cst_85 = arith.constant dense<0.000000e+00> : vector<64x8xf32>
    %98 = tpu.matmul %95, %97, %cst_85 {dimension_numbers = #tpu.dot_dimension_numbers<[1], [0], [0], [1], [0, 0, 1, 1], [], []>} : vector<64x8xf32>, vector<8x8xf32>, vector<64x8xf32> -> vector<64x8xf32>
    %99 = arith.addf %90, %98 : vector<64x8xf32>
    %c1_i32_86 = arith.constant 1 : i32
    %100 = arith.addi %arg1, %c1_i32_86 : i32
    %c0_87 = arith.constant 0 : index
    %101 = arith.index_cast %100 : i32 to index
    %c0_88 = arith.constant 0 : index
    %c2_89 = arith.constant 2 : index
    %c0_90 = arith.constant 0 : index
    %102 = vector.load %arg2[%c0_87, %101, %c0_88, %c2_89, %c0_90] : memref<1x10x10x10x8xf32, #tpu.memory_space<vmem>>, vector<1x1x8x8x8xf32>
    %103 = vector.shape_cast %102 : vector<1x1x8x8x8xf32> to vector<8x8x8xf32>
    %104 = vector.shape_cast %103 : vector<8x8x8xf32> to vector<64x8xf32>
    %c11 = arith.constant 11 : index
    %c0_91 = arith.constant 0 : index
    %c0_92 = arith.constant 0 : index
    %105 = vector.load %arg3[%c11, %c0_91, %c0_92] : memref<27x8x8xf32, #tpu.memory_space<vmem>>, vector<1x8x8xf32>
    %106 = vector.shape_cast %105 : vector<1x8x8xf32> to vector<8x8xf32>
    %cst_93 = arith.constant dense<0.000000e+00> : vector<64x8xf32>
    %107 = tpu.matmul %104, %106, %cst_93 {dimension_numbers = #tpu.dot_dimension_numbers<[1], [0], [0], [1], [0, 0, 1, 1], [], []>} : vector<64x8xf32>, vector<8x8xf32>, vector<64x8xf32> -> vector<64x8xf32>
    %108 = arith.addf %99, %107 : vector<64x8xf32>
    %c1_i32_94 = arith.constant 1 : i32
    %109 = arith.addi %arg1, %c1_i32_94 : i32
    %c0_95 = arith.constant 0 : index
    %110 = arith.index_cast %109 : i32 to index
    %c1_96 = arith.constant 1 : index
    %c0_97 = arith.constant 0 : index
    %c0_98 = arith.constant 0 : index
    %111 = vector.load %arg2[%c0_95, %110, %c1_96, %c0_97, %c0_98] : memref<1x10x10x10x8xf32, #tpu.memory_space<vmem>>, vector<1x1x8x8x8xf32>
    %112 = vector.shape_cast %111 : vector<1x1x8x8x8xf32> to vector<8x8x8xf32>
    %113 = vector.shape_cast %112 : vector<8x8x8xf32> to vector<64x8xf32>
    %c12 = arith.constant 12 : index
    %c0_99 = arith.constant 0 : index
    %c0_100 = arith.constant 0 : index
    %114 = vector.load %arg3[%c12, %c0_99, %c0_100] : memref<27x8x8xf32, #tpu.memory_space<vmem>>, vector<1x8x8xf32>
    %115 = vector.shape_cast %114 : vector<1x8x8xf32> to vector<8x8xf32>
    %cst_101 = arith.constant dense<0.000000e+00> : vector<64x8xf32>
    %116 = tpu.matmul %113, %115, %cst_101 {dimension_numbers = #tpu.dot_dimension_numbers<[1], [0], [0], [1], [0, 0, 1, 1], [], []>} : vector<64x8xf32>, vector<8x8xf32>, vector<64x8xf32> -> vector<64x8xf32>
    %117 = arith.addf %108, %116 : vector<64x8xf32>
    %c1_i32_102 = arith.constant 1 : i32
    %118 = arith.addi %arg1, %c1_i32_102 : i32
    %c0_103 = arith.constant 0 : index
    %119 = arith.index_cast %118 : i32 to index
    %c1_104 = arith.constant 1 : index
    %c1_105 = arith.constant 1 : index
    %c0_106 = arith.constant 0 : index
    %120 = vector.load %arg2[%c0_103, %119, %c1_104, %c1_105, %c0_106] : memref<1x10x10x10x8xf32, #tpu.memory_space<vmem>>, vector<1x1x8x8x8xf32>
    %121 = vector.shape_cast %120 : vector<1x1x8x8x8xf32> to vector<8x8x8xf32>
    %122 = vector.shape_cast %121 : vector<8x8x8xf32> to vector<64x8xf32>
    %c13 = arith.constant 13 : index
    %c0_107 = arith.constant 0 : index
    %c0_108 = arith.constant 0 : index
    %123 = vector.load %arg3[%c13, %c0_107, %c0_108] : memref<27x8x8xf32, #tpu.memory_space<vmem>>, vector<1x8x8xf32>
    %124 = vector.shape_cast %123 : vector<1x8x8xf32> to vector<8x8xf32>
    %cst_109 = arith.constant dense<0.000000e+00> : vector<64x8xf32>
    %125 = tpu.matmul %122, %124, %cst_109 {dimension_numbers = #tpu.dot_dimension_numbers<[1], [0], [0], [1], [0, 0, 1, 1], [], []>} : vector<64x8xf32>, vector<8x8xf32>, vector<64x8xf32> -> vector<64x8xf32>
    %126 = arith.addf %117, %125 : vector<64x8xf32>
    %c1_i32_110 = arith.constant 1 : i32
    %127 = arith.addi %arg1, %c1_i32_110 : i32
    %c0_111 = arith.constant 0 : index
    %128 = arith.index_cast %127 : i32 to index
    %c1_112 = arith.constant 1 : index
    %c2_113 = arith.constant 2 : index
    %c0_114 = arith.constant 0 : index
    %129 = vector.load %arg2[%c0_111, %128, %c1_112, %c2_113, %c0_114] : memref<1x10x10x10x8xf32, #tpu.memory_space<vmem>>, vector<1x1x8x8x8xf32>
    %130 = vector.shape_cast %129 : vector<1x1x8x8x8xf32> to vector<8x8x8xf32>
    %131 = vector.shape_cast %130 : vector<8x8x8xf32> to vector<64x8xf32>
    %c14 = arith.constant 14 : index
    %c0_115 = arith.constant 0 : index
    %c0_116 = arith.constant 0 : index
    %132 = vector.load %arg3[%c14, %c0_115, %c0_116] : memref<27x8x8xf32, #tpu.memory_space<vmem>>, vector<1x8x8xf32>
    %133 = vector.shape_cast %132 : vector<1x8x8xf32> to vector<8x8xf32>
    %cst_117 = arith.constant dense<0.000000e+00> : vector<64x8xf32>
    %134 = tpu.matmul %131, %133, %cst_117 {dimension_numbers = #tpu.dot_dimension_numbers<[1], [0], [0], [1], [0, 0, 1, 1], [], []>} : vector<64x8xf32>, vector<8x8xf32>, vector<64x8xf32> -> vector<64x8xf32>
    %135 = arith.addf %126, %134 : vector<64x8xf32>
    %c1_i32_118 = arith.constant 1 : i32
    %136 = arith.addi %arg1, %c1_i32_118 : i32
    %c0_119 = arith.constant 0 : index
    %137 = arith.index_cast %136 : i32 to index
    %c2_120 = arith.constant 2 : index
    %c0_121 = arith.constant 0 : index
    %c0_122 = arith.constant 0 : index
    %138 = vector.load %arg2[%c0_119, %137, %c2_120, %c0_121, %c0_122] : memref<1x10x10x10x8xf32, #tpu.memory_space<vmem>>, vector<1x1x8x8x8xf32>
    %139 = vector.shape_cast %138 : vector<1x1x8x8x8xf32> to vector<8x8x8xf32>
    %140 = vector.shape_cast %139 : vector<8x8x8xf32> to vector<64x8xf32>
    %c15 = arith.constant 15 : index
    %c0_123 = arith.constant 0 : index
    %c0_124 = arith.constant 0 : index
    %141 = vector.load %arg3[%c15, %c0_123, %c0_124] : memref<27x8x8xf32, #tpu.memory_space<vmem>>, vector<1x8x8xf32>
    %142 = vector.shape_cast %141 : vector<1x8x8xf32> to vector<8x8xf32>
    %cst_125 = arith.constant dense<0.000000e+00> : vector<64x8xf32>
    %143 = tpu.matmul %140, %142, %cst_125 {dimension_numbers = #tpu.dot_dimension_numbers<[1], [0], [0], [1], [0, 0, 1, 1], [], []>} : vector<64x8xf32>, vector<8x8xf32>, vector<64x8xf32> -> vector<64x8xf32>
    %144 = arith.addf %135, %143 : vector<64x8xf32>
    %c1_i32_126 = arith.constant 1 : i32
    %145 = arith.addi %arg1, %c1_i32_126 : i32
    %c0_127 = arith.constant 0 : index
    %146 = arith.index_cast %145 : i32 to index
    %c2_128 = arith.constant 2 : index
    %c1_129 = arith.constant 1 : index
    %c0_130 = arith.constant 0 : index
    %147 = vector.load %arg2[%c0_127, %146, %c2_128, %c1_129, %c0_130] : memref<1x10x10x10x8xf32, #tpu.memory_space<vmem>>, vector<1x1x8x8x8xf32>
    %148 = vector.shape_cast %147 : vector<1x1x8x8x8xf32> to vector<8x8x8xf32>
    %149 = vector.shape_cast %148 : vector<8x8x8xf32> to vector<64x8xf32>
    %c16 = arith.constant 16 : index
    %c0_131 = arith.constant 0 : index
    %c0_132 = arith.constant 0 : index
    %150 = vector.load %arg3[%c16, %c0_131, %c0_132] : memref<27x8x8xf32, #tpu.memory_space<vmem>>, vector<1x8x8xf32>
    %151 = vector.shape_cast %150 : vector<1x8x8xf32> to vector<8x8xf32>
    %cst_133 = arith.constant dense<0.000000e+00> : vector<64x8xf32>
    %152 = tpu.matmul %149, %151, %cst_133 {dimension_numbers = #tpu.dot_dimension_numbers<[1], [0], [0], [1], [0, 0, 1, 1], [], []>} : vector<64x8xf32>, vector<8x8xf32>, vector<64x8xf32> -> vector<64x8xf32>
    %153 = arith.addf %144, %152 : vector<64x8xf32>
    %c1_i32_134 = arith.constant 1 : i32
    %154 = arith.addi %arg1, %c1_i32_134 : i32
    %c0_135 = arith.constant 0 : index
    %155 = arith.index_cast %154 : i32 to index
    %c2_136 = arith.constant 2 : index
    %c2_137 = arith.constant 2 : index
    %c0_138 = arith.constant 0 : index
    %156 = vector.load %arg2[%c0_135, %155, %c2_136, %c2_137, %c0_138] : memref<1x10x10x10x8xf32, #tpu.memory_space<vmem>>, vector<1x1x8x8x8xf32>
    %157 = vector.shape_cast %156 : vector<1x1x8x8x8xf32> to vector<8x8x8xf32>
    %158 = vector.shape_cast %157 : vector<8x8x8xf32> to vector<64x8xf32>
    %c17 = arith.constant 17 : index
    %c0_139 = arith.constant 0 : index
    %c0_140 = arith.constant 0 : index
    %159 = vector.load %arg3[%c17, %c0_139, %c0_140] : memref<27x8x8xf32, #tpu.memory_space<vmem>>, vector<1x8x8xf32>
    %160 = vector.shape_cast %159 : vector<1x8x8xf32> to vector<8x8xf32>
    %cst_141 = arith.constant dense<0.000000e+00> : vector<64x8xf32>
    %161 = tpu.matmul %158, %160, %cst_141 {dimension_numbers = #tpu.dot_dimension_numbers<[1], [0], [0], [1], [0, 0, 1, 1], [], []>} : vector<64x8xf32>, vector<8x8xf32>, vector<64x8xf32> -> vector<64x8xf32>
    %162 = arith.addf %153, %161 : vector<64x8xf32>
    %c2_i32 = arith.constant 2 : i32
    %163 = arith.addi %arg1, %c2_i32 : i32
    %c0_142 = arith.constant 0 : index
    %164 = arith.index_cast %163 : i32 to index
    %c0_143 = arith.constant 0 : index
    %c0_144 = arith.constant 0 : index
    %c0_145 = arith.constant 0 : index
    %165 = vector.load %arg2[%c0_142, %164, %c0_143, %c0_144, %c0_145] : memref<1x10x10x10x8xf32, #tpu.memory_space<vmem>>, vector<1x1x8x8x8xf32>
    %166 = vector.shape_cast %165 : vector<1x1x8x8x8xf32> to vector<8x8x8xf32>
    %167 = vector.shape_cast %166 : vector<8x8x8xf32> to vector<64x8xf32>
    %c18 = arith.constant 18 : index
    %c0_146 = arith.constant 0 : index
    %c0_147 = arith.constant 0 : index
    %168 = vector.load %arg3[%c18, %c0_146, %c0_147] : memref<27x8x8xf32, #tpu.memory_space<vmem>>, vector<1x8x8xf32>
    %169 = vector.shape_cast %168 : vector<1x8x8xf32> to vector<8x8xf32>
    %cst_148 = arith.constant dense<0.000000e+00> : vector<64x8xf32>
    %170 = tpu.matmul %167, %169, %cst_148 {dimension_numbers = #tpu.dot_dimension_numbers<[1], [0], [0], [1], [0, 0, 1, 1], [], []>} : vector<64x8xf32>, vector<8x8xf32>, vector<64x8xf32> -> vector<64x8xf32>
    %171 = arith.addf %162, %170 : vector<64x8xf32>
    %c2_i32_149 = arith.constant 2 : i32
    %172 = arith.addi %arg1, %c2_i32_149 : i32
    %c0_150 = arith.constant 0 : index
    %173 = arith.index_cast %172 : i32 to index
    %c0_151 = arith.constant 0 : index
    %c1_152 = arith.constant 1 : index
    %c0_153 = arith.constant 0 : index
    %174 = vector.load %arg2[%c0_150, %173, %c0_151, %c1_152, %c0_153] : memref<1x10x10x10x8xf32, #tpu.memory_space<vmem>>, vector<1x1x8x8x8xf32>
    %175 = vector.shape_cast %174 : vector<1x1x8x8x8xf32> to vector<8x8x8xf32>
    %176 = vector.shape_cast %175 : vector<8x8x8xf32> to vector<64x8xf32>
    %c19 = arith.constant 19 : index
    %c0_154 = arith.constant 0 : index
    %c0_155 = arith.constant 0 : index
    %177 = vector.load %arg3[%c19, %c0_154, %c0_155] : memref<27x8x8xf32, #tpu.memory_space<vmem>>, vector<1x8x8xf32>
    %178 = vector.shape_cast %177 : vector<1x8x8xf32> to vector<8x8xf32>
    %cst_156 = arith.constant dense<0.000000e+00> : vector<64x8xf32>
    %179 = tpu.matmul %176, %178, %cst_156 {dimension_numbers = #tpu.dot_dimension_numbers<[1], [0], [0], [1], [0, 0, 1, 1], [], []>} : vector<64x8xf32>, vector<8x8xf32>, vector<64x8xf32> -> vector<64x8xf32>
    %180 = arith.addf %171, %179 : vector<64x8xf32>
    %c2_i32_157 = arith.constant 2 : i32
    %181 = arith.addi %arg1, %c2_i32_157 : i32
    %c0_158 = arith.constant 0 : index
    %182 = arith.index_cast %181 : i32 to index
    %c0_159 = arith.constant 0 : index
    %c2_160 = arith.constant 2 : index
    %c0_161 = arith.constant 0 : index
    %183 = vector.load %arg2[%c0_158, %182, %c0_159, %c2_160, %c0_161] : memref<1x10x10x10x8xf32, #tpu.memory_space<vmem>>, vector<1x1x8x8x8xf32>
    %184 = vector.shape_cast %183 : vector<1x1x8x8x8xf32> to vector<8x8x8xf32>
    %185 = vector.shape_cast %184 : vector<8x8x8xf32> to vector<64x8xf32>
    %c20 = arith.constant 20 : index
    %c0_162 = arith.constant 0 : index
    %c0_163 = arith.constant 0 : index
    %186 = vector.load %arg3[%c20, %c0_162, %c0_163] : memref<27x8x8xf32, #tpu.memory_space<vmem>>, vector<1x8x8xf32>
    %187 = vector.shape_cast %186 : vector<1x8x8xf32> to vector<8x8xf32>
    %cst_164 = arith.constant dense<0.000000e+00> : vector<64x8xf32>
    %188 = tpu.matmul %185, %187, %cst_164 {dimension_numbers = #tpu.dot_dimension_numbers<[1], [0], [0], [1], [0, 0, 1, 1], [], []>} : vector<64x8xf32>, vector<8x8xf32>, vector<64x8xf32> -> vector<64x8xf32>
    %189 = arith.addf %180, %188 : vector<64x8xf32>
    %c2_i32_165 = arith.constant 2 : i32
    %190 = arith.addi %arg1, %c2_i32_165 : i32
    %c0_166 = arith.constant 0 : index
    %191 = arith.index_cast %190 : i32 to index
    %c1_167 = arith.constant 1 : index
    %c0_168 = arith.constant 0 : index
    %c0_169 = arith.constant 0 : index
    %192 = vector.load %arg2[%c0_166, %191, %c1_167, %c0_168, %c0_169] : memref<1x10x10x10x8xf32, #tpu.memory_space<vmem>>, vector<1x1x8x8x8xf32>
    %193 = vector.shape_cast %192 : vector<1x1x8x8x8xf32> to vector<8x8x8xf32>
    %194 = vector.shape_cast %193 : vector<8x8x8xf32> to vector<64x8xf32>
    %c21 = arith.constant 21 : index
    %c0_170 = arith.constant 0 : index
    %c0_171 = arith.constant 0 : index
    %195 = vector.load %arg3[%c21, %c0_170, %c0_171] : memref<27x8x8xf32, #tpu.memory_space<vmem>>, vector<1x8x8xf32>
    %196 = vector.shape_cast %195 : vector<1x8x8xf32> to vector<8x8xf32>
    %cst_172 = arith.constant dense<0.000000e+00> : vector<64x8xf32>
    %197 = tpu.matmul %194, %196, %cst_172 {dimension_numbers = #tpu.dot_dimension_numbers<[1], [0], [0], [1], [0, 0, 1, 1], [], []>} : vector<64x8xf32>, vector<8x8xf32>, vector<64x8xf32> -> vector<64x8xf32>
    %198 = arith.addf %189, %197 : vector<64x8xf32>
    %c2_i32_173 = arith.constant 2 : i32
    %199 = arith.addi %arg1, %c2_i32_173 : i32
    %c0_174 = arith.constant 0 : index
    %200 = arith.index_cast %199 : i32 to index
    %c1_175 = arith.constant 1 : index
    %c1_176 = arith.constant 1 : index
    %c0_177 = arith.constant 0 : index
    %201 = vector.load %arg2[%c0_174, %200, %c1_175, %c1_176, %c0_177] : memref<1x10x10x10x8xf32, #tpu.memory_space<vmem>>, vector<1x1x8x8x8xf32>
    %202 = vector.shape_cast %201 : vector<1x1x8x8x8xf32> to vector<8x8x8xf32>
    %203 = vector.shape_cast %202 : vector<8x8x8xf32> to vector<64x8xf32>
    %c22 = arith.constant 22 : index
    %c0_178 = arith.constant 0 : index
    %c0_179 = arith.constant 0 : index
    %204 = vector.load %arg3[%c22, %c0_178, %c0_179] : memref<27x8x8xf32, #tpu.memory_space<vmem>>, vector<1x8x8xf32>
    %205 = vector.shape_cast %204 : vector<1x8x8xf32> to vector<8x8xf32>
    %cst_180 = arith.constant dense<0.000000e+00> : vector<64x8xf32>
    %206 = tpu.matmul %203, %205, %cst_180 {dimension_numbers = #tpu.dot_dimension_numbers<[1], [0], [0], [1], [0, 0, 1, 1], [], []>} : vector<64x8xf32>, vector<8x8xf32>, vector<64x8xf32> -> vector<64x8xf32>
    %207 = arith.addf %198, %206 : vector<64x8xf32>
    %c2_i32_181 = arith.constant 2 : i32
    %208 = arith.addi %arg1, %c2_i32_181 : i32
    %c0_182 = arith.constant 0 : index
    %209 = arith.index_cast %208 : i32 to index
    %c1_183 = arith.constant 1 : index
    %c2_184 = arith.constant 2 : index
    %c0_185 = arith.constant 0 : index
    %210 = vector.load %arg2[%c0_182, %209, %c1_183, %c2_184, %c0_185] : memref<1x10x10x10x8xf32, #tpu.memory_space<vmem>>, vector<1x1x8x8x8xf32>
    %211 = vector.shape_cast %210 : vector<1x1x8x8x8xf32> to vector<8x8x8xf32>
    %212 = vector.shape_cast %211 : vector<8x8x8xf32> to vector<64x8xf32>
    %c23 = arith.constant 23 : index
    %c0_186 = arith.constant 0 : index
    %c0_187 = arith.constant 0 : index
    %213 = vector.load %arg3[%c23, %c0_186, %c0_187] : memref<27x8x8xf32, #tpu.memory_space<vmem>>, vector<1x8x8xf32>
    %214 = vector.shape_cast %213 : vector<1x8x8xf32> to vector<8x8xf32>
    %cst_188 = arith.constant dense<0.000000e+00> : vector<64x8xf32>
    %215 = tpu.matmul %212, %214, %cst_188 {dimension_numbers = #tpu.dot_dimension_numbers<[1], [0], [0], [1], [0, 0, 1, 1], [], []>} : vector<64x8xf32>, vector<8x8xf32>, vector<64x8xf32> -> vector<64x8xf32>
    %216 = arith.addf %207, %215 : vector<64x8xf32>
    %c2_i32_189 = arith.constant 2 : i32
    %217 = arith.addi %arg1, %c2_i32_189 : i32
    %c0_190 = arith.constant 0 : index
    %218 = arith.index_cast %217 : i32 to index
    %c2_191 = arith.constant 2 : index
    %c0_192 = arith.constant 0 : index
    %c0_193 = arith.constant 0 : index
    %219 = vector.load %arg2[%c0_190, %218, %c2_191, %c0_192, %c0_193] : memref<1x10x10x10x8xf32, #tpu.memory_space<vmem>>, vector<1x1x8x8x8xf32>
    %220 = vector.shape_cast %219 : vector<1x1x8x8x8xf32> to vector<8x8x8xf32>
    %221 = vector.shape_cast %220 : vector<8x8x8xf32> to vector<64x8xf32>
    %c24 = arith.constant 24 : index
    %c0_194 = arith.constant 0 : index
    %c0_195 = arith.constant 0 : index
    %222 = vector.load %arg3[%c24, %c0_194, %c0_195] : memref<27x8x8xf32, #tpu.memory_space<vmem>>, vector<1x8x8xf32>
    %223 = vector.shape_cast %222 : vector<1x8x8xf32> to vector<8x8xf32>
    %cst_196 = arith.constant dense<0.000000e+00> : vector<64x8xf32>
    %224 = tpu.matmul %221, %223, %cst_196 {dimension_numbers = #tpu.dot_dimension_numbers<[1], [0], [0], [1], [0, 0, 1, 1], [], []>} : vector<64x8xf32>, vector<8x8xf32>, vector<64x8xf32> -> vector<64x8xf32>
    %225 = arith.addf %216, %224 : vector<64x8xf32>
    %c2_i32_197 = arith.constant 2 : i32
    %226 = arith.addi %arg1, %c2_i32_197 : i32
    %c0_198 = arith.constant 0 : index
    %227 = arith.index_cast %226 : i32 to index
    %c2_199 = arith.constant 2 : index
    %c1_200 = arith.constant 1 : index
    %c0_201 = arith.constant 0 : index
    %228 = vector.load %arg2[%c0_198, %227, %c2_199, %c1_200, %c0_201] : memref<1x10x10x10x8xf32, #tpu.memory_space<vmem>>, vector<1x1x8x8x8xf32>
    %229 = vector.shape_cast %228 : vector<1x1x8x8x8xf32> to vector<8x8x8xf32>
    %230 = vector.shape_cast %229 : vector<8x8x8xf32> to vector<64x8xf32>
    %c25 = arith.constant 25 : index
    %c0_202 = arith.constant 0 : index
    %c0_203 = arith.constant 0 : index
    %231 = vector.load %arg3[%c25, %c0_202, %c0_203] : memref<27x8x8xf32, #tpu.memory_space<vmem>>, vector<1x8x8xf32>
    %232 = vector.shape_cast %231 : vector<1x8x8xf32> to vector<8x8xf32>
    %cst_204 = arith.constant dense<0.000000e+00> : vector<64x8xf32>
    %233 = tpu.matmul %230, %232, %cst_204 {dimension_numbers = #tpu.dot_dimension_numbers<[1], [0], [0], [1], [0, 0, 1, 1], [], []>} : vector<64x8xf32>, vector<8x8xf32>, vector<64x8xf32> -> vector<64x8xf32>
    %234 = arith.addf %225, %233 : vector<64x8xf32>
    %c2_i32_205 = arith.constant 2 : i32
    %235 = arith.addi %arg1, %c2_i32_205 : i32
    %c0_206 = arith.constant 0 : index
    %236 = arith.index_cast %235 : i32 to index
    %c2_207 = arith.constant 2 : index
    %c2_208 = arith.constant 2 : index
    %c0_209 = arith.constant 0 : index
    %237 = vector.load %arg2[%c0_206, %236, %c2_207, %c2_208, %c0_209] : memref<1x10x10x10x8xf32, #tpu.memory_space<vmem>>, vector<1x1x8x8x8xf32>
    %238 = vector.shape_cast %237 : vector<1x1x8x8x8xf32> to vector<8x8x8xf32>
    %239 = vector.shape_cast %238 : vector<8x8x8xf32> to vector<64x8xf32>
    %c26 = arith.constant 26 : index
    %c0_210 = arith.constant 0 : index
    %c0_211 = arith.constant 0 : index
    %240 = vector.load %arg3[%c26, %c0_210, %c0_211] : memref<27x8x8xf32, #tpu.memory_space<vmem>>, vector<1x8x8xf32>
    %241 = vector.shape_cast %240 : vector<1x8x8xf32> to vector<8x8xf32>
    %cst_212 = arith.constant dense<0.000000e+00> : vector<64x8xf32>
    %242 = tpu.matmul %239, %241, %cst_212 {dimension_numbers = #tpu.dot_dimension_numbers<[1], [0], [0], [1], [0, 0, 1, 1], [], []>} : vector<64x8xf32>, vector<8x8xf32>, vector<64x8xf32> -> vector<64x8xf32>
    %243 = arith.addf %234, %242 : vector<64x8xf32>
    %c0_213 = arith.constant 0 : index
    %c0_214 = arith.constant 0 : index
    %244 = vector.load %arg4[%c0_213, %c0_214] : memref<1x8xf32, #tpu.memory_space<vmem>>, vector<1x8xf32>
    %245 = vector.broadcast %244 : vector<1x8xf32> to vector<64x8xf32>
    %246 = arith.addf %243, %245 : vector<64x8xf32>
    %cst_215 = arith.constant 0.000000e+00 : f32
    %247 = vector.broadcast %cst_215 : f32 to vector<64x8xf32>
    %248 = arith.cmpf oge, %246, %247 : vector<64x8xf32>
    %cst_216 = arith.constant 0.00999999977 : f32
    %249 = vector.broadcast %cst_216 : f32 to vector<64x8xf32>
    %250 = arith.mulf %249, %246 : vector<64x8xf32>
    %251 = arith.select %248, %246, %250 : vector<64x8xi1>, vector<64x8xf32>
    %252 = vector.shape_cast %251 : vector<64x8xf32> to vector<8x8x8xf32>
    %c0_217 = arith.constant 0 : index
    %c0_218 = arith.constant 0 : index
    %c0_219 = arith.constant 0 : index
    %c0_220 = arith.constant 0 : index
    %c0_221 = arith.constant 0 : index
    %253 = vector.load %arg5[%c0_217, %c0_218, %c0_219, %c0_220, %c0_221] : memref<1x1x8x8x8xf32, #tpu.memory_space<vmem>>, vector<1x1x8x8x8xf32>
    %254 = vector.shape_cast %253 : vector<1x1x8x8x8xf32> to vector<8x8x8xf32>
    %255 = vector.shape_cast %252 : vector<8x8x8xf32> to vector<1x1x8x8x8xf32>
    tpu.vector_store %arg5[%c0_217, %c0_218, %c0_219, %c0_220, %c0_221], %255 {strides = array<i32>} : memref<1x1x8x8x8xf32, #tpu.memory_space<vmem>>, vector<1x1x8x8x8xf32>,
    return
  }
  func.func @transform_0(%arg0: i32, %arg1: i32) -> (i32, i32, i32, i32, i32) {
    %c0_i32 = arith.constant 0 : i32
    %c0_i32_0 = arith.constant 0 : i32
    %c0_i32_1 = arith.constant 0 : i32
    %c0_i32_2 = arith.constant 0 : i32
    %c0_i32_3 = arith.constant 0 : i32
    return %arg0, %c0_i32, %c0_i32_0, %c0_i32_1, %c0_i32_2 : i32, i32, i32, i32, i32
  }
  func.func @transform_1(%arg0: i32, %arg1: i32) -> (i32, i32, i32) {
    %c0_i32 = arith.constant 0 : i32
    %c0_i32_0 = arith.constant 0 : i32
    %c0_i32_1 = arith.constant 0 : i32
    %c0_i32_2 = arith.constant 0 : i32
    return %c0_i32, %c0_i32_0, %c0_i32_1 : i32, i32, i32
  }
  func.func @transform_2(%arg0: i32, %arg1: i32) -> (i32, i32) {
    %c0_i32 = arith.constant 0 : i32
    %c0_i32_0 = arith.constant 0 : i32
    %c0_i32_1 = arith.constant 0 : i32
    return %c0_i32, %c0_i32_0 : i32, i32
  }
  func.func @transform_3(%arg0: i32, %arg1: i32) -> (i32, i32, i32, i32, i32) {
    %c0_i32 = arith.constant 0 : i32
    %c0_i32_0 = arith.constant 0 : i32
    %c0_i32_1 = arith.constant 0 : i32
    %c0_i32_2 = arith.constant 0 : i32
    return %arg0, %arg1, %c0_i32, %c0_i32_0, %c0_i32_1 : i32, i32, i32, i32, i32
  }
}

module attributes {stable_mosaic.version = 11 : i64} {
  func.func @_conv3d_slab_kernel(%arg0: i32, %arg1: i32, %arg2: memref<1x10x10x10x8xf32, #tpu.memory_space<vmem>>, %arg3: memref<27x8x8xf32, #tpu.memory_space<vmem>>, %arg4: memref<1x8xf32, #tpu.memory_space<vmem>>, %arg5: memref<1x1x8x8x8xf32, #tpu.memory_space<vmem>>) attributes {dimension_semantics = [#tpu.dimension_semantics<parallel>, #tpu.dimension_semantics<arbitrary>], iteration_bounds = array<i64: 2, 8>, scalar_prefetch = 0 : i64, scratch_operands = 0 : i64, tpu.core_type = #tpu.core_type<tc>, window_params = [{transform_indices = @transform_0, window_bounds = array<i64: 1, 10, 10, 10, 8>}, {pipeline_mode = #tpu.pipeline_mode<synchronous>, transform_indices = @transform_1, window_bounds = array<i64: 27, 8, 8>}, {pipeline_mode = #tpu.pipeline_mode<synchronous>, transform_indices = @transform_2, window_bounds = array<i64: 1, 8>}, {transform_indices = @transform_3, window_bounds = array<i64: 1, 1, 8, 8, 8>}]} {
    %cst = arith.constant 0.000000e+00 : f32
    %0 = vector.broadcast %cst : f32 to vector<64x8xf32>
    %c0_i32 = arith.constant 0 : i32
    %1 = arith.addi %arg1, %c0_i32 : i32
    %c0 = arith.constant 0 : index
    %2 = arith.index_cast %1 : i32 to index
    %c0_0 = arith.constant 0 : index
    %c0_1 = arith.constant 0 : index
    %c0_2 = arith.constant 0 : index
    %3 = vector.load %arg2[%c0, %2, %c0_0, %c0_1, %c0_2] : memref<1x10x10x10x8xf32, #tpu.memory_space<vmem>>, vector<1x1x8x8x8xf32>
    %4 = vector.shape_cast %3 : vector<1x1x8x8x8xf32> to vector<8x8x8xf32>
    %5 = vector.shape_cast %4 : vector<8x8x8xf32> to vector<64x8xf32>
    %c0_3 = arith.constant 0 : index
    %c0_4 = arith.constant 0 : index
    %c0_5 = arith.constant 0 : index
    %6 = vector.load %arg3[%c0_3, %c0_4, %c0_5] : memref<27x8x8xf32, #tpu.memory_space<vmem>>, vector<1x8x8xf32>
    %7 = vector.shape_cast %6 : vector<1x8x8xf32> to vector<8x8xf32>
    %cst_6 = arith.constant dense<0.000000e+00> : vector<64x8xf32>
    %8 = tpu.matmul %5, %7, %cst_6 {dimension_numbers = #tpu.dot_dimension_numbers<[1], [0], [0], [1], [0, 0, 1, 1], [], []>} : vector<64x8xf32>, vector<8x8xf32>, vector<64x8xf32> -> vector<64x8xf32>
    %9 = arith.addf %0, %8 : vector<64x8xf32>
    %c0_i32_7 = arith.constant 0 : i32
    %10 = arith.addi %arg1, %c0_i32_7 : i32
    %c0_8 = arith.constant 0 : index
    %11 = arith.index_cast %10 : i32 to index
    %c0_9 = arith.constant 0 : index
    %c1 = arith.constant 1 : index
    %c0_10 = arith.constant 0 : index
    %12 = vector.load %arg2[%c0_8, %11, %c0_9, %c1, %c0_10] : memref<1x10x10x10x8xf32, #tpu.memory_space<vmem>>, vector<1x1x8x8x8xf32>
    %13 = vector.shape_cast %12 : vector<1x1x8x8x8xf32> to vector<8x8x8xf32>
    %14 = vector.shape_cast %13 : vector<8x8x8xf32> to vector<64x8xf32>
    %c1_11 = arith.constant 1 : index
    %c0_12 = arith.constant 0 : index
    %c0_13 = arith.constant 0 : index
    %15 = vector.load %arg3[%c1_11, %c0_12, %c0_13] : memref<27x8x8xf32, #tpu.memory_space<vmem>>, vector<1x8x8xf32>
    %16 = vector.shape_cast %15 : vector<1x8x8xf32> to vector<8x8xf32>
    %cst_14 = arith.constant dense<0.000000e+00> : vector<64x8xf32>
    %17 = tpu.matmul %14, %16, %cst_14 {dimension_numbers = #tpu.dot_dimension_numbers<[1], [0], [0], [1], [0, 0, 1, 1], [], []>} : vector<64x8xf32>, vector<8x8xf32>, vector<64x8xf32> -> vector<64x8xf32>
    %18 = arith.addf %9, %17 : vector<64x8xf32>
    %c0_i32_15 = arith.constant 0 : i32
    %19 = arith.addi %arg1, %c0_i32_15 : i32
    %c0_16 = arith.constant 0 : index
    %20 = arith.index_cast %19 : i32 to index
    %c0_17 = arith.constant 0 : index
    %c2 = arith.constant 2 : index
    %c0_18 = arith.constant 0 : index
    %21 = vector.load %arg2[%c0_16, %20, %c0_17, %c2, %c0_18] : memref<1x10x10x10x8xf32, #tpu.memory_space<vmem>>, vector<1x1x8x8x8xf32>
    %22 = vector.shape_cast %21 : vector<1x1x8x8x8xf32> to vector<8x8x8xf32>
    %23 = vector.shape_cast %22 : vector<8x8x8xf32> to vector<64x8xf32>
    %c2_19 = arith.constant 2 : index
    %c0_20 = arith.constant 0 : index
    %c0_21 = arith.constant 0 : index
    %24 = vector.load %arg3[%c2_19, %c0_20, %c0_21] : memref<27x8x8xf32, #tpu.memory_space<vmem>>, vector<1x8x8xf32>
    %25 = vector.shape_cast %24 : vector<1x8x8xf32> to vector<8x8xf32>
    %cst_22 = arith.constant dense<0.000000e+00> : vector<64x8xf32>
    %26 = tpu.matmul %23, %25, %cst_22 {dimension_numbers = #tpu.dot_dimension_numbers<[1], [0], [0], [1], [0, 0, 1, 1], [], []>} : vector<64x8xf32>, vector<8x8xf32>, vector<64x8xf32> -> vector<64x8xf32>
    %27 = arith.addf %18, %26 : vector<64x8xf32>
    %c0_i32_23 = arith.constant 0 : i32
    %28 = arith.addi %arg1, %c0_i32_23 : i32
    %c0_24 = arith.constant 0 : index
    %29 = arith.index_cast %28 : i32 to index
    %c1_25 = arith.constant 1 : index
    %c0_26 = arith.constant 0 : index
    %c0_27 = arith.constant 0 : index
    %30 = vector.load %arg2[%c0_24, %29, %c1_25, %c0_26, %c0_27] : memref<1x10x10x10x8xf32, #tpu.memory_space<vmem>>, vector<1x1x8x8x8xf32>
    %31 = vector.shape_cast %30 : vector<1x1x8x8x8xf32> to vector<8x8x8xf32>
    %32 = vector.shape_cast %31 : vector<8x8x8xf32> to vector<64x8xf32>
    %c3 = arith.constant 3 : index
    %c0_28 = arith.constant 0 : index
    %c0_29 = arith.constant 0 : index
    %33 = vector.load %arg3[%c3, %c0_28, %c0_29] : memref<27x8x8xf32, #tpu.memory_space<vmem>>, vector<1x8x8xf32>
    %34 = vector.shape_cast %33 : vector<1x8x8xf32> to vector<8x8xf32>
    %cst_30 = arith.constant dense<0.000000e+00> : vector<64x8xf32>
    %35 = tpu.matmul %32, %34, %cst_30 {dimension_numbers = #tpu.dot_dimension_numbers<[1], [0], [0], [1], [0, 0, 1, 1], [], []>} : vector<64x8xf32>, vector<8x8xf32>, vector<64x8xf32> -> vector<64x8xf32>
    %36 = arith.addf %27, %35 : vector<64x8xf32>
    %c0_i32_31 = arith.constant 0 : i32
    %37 = arith.addi %arg1, %c0_i32_31 : i32
    %c0_32 = arith.constant 0 : index
    %38 = arith.index_cast %37 : i32 to index
    %c1_33 = arith.constant 1 : index
    %c1_34 = arith.constant 1 : index
    %c0_35 = arith.constant 0 : index
    %39 = vector.load %arg2[%c0_32, %38, %c1_33, %c1_34, %c0_35] : memref<1x10x10x10x8xf32, #tpu.memory_space<vmem>>, vector<1x1x8x8x8xf32>
    %40 = vector.shape_cast %39 : vector<1x1x8x8x8xf32> to vector<8x8x8xf32>
    %41 = vector.shape_cast %40 : vector<8x8x8xf32> to vector<64x8xf32>
    %c4 = arith.constant 4 : index
    %c0_36 = arith.constant 0 : index
    %c0_37 = arith.constant 0 : index
    %42 = vector.load %arg3[%c4, %c0_36, %c0_37] : memref<27x8x8xf32, #tpu.memory_space<vmem>>, vector<1x8x8xf32>
    %43 = vector.shape_cast %42 : vector<1x8x8xf32> to vector<8x8xf32>
    %cst_38 = arith.constant dense<0.000000e+00> : vector<64x8xf32>
    %44 = tpu.matmul %41, %43, %cst_38 {dimension_numbers = #tpu.dot_dimension_numbers<[1], [0], [0], [1], [0, 0, 1, 1], [], []>} : vector<64x8xf32>, vector<8x8xf32>, vector<64x8xf32> -> vector<64x8xf32>
    %45 = arith.addf %36, %44 : vector<64x8xf32>
    %c0_i32_39 = arith.constant 0 : i32
    %46 = arith.addi %arg1, %c0_i32_39 : i32
    %c0_40 = arith.constant 0 : index
    %47 = arith.index_cast %46 : i32 to index
    %c1_41 = arith.constant 1 : index
    %c2_42 = arith.constant 2 : index
    %c0_43 = arith.constant 0 : index
    %48 = vector.load %arg2[%c0_40, %47, %c1_41, %c2_42, %c0_43] : memref<1x10x10x10x8xf32, #tpu.memory_space<vmem>>, vector<1x1x8x8x8xf32>
    %49 = vector.shape_cast %48 : vector<1x1x8x8x8xf32> to vector<8x8x8xf32>
    %50 = vector.shape_cast %49 : vector<8x8x8xf32> to vector<64x8xf32>
    %c5 = arith.constant 5 : index
    %c0_44 = arith.constant 0 : index
    %c0_45 = arith.constant 0 : index
    %51 = vector.load %arg3[%c5, %c0_44, %c0_45] : memref<27x8x8xf32, #tpu.memory_space<vmem>>, vector<1x8x8xf32>
    %52 = vector.shape_cast %51 : vector<1x8x8xf32> to vector<8x8xf32>
    %cst_46 = arith.constant dense<0.000000e+00> : vector<64x8xf32>
    %53 = tpu.matmul %50, %52, %cst_46 {dimension_numbers = #tpu.dot_dimension_numbers<[1], [0], [0], [1], [0, 0, 1, 1], [], []>} : vector<64x8xf32>, vector<8x8xf32>, vector<64x8xf32> -> vector<64x8xf32>
    %54 = arith.addf %45, %53 : vector<64x8xf32>
    %c0_i32_47 = arith.constant 0 : i32
    %55 = arith.addi %arg1, %c0_i32_47 : i32
    %c0_48 = arith.constant 0 : index
    %56 = arith.index_cast %55 : i32 to index
    %c2_49 = arith.constant 2 : index
    %c0_50 = arith.constant 0 : index
    %c0_51 = arith.constant 0 : index
    %57 = vector.load %arg2[%c0_48, %56, %c2_49, %c0_50, %c0_51] : memref<1x10x10x10x8xf32, #tpu.memory_space<vmem>>, vector<1x1x8x8x8xf32>
    %58 = vector.shape_cast %57 : vector<1x1x8x8x8xf32> to vector<8x8x8xf32>
    %59 = vector.shape_cast %58 : vector<8x8x8xf32> to vector<64x8xf32>
    %c6 = arith.constant 6 : index
    %c0_52 = arith.constant 0 : index
    %c0_53 = arith.constant 0 : index
    %60 = vector.load %arg3[%c6, %c0_52, %c0_53] : memref<27x8x8xf32, #tpu.memory_space<vmem>>, vector<1x8x8xf32>
    %61 = vector.shape_cast %60 : vector<1x8x8xf32> to vector<8x8xf32>
    %cst_54 = arith.constant dense<0.000000e+00> : vector<64x8xf32>
    %62 = tpu.matmul %59, %61, %cst_54 {dimension_numbers = #tpu.dot_dimension_numbers<[1], [0], [0], [1], [0, 0, 1, 1], [], []>} : vector<64x8xf32>, vector<8x8xf32>, vector<64x8xf32> -> vector<64x8xf32>
    %63 = arith.addf %54, %62 : vector<64x8xf32>
    %c0_i32_55 = arith.constant 0 : i32
    %64 = arith.addi %arg1, %c0_i32_55 : i32
    %c0_56 = arith.constant 0 : index
    %65 = arith.index_cast %64 : i32 to index
    %c2_57 = arith.constant 2 : index
    %c1_58 = arith.constant 1 : index
    %c0_59 = arith.constant 0 : index
    %66 = vector.load %arg2[%c0_56, %65, %c2_57, %c1_58, %c0_59] : memref<1x10x10x10x8xf32, #tpu.memory_space<vmem>>, vector<1x1x8x8x8xf32>
    %67 = vector.shape_cast %66 : vector<1x1x8x8x8xf32> to vector<8x8x8xf32>
    %68 = vector.shape_cast %67 : vector<8x8x8xf32> to vector<64x8xf32>
    %c7 = arith.constant 7 : index
    %c0_60 = arith.constant 0 : index
    %c0_61 = arith.constant 0 : index
    %69 = vector.load %arg3[%c7, %c0_60, %c0_61] : memref<27x8x8xf32, #tpu.memory_space<vmem>>, vector<1x8x8xf32>
    %70 = vector.shape_cast %69 : vector<1x8x8xf32> to vector<8x8xf32>
    %cst_62 = arith.constant dense<0.000000e+00> : vector<64x8xf32>
    %71 = tpu.matmul %68, %70, %cst_62 {dimension_numbers = #tpu.dot_dimension_numbers<[1], [0], [0], [1], [0, 0, 1, 1], [], []>} : vector<64x8xf32>, vector<8x8xf32>, vector<64x8xf32> -> vector<64x8xf32>
    %72 = arith.addf %63, %71 : vector<64x8xf32>
    %c0_i32_63 = arith.constant 0 : i32
    %73 = arith.addi %arg1, %c0_i32_63 : i32
    %c0_64 = arith.constant 0 : index
    %74 = arith.index_cast %73 : i32 to index
    %c2_65 = arith.constant 2 : index
    %c2_66 = arith.constant 2 : index
    %c0_67 = arith.constant 0 : index
    %75 = vector.load %arg2[%c0_64, %74, %c2_65, %c2_66, %c0_67] : memref<1x10x10x10x8xf32, #tpu.memory_space<vmem>>, vector<1x1x8x8x8xf32>
    %76 = vector.shape_cast %75 : vector<1x1x8x8x8xf32> to vector<8x8x8xf32>
    %77 = vector.shape_cast %76 : vector<8x8x8xf32> to vector<64x8xf32>
    %c8 = arith.constant 8 : index
    %c0_68 = arith.constant 0 : index
    %c0_69 = arith.constant 0 : index
    %78 = vector.load %arg3[%c8, %c0_68, %c0_69] : memref<27x8x8xf32, #tpu.memory_space<vmem>>, vector<1x8x8xf32>
    %79 = vector.shape_cast %78 : vector<1x8x8xf32> to vector<8x8xf32>
    %cst_70 = arith.constant dense<0.000000e+00> : vector<64x8xf32>
    %80 = tpu.matmul %77, %79, %cst_70 {dimension_numbers = #tpu.dot_dimension_numbers<[1], [0], [0], [1], [0, 0, 1, 1], [], []>} : vector<64x8xf32>, vector<8x8xf32>, vector<64x8xf32> -> vector<64x8xf32>
    %81 = arith.addf %72, %80 : vector<64x8xf32>
    %c1_i32 = arith.constant 1 : i32
    %82 = arith.addi %arg1, %c1_i32 : i32
    %c0_71 = arith.constant 0 : index
    %83 = arith.index_cast %82 : i32 to index
    %c0_72 = arith.constant 0 : index
    %c0_73 = arith.constant 0 : index
    %c0_74 = arith.constant 0 : index
    %84 = vector.load %arg2[%c0_71, %83, %c0_72, %c0_73, %c0_74] : memref<1x10x10x10x8xf32, #tpu.memory_space<vmem>>, vector<1x1x8x8x8xf32>
    %85 = vector.shape_cast %84 : vector<1x1x8x8x8xf32> to vector<8x8x8xf32>
    %86 = vector.shape_cast %85 : vector<8x8x8xf32> to vector<64x8xf32>
    %c9 = arith.constant 9 : index
    %c0_75 = arith.constant 0 : index
    %c0_76 = arith.constant 0 : index
    %87 = vector.load %arg3[%c9, %c0_75, %c0_76] : memref<27x8x8xf32, #tpu.memory_space<vmem>>, vector<1x8x8xf32>
    %88 = vector.shape_cast %87 : vector<1x8x8xf32> to vector<8x8xf32>
    %cst_77 = arith.constant dense<0.000000e+00> : vector<64x8xf32>
    %89 = tpu.matmul %86, %88, %cst_77 {dimension_numbers = #tpu.dot_dimension_numbers<[1], [0], [0], [1], [0, 0, 1, 1], [], []>} : vector<64x8xf32>, vector<8x8xf32>, vector<64x8xf32> -> vector<64x8xf32>
    %90 = arith.addf %81, %89 : vector<64x8xf32>
    %c1_i32_78 = arith.constant 1 : i32
    %91 = arith.addi %arg1, %c1_i32_78 : i32
    %c0_79 = arith.constant 0 : index
    %92 = arith.index_cast %91 : i32 to index
    %c0_80 = arith.constant 0 : index
    %c1_81 = arith.constant 1 : index
    %c0_82 = arith.constant 0 : index
    %93 = vector.load %arg2[%c0_79, %92, %c0_80, %c1_81, %c0_82] : memref<1x10x10x10x8xf32, #tpu.memory_space<vmem>>, vector<1x1x8x8x8xf32>
    %94 = vector.shape_cast %93 : vector<1x1x8x8x8xf32> to vector<8x8x8xf32>
    %95 = vector.shape_cast %94 : vector<8x8x8xf32> to vector<64x8xf32>
    %c10 = arith.constant 10 : index
    %c0_83 = arith.constant 0 : index
    %c0_84 = arith.constant 0 : index
    %96 = vector.load %arg3[%c10, %c0_83, %c0_84] : memref<27x8x8xf32, #tpu.memory_space<vmem>>, vector<1x8x8xf32>
    %97 = vector.shape_cast %96 : vector<1x8x8xf32> to vector<8x8xf32>
    %cst_85 = arith.constant dense<0.000000e+00> : vector<64x8xf32>
    %98 = tpu.matmul %95, %97, %cst_85 {dimension_numbers = #tpu.dot_dimension_numbers<[1], [0], [0], [1], [0, 0, 1, 1], [], []>} : vector<64x8xf32>, vector<8x8xf32>, vector<64x8xf32> -> vector<64x8xf32>
    %99 = arith.addf %90, %98 : vector<64x8xf32>
    %c1_i32_86 = arith.constant 1 : i32
    %100 = arith.addi %arg1, %c1_i32_86 : i32
    %c0_87 = arith.constant 0 : index
    %101 = arith.index_cast %100 : i32 to index
    %c0_88 = arith.constant 0 : index
    %c2_89 = arith.constant 2 : index
    %c0_90 = arith.constant 0 : index
    %102 = vector.load %arg2[%c0_87, %101, %c0_88, %c2_89, %c0_90] : memref<1x10x10x10x8xf32, #tpu.memory_space<vmem>>, vector<1x1x8x8x8xf32>
    %103 = vector.shape_cast %102 : vector<1x1x8x8x8xf32> to vector<8x8x8xf32>
    %104 = vector.shape_cast %103 : vector<8x8x8xf32> to vector<64x8xf32>
    %c11 = arith.constant 11 : index
    %c0_91 = arith.constant 0 : index
    %c0_92 = arith.constant 0 : index
    %105 = vector.load %arg3[%c11, %c0_91, %c0_92] : memref<27x8x8xf32, #tpu.memory_space<vmem>>, vector<1x8x8xf32>
    %106 = vector.shape_cast %105 : vector<1x8x8xf32> to vector<8x8xf32>
    %cst_93 = arith.constant dense<0.000000e+00> : vector<64x8xf32>
    %107 = tpu.matmul %104, %106, %cst_93 {dimension_numbers = #tpu.dot_dimension_numbers<[1], [0], [0], [1], [0, 0, 1, 1], [], []>} : vector<64x8xf32>, vector<8x8xf32>, vector<64x8xf32> -> vector<64x8xf32>
    %108 = arith.addf %99, %107 : vector<64x8xf32>
    %c1_i32_94 = arith.constant 1 : i32
    %109 = arith.addi %arg1, %c1_i32_94 : i32
    %c0_95 = arith.constant 0 : index
    %110 = arith.index_cast %109 : i32 to index
    %c1_96 = arith.constant 1 : index
    %c0_97 = arith.constant 0 : index
    %c0_98 = arith.constant 0 : index
    %111 = vector.load %arg2[%c0_95, %110, %c1_96, %c0_97, %c0_98] : memref<1x10x10x10x8xf32, #tpu.memory_space<vmem>>, vector<1x1x8x8x8xf32>
    %112 = vector.shape_cast %111 : vector<1x1x8x8x8xf32> to vector<8x8x8xf32>
    %113 = vector.shape_cast %112 : vector<8x8x8xf32> to vector<64x8xf32>
    %c12 = arith.constant 12 : index
    %c0_99 = arith.constant 0 : index
    %c0_100 = arith.constant 0 : index
    %114 = vector.load %arg3[%c12, %c0_99, %c0_100] : memref<27x8x8xf32, #tpu.memory_space<vmem>>, vector<1x8x8xf32>
    %115 = vector.shape_cast %114 : vector<1x8x8xf32> to vector<8x8xf32>
    %cst_101 = arith.constant dense<0.000000e+00> : vector<64x8xf32>
    %116 = tpu.matmul %113, %115, %cst_101 {dimension_numbers = #tpu.dot_dimension_numbers<[1], [0], [0], [1], [0, 0, 1, 1], [], []>} : vector<64x8xf32>, vector<8x8xf32>, vector<64x8xf32> -> vector<64x8xf32>
    %117 = arith.addf %108, %116 : vector<64x8xf32>
    %c1_i32_102 = arith.constant 1 : i32
    %118 = arith.addi %arg1, %c1_i32_102 : i32
    %c0_103 = arith.constant 0 : index
    %119 = arith.index_cast %118 : i32 to index
    %c1_104 = arith.constant 1 : index
    %c1_105 = arith.constant 1 : index
    %c0_106 = arith.constant 0 : index
    %120 = vector.load %arg2[%c0_103, %119, %c1_104, %c1_105, %c0_106] : memref<1x10x10x10x8xf32, #tpu.memory_space<vmem>>, vector<1x1x8x8x8xf32>
    %121 = vector.shape_cast %120 : vector<1x1x8x8x8xf32> to vector<8x8x8xf32>
    %122 = vector.shape_cast %121 : vector<8x8x8xf32> to vector<64x8xf32>
    %c13 = arith.constant 13 : index
    %c0_107 = arith.constant 0 : index
    %c0_108 = arith.constant 0 : index
    %123 = vector.load %arg3[%c13, %c0_107, %c0_108] : memref<27x8x8xf32, #tpu.memory_space<vmem>>, vector<1x8x8xf32>
    %124 = vector.shape_cast %123 : vector<1x8x8xf32> to vector<8x8xf32>
    %cst_109 = arith.constant dense<0.000000e+00> : vector<64x8xf32>
    %125 = tpu.matmul %122, %124, %cst_109 {dimension_numbers = #tpu.dot_dimension_numbers<[1], [0], [0], [1], [0, 0, 1, 1], [], []>} : vector<64x8xf32>, vector<8x8xf32>, vector<64x8xf32> -> vector<64x8xf32>
    %126 = arith.addf %117, %125 : vector<64x8xf32>
    %c1_i32_110 = arith.constant 1 : i32
    %127 = arith.addi %arg1, %c1_i32_110 : i32
    %c0_111 = arith.constant 0 : index
    %128 = arith.index_cast %127 : i32 to index
    %c1_112 = arith.constant 1 : index
    %c2_113 = arith.constant 2 : index
    %c0_114 = arith.constant 0 : index
    %129 = vector.load %arg2[%c0_111, %128, %c1_112, %c2_113, %c0_114] : memref<1x10x10x10x8xf32, #tpu.memory_space<vmem>>, vector<1x1x8x8x8xf32>
    %130 = vector.shape_cast %129 : vector<1x1x8x8x8xf32> to vector<8x8x8xf32>
    %131 = vector.shape_cast %130 : vector<8x8x8xf32> to vector<64x8xf32>
    %c14 = arith.constant 14 : index
    %c0_115 = arith.constant 0 : index
    %c0_116 = arith.constant 0 : index
    %132 = vector.load %arg3[%c14, %c0_115, %c0_116] : memref<27x8x8xf32, #tpu.memory_space<vmem>>, vector<1x8x8xf32>
    %133 = vector.shape_cast %132 : vector<1x8x8xf32> to vector<8x8xf32>
    %cst_117 = arith.constant dense<0.000000e+00> : vector<64x8xf32>
    %134 = tpu.matmul %131, %133, %cst_117 {dimension_numbers = #tpu.dot_dimension_numbers<[1], [0], [0], [1], [0, 0, 1, 1], [], []>} : vector<64x8xf32>, vector<8x8xf32>, vector<64x8xf32> -> vector<64x8xf32>
    %135 = arith.addf %126, %134 : vector<64x8xf32>
    %c1_i32_118 = arith.constant 1 : i32
    %136 = arith.addi %arg1, %c1_i32_118 : i32
    %c0_119 = arith.constant 0 : index
    %137 = arith.index_cast %136 : i32 to index
    %c2_120 = arith.constant 2 : index
    %c0_121 = arith.constant 0 : index
    %c0_122 = arith.constant 0 : index
    %138 = vector.load %arg2[%c0_119, %137, %c2_120, %c0_121, %c0_122] : memref<1x10x10x10x8xf32, #tpu.memory_space<vmem>>, vector<1x1x8x8x8xf32>
    %139 = vector.shape_cast %138 : vector<1x1x8x8x8xf32> to vector<8x8x8xf32>
    %140 = vector.shape_cast %139 : vector<8x8x8xf32> to vector<64x8xf32>
    %c15 = arith.constant 15 : index
    %c0_123 = arith.constant 0 : index
    %c0_124 = arith.constant 0 : index
    %141 = vector.load %arg3[%c15, %c0_123, %c0_124] : memref<27x8x8xf32, #tpu.memory_space<vmem>>, vector<1x8x8xf32>
    %142 = vector.shape_cast %141 : vector<1x8x8xf32> to vector<8x8xf32>
    %cst_125 = arith.constant dense<0.000000e+00> : vector<64x8xf32>
    %143 = tpu.matmul %140, %142, %cst_125 {dimension_numbers = #tpu.dot_dimension_numbers<[1], [0], [0], [1], [0, 0, 1, 1], [], []>} : vector<64x8xf32>, vector<8x8xf32>, vector<64x8xf32> -> vector<64x8xf32>
    %144 = arith.addf %135, %143 : vector<64x8xf32>
    %c1_i32_126 = arith.constant 1 : i32
    %145 = arith.addi %arg1, %c1_i32_126 : i32
    %c0_127 = arith.constant 0 : index
    %146 = arith.index_cast %145 : i32 to index
    %c2_128 = arith.constant 2 : index
    %c1_129 = arith.constant 1 : index
    %c0_130 = arith.constant 0 : index
    %147 = vector.load %arg2[%c0_127, %146, %c2_128, %c1_129, %c0_130] : memref<1x10x10x10x8xf32, #tpu.memory_space<vmem>>, vector<1x1x8x8x8xf32>
    %148 = vector.shape_cast %147 : vector<1x1x8x8x8xf32> to vector<8x8x8xf32>
    %149 = vector.shape_cast %148 : vector<8x8x8xf32> to vector<64x8xf32>
    %c16 = arith.constant 16 : index
    %c0_131 = arith.constant 0 : index
    %c0_132 = arith.constant 0 : index
    %150 = vector.load %arg3[%c16, %c0_131, %c0_132] : memref<27x8x8xf32, #tpu.memory_space<vmem>>, vector<1x8x8xf32>
    %151 = vector.shape_cast %150 : vector<1x8x8xf32> to vector<8x8xf32>
    %cst_133 = arith.constant dense<0.000000e+00> : vector<64x8xf32>
    %152 = tpu.matmul %149, %151, %cst_133 {dimension_numbers = #tpu.dot_dimension_numbers<[1], [0], [0], [1], [0, 0, 1, 1], [], []>} : vector<64x8xf32>, vector<8x8xf32>, vector<64x8xf32> -> vector<64x8xf32>
    %153 = arith.addf %144, %152 : vector<64x8xf32>
    %c1_i32_134 = arith.constant 1 : i32
    %154 = arith.addi %arg1, %c1_i32_134 : i32
    %c0_135 = arith.constant 0 : index
    %155 = arith.index_cast %154 : i32 to index
    %c2_136 = arith.constant 2 : index
    %c2_137 = arith.constant 2 : index
    %c0_138 = arith.constant 0 : index
    %156 = vector.load %arg2[%c0_135, %155, %c2_136, %c2_137, %c0_138] : memref<1x10x10x10x8xf32, #tpu.memory_space<vmem>>, vector<1x1x8x8x8xf32>
    %157 = vector.shape_cast %156 : vector<1x1x8x8x8xf32> to vector<8x8x8xf32>
    %158 = vector.shape_cast %157 : vector<8x8x8xf32> to vector<64x8xf32>
    %c17 = arith.constant 17 : index
    %c0_139 = arith.constant 0 : index
    %c0_140 = arith.constant 0 : index
    %159 = vector.load %arg3[%c17, %c0_139, %c0_140] : memref<27x8x8xf32, #tpu.memory_space<vmem>>, vector<1x8x8xf32>
    %160 = vector.shape_cast %159 : vector<1x8x8xf32> to vector<8x8xf32>
    %cst_141 = arith.constant dense<0.000000e+00> : vector<64x8xf32>
    %161 = tpu.matmul %158, %160, %cst_141 {dimension_numbers = #tpu.dot_dimension_numbers<[1], [0], [0], [1], [0, 0, 1, 1], [], []>} : vector<64x8xf32>, vector<8x8xf32>, vector<64x8xf32> -> vector<64x8xf32>
    %162 = arith.addf %153, %161 : vector<64x8xf32>
    %c2_i32 = arith.constant 2 : i32
    %163 = arith.addi %arg1, %c2_i32 : i32
    %c0_142 = arith.constant 0 : index
    %164 = arith.index_cast %163 : i32 to index
    %c0_143 = arith.constant 0 : index
    %c0_144 = arith.constant 0 : index
    %c0_145 = arith.constant 0 : index
    %165 = vector.load %arg2[%c0_142, %164, %c0_143, %c0_144, %c0_145] : memref<1x10x10x10x8xf32, #tpu.memory_space<vmem>>, vector<1x1x8x8x8xf32>
    %166 = vector.shape_cast %165 : vector<1x1x8x8x8xf32> to vector<8x8x8xf32>
    %167 = vector.shape_cast %166 : vector<8x8x8xf32> to vector<64x8xf32>
    %c18 = arith.constant 18 : index
    %c0_146 = arith.constant 0 : index
    %c0_147 = arith.constant 0 : index
    %168 = vector.load %arg3[%c18, %c0_146, %c0_147] : memref<27x8x8xf32, #tpu.memory_space<vmem>>, vector<1x8x8xf32>
    %169 = vector.shape_cast %168 : vector<1x8x8xf32> to vector<8x8xf32>
    %cst_148 = arith.constant dense<0.000000e+00> : vector<64x8xf32>
    %170 = tpu.matmul %167, %169, %cst_148 {dimension_numbers = #tpu.dot_dimension_numbers<[1], [0], [0], [1], [0, 0, 1, 1], [], []>} : vector<64x8xf32>, vector<8x8xf32>, vector<64x8xf32> -> vector<64x8xf32>
    %171 = arith.addf %162, %170 : vector<64x8xf32>
    %c2_i32_149 = arith.constant 2 : i32
    %172 = arith.addi %arg1, %c2_i32_149 : i32
    %c0_150 = arith.constant 0 : index
    %173 = arith.index_cast %172 : i32 to index
    %c0_151 = arith.constant 0 : index
    %c1_152 = arith.constant 1 : index
    %c0_153 = arith.constant 0 : index
    %174 = vector.load %arg2[%c0_150, %173, %c0_151, %c1_152, %c0_153] : memref<1x10x10x10x8xf32, #tpu.memory_space<vmem>>, vector<1x1x8x8x8xf32>
    %175 = vector.shape_cast %174 : vector<1x1x8x8x8xf32> to vector<8x8x8xf32>
    %176 = vector.shape_cast %175 : vector<8x8x8xf32> to vector<64x8xf32>
    %c19 = arith.constant 19 : index
    %c0_154 = arith.constant 0 : index
    %c0_155 = arith.constant 0 : index
    %177 = vector.load %arg3[%c19, %c0_154, %c0_155] : memref<27x8x8xf32, #tpu.memory_space<vmem>>, vector<1x8x8xf32>
    %178 = vector.shape_cast %177 : vector<1x8x8xf32> to vector<8x8xf32>
    %cst_156 = arith.constant dense<0.000000e+00> : vector<64x8xf32>
    %179 = tpu.matmul %176, %178, %cst_156 {dimension_numbers = #tpu.dot_dimension_numbers<[1], [0], [0], [1], [0, 0, 1, 1], [], []>} : vector<64x8xf32>, vector<8x8xf32>, vector<64x8xf32> -> vector<64x8xf32>
    %180 = arith.addf %171, %179 : vector<64x8xf32>
    %c2_i32_157 = arith.constant 2 : i32
    %181 = arith.addi %arg1, %c2_i32_157 : i32
    %c0_158 = arith.constant 0 : index
    %182 = arith.index_cast %181 : i32 to index
    %c0_159 = arith.constant 0 : index
    %c2_160 = arith.constant 2 : index
    %c0_161 = arith.constant 0 : index
    %183 = vector.load %arg2[%c0_158, %182, %c0_159, %c2_160, %c0_161] : memref<1x10x10x10x8xf32, #tpu.memory_space<vmem>>, vector<1x1x8x8x8xf32>
    %184 = vector.shape_cast %183 : vector<1x1x8x8x8xf32> to vector<8x8x8xf32>
    %185 = vector.shape_cast %184 : vector<8x8x8xf32> to vector<64x8xf32>
    %c20 = arith.constant 20 : index
    %c0_162 = arith.constant 0 : index
    %c0_163 = arith.constant 0 : index
    %186 = vector.load %arg3[%c20, %c0_162, %c0_163] : memref<27x8x8xf32, #tpu.memory_space<vmem>>, vector<1x8x8xf32>
    %187 = vector.shape_cast %186 : vector<1x8x8xf32> to vector<8x8xf32>
    %cst_164 = arith.constant dense<0.000000e+00> : vector<64x8xf32>
    %188 = tpu.matmul %185, %187, %cst_164 {dimension_numbers = #tpu.dot_dimension_numbers<[1], [0], [0], [1], [0, 0, 1, 1], [], []>} : vector<64x8xf32>, vector<8x8xf32>, vector<64x8xf32> -> vector<64x8xf32>
    %189 = arith.addf %180, %188 : vector<64x8xf32>
    %c2_i32_165 = arith.constant 2 : i32
    %190 = arith.addi %arg1, %c2_i32_165 : i32
    %c0_166 = arith.constant 0 : index
    %191 = arith.index_cast %190 : i32 to index
    %c1_167 = arith.constant 1 : index
    %c0_168 = arith.constant 0 : index
    %c0_169 = arith.constant 0 : index
    %192 = vector.load %arg2[%c0_166, %191, %c1_167, %c0_168, %c0_169] : memref<1x10x10x10x8xf32, #tpu.memory_space<vmem>>, vector<1x1x8x8x8xf32>
    %193 = vector.shape_cast %192 : vector<1x1x8x8x8xf32> to vector<8x8x8xf32>
    %194 = vector.shape_cast %193 : vector<8x8x8xf32> to vector<64x8xf32>
    %c21 = arith.constant 21 : index
    %c0_170 = arith.constant 0 : index
    %c0_171 = arith.constant 0 : index
    %195 = vector.load %arg3[%c21, %c0_170, %c0_171] : memref<27x8x8xf32, #tpu.memory_space<vmem>>, vector<1x8x8xf32>
    %196 = vector.shape_cast %195 : vector<1x8x8xf32> to vector<8x8xf32>
    %cst_172 = arith.constant dense<0.000000e+00> : vector<64x8xf32>
    %197 = tpu.matmul %194, %196, %cst_172 {dimension_numbers = #tpu.dot_dimension_numbers<[1], [0], [0], [1], [0, 0, 1, 1], [], []>} : vector<64x8xf32>, vector<8x8xf32>, vector<64x8xf32> -> vector<64x8xf32>
    %198 = arith.addf %189, %197 : vector<64x8xf32>
    %c2_i32_173 = arith.constant 2 : i32
    %199 = arith.addi %arg1, %c2_i32_173 : i32
    %c0_174 = arith.constant 0 : index
    %200 = arith.index_cast %199 : i32 to index
    %c1_175 = arith.constant 1 : index
    %c1_176 = arith.constant 1 : index
    %c0_177 = arith.constant 0 : index
    %201 = vector.load %arg2[%c0_174, %200, %c1_175, %c1_176, %c0_177] : memref<1x10x10x10x8xf32, #tpu.memory_space<vmem>>, vector<1x1x8x8x8xf32>
    %202 = vector.shape_cast %201 : vector<1x1x8x8x8xf32> to vector<8x8x8xf32>
    %203 = vector.shape_cast %202 : vector<8x8x8xf32> to vector<64x8xf32>
    %c22 = arith.constant 22 : index
    %c0_178 = arith.constant 0 : index
    %c0_179 = arith.constant 0 : index
    %204 = vector.load %arg3[%c22, %c0_178, %c0_179] : memref<27x8x8xf32, #tpu.memory_space<vmem>>, vector<1x8x8xf32>
    %205 = vector.shape_cast %204 : vector<1x8x8xf32> to vector<8x8xf32>
    %cst_180 = arith.constant dense<0.000000e+00> : vector<64x8xf32>
    %206 = tpu.matmul %203, %205, %cst_180 {dimension_numbers = #tpu.dot_dimension_numbers<[1], [0], [0], [1], [0, 0, 1, 1], [], []>} : vector<64x8xf32>, vector<8x8xf32>, vector<64x8xf32> -> vector<64x8xf32>
    %207 = arith.addf %198, %206 : vector<64x8xf32>
    %c2_i32_181 = arith.constant 2 : i32
    %208 = arith.addi %arg1, %c2_i32_181 : i32
    %c0_182 = arith.constant 0 : index
    %209 = arith.index_cast %208 : i32 to index
    %c1_183 = arith.constant 1 : index
    %c2_184 = arith.constant 2 : index
    %c0_185 = arith.constant 0 : index
    %210 = vector.load %arg2[%c0_182, %209, %c1_183, %c2_184, %c0_185] : memref<1x10x10x10x8xf32, #tpu.memory_space<vmem>>, vector<1x1x8x8x8xf32>
    %211 = vector.shape_cast %210 : vector<1x1x8x8x8xf32> to vector<8x8x8xf32>
    %212 = vector.shape_cast %211 : vector<8x8x8xf32> to vector<64x8xf32>
    %c23 = arith.constant 23 : index
    %c0_186 = arith.constant 0 : index
    %c0_187 = arith.constant 0 : index
    %213 = vector.load %arg3[%c23, %c0_186, %c0_187] : memref<27x8x8xf32, #tpu.memory_space<vmem>>, vector<1x8x8xf32>
    %214 = vector.shape_cast %213 : vector<1x8x8xf32> to vector<8x8xf32>
    %cst_188 = arith.constant dense<0.000000e+00> : vector<64x8xf32>
    %215 = tpu.matmul %212, %214, %cst_188 {dimension_numbers = #tpu.dot_dimension_numbers<[1], [0], [0], [1], [0, 0, 1, 1], [], []>} : vector<64x8xf32>, vector<8x8xf32>, vector<64x8xf32> -> vector<64x8xf32>
    %216 = arith.addf %207, %215 : vector<64x8xf32>
    %c2_i32_189 = arith.constant 2 : i32
    %217 = arith.addi %arg1, %c2_i32_189 : i32
    %c0_190 = arith.constant 0 : index
    %218 = arith.index_cast %217 : i32 to index
    %c2_191 = arith.constant 2 : index
    %c0_192 = arith.constant 0 : index
    %c0_193 = arith.constant 0 : index
    %219 = vector.load %arg2[%c0_190, %218, %c2_191, %c0_192, %c0_193] : memref<1x10x10x10x8xf32, #tpu.memory_space<vmem>>, vector<1x1x8x8x8xf32>
    %220 = vector.shape_cast %219 : vector<1x1x8x8x8xf32> to vector<8x8x8xf32>
    %221 = vector.shape_cast %220 : vector<8x8x8xf32> to vector<64x8xf32>
    %c24 = arith.constant 24 : index
    %c0_194 = arith.constant 0 : index
    %c0_195 = arith.constant 0 : index
    %222 = vector.load %arg3[%c24, %c0_194, %c0_195] : memref<27x8x8xf32, #tpu.memory_space<vmem>>, vector<1x8x8xf32>
    %223 = vector.shape_cast %222 : vector<1x8x8xf32> to vector<8x8xf32>
    %cst_196 = arith.constant dense<0.000000e+00> : vector<64x8xf32>
    %224 = tpu.matmul %221, %223, %cst_196 {dimension_numbers = #tpu.dot_dimension_numbers<[1], [0], [0], [1], [0, 0, 1, 1], [], []>} : vector<64x8xf32>, vector<8x8xf32>, vector<64x8xf32> -> vector<64x8xf32>
    %225 = arith.addf %216, %224 : vector<64x8xf32>
    %c2_i32_197 = arith.constant 2 : i32
    %226 = arith.addi %arg1, %c2_i32_197 : i32
    %c0_198 = arith.constant 0 : index
    %227 = arith.index_cast %226 : i32 to index
    %c2_199 = arith.constant 2 : index
    %c1_200 = arith.constant 1 : index
    %c0_201 = arith.constant 0 : index
    %228 = vector.load %arg2[%c0_198, %227, %c2_199, %c1_200, %c0_201] : memref<1x10x10x10x8xf32, #tpu.memory_space<vmem>>, vector<1x1x8x8x8xf32>
    %229 = vector.shape_cast %228 : vector<1x1x8x8x8xf32> to vector<8x8x8xf32>
    %230 = vector.shape_cast %229 : vector<8x8x8xf32> to vector<64x8xf32>
    %c25 = arith.constant 25 : index
    %c0_202 = arith.constant 0 : index
    %c0_203 = arith.constant 0 : index
    %231 = vector.load %arg3[%c25, %c0_202, %c0_203] : memref<27x8x8xf32, #tpu.memory_space<vmem>>, vector<1x8x8xf32>
    %232 = vector.shape_cast %231 : vector<1x8x8xf32> to vector<8x8xf32>
    %cst_204 = arith.constant dense<0.000000e+00> : vector<64x8xf32>
    %233 = tpu.matmul %230, %232, %cst_204 {dimension_numbers = #tpu.dot_dimension_numbers<[1], [0], [0], [1], [0, 0, 1, 1], [], []>} : vector<64x8xf32>, vector<8x8xf32>, vector<64x8xf32> -> vector<64x8xf32>
    %234 = arith.addf %225, %233 : vector<64x8xf32>
    %c2_i32_205 = arith.constant 2 : i32
    %235 = arith.addi %arg1, %c2_i32_205 : i32
    %c0_206 = arith.constant 0 : index
    %236 = arith.index_cast %235 : i32 to index
    %c2_207 = arith.constant 2 : index
    %c2_208 = arith.constant 2 : index
    %c0_209 = arith.constant 0 : index
    %237 = vector.load %arg2[%c0_206, %236, %c2_207, %c2_208, %c0_209] : memref<1x10x10x10x8xf32, #tpu.memory_space<vmem>>, vector<1x1x8x8x8xf32>
    %238 = vector.shape_cast %237 : vector<1x1x8x8x8xf32> to vector<8x8x8xf32>
    %239 = vector.shape_cast %238 : vector<8x8x8xf32> to vector<64x8xf32>
    %c26 = arith.constant 26 : index
    %c0_210 = arith.constant 0 : index
    %c0_211 = arith.constant 0 : index
    %240 = vector.load %arg3[%c26, %c0_210, %c0_211] : memref<27x8x8xf32, #tpu.memory_space<vmem>>, vector<1x8x8xf32>
    %241 = vector.shape_cast %240 : vector<1x8x8xf32> to vector<8x8xf32>
    %cst_212 = arith.constant dense<0.000000e+00> : vector<64x8xf32>
    %242 = tpu.matmul %239, %241, %cst_212 {dimension_numbers = #tpu.dot_dimension_numbers<[1], [0], [0], [1], [0, 0, 1, 1], [], []>} : vector<64x8xf32>, vector<8x8xf32>, vector<64x8xf32> -> vector<64x8xf32>
    %243 = arith.addf %234, %242 : vector<64x8xf32>
    %c0_213 = arith.constant 0 : index
    %c0_214 = arith.constant 0 : index
    %244 = vector.load %arg4[%c0_213, %c0_214] : memref<1x8xf32, #tpu.memory_space<vmem>>, vector<1x8xf32>
    %245 = vector.broadcast %244 : vector<1x8xf32> to vector<64x8xf32>
    %246 = arith.addf %243, %245 : vector<64x8xf32>
    %247 = vector.shape_cast %246 : vector<64x8xf32> to vector<8x8x8xf32>
    %c0_215 = arith.constant 0 : index
    %c0_216 = arith.constant 0 : index
    %c0_217 = arith.constant 0 : index
    %c0_218 = arith.constant 0 : index
    %c0_219 = arith.constant 0 : index
    %248 = vector.load %arg5[%c0_215, %c0_216, %c0_217, %c0_218, %c0_219] : memref<1x1x8x8x8xf32, #tpu.memory_space<vmem>>, vector<1x1x8x8x8xf32>
    %249 = vector.shape_cast %248 : vector<1x1x8x8x8xf32> to vector<8x8x8xf32>
    %250 = vector.shape_cast %247 : vector<8x8x8xf32> to vector<1x1x8x8x8xf32>
    tpu.vector_store %arg5[%c0_215, %c0_216, %c0_217, %c0_218, %c0_219], %250 {strides = array<i32>} : memref<1x1x8x8x8xf32, #tpu.memory_space<vmem>>, vector<1x1x8x8x8xf32>,
    return
  }
  func.func @transform_0(%arg0: i32, %arg1: i32) -> (i32, i32, i32, i32, i32) {
    %c0_i32 = arith.constant 0 : i32
    %c0_i32_0 = arith.constant 0 : i32
    %c0_i32_1 = arith.constant 0 : i32
    %c0_i32_2 = arith.constant 0 : i32
    %c0_i32_3 = arith.constant 0 : i32
    return %arg0, %c0_i32, %c0_i32_0, %c0_i32_1, %c0_i32_2 : i32, i32, i32, i32, i32
  }
  func.func @transform_1(%arg0: i32, %arg1: i32) -> (i32, i32, i32) {
    %c0_i32 = arith.constant 0 : i32
    %c0_i32_0 = arith.constant 0 : i32
    %c0_i32_1 = arith.constant 0 : i32
    %c0_i32_2 = arith.constant 0 : i32
    return %c0_i32, %c0_i32_0, %c0_i32_1 : i32, i32, i32
  }
  func.func @transform_2(%arg0: i32, %arg1: i32) -> (i32, i32) {
    %c0_i32 = arith.constant 0 : i32
    %c0_i32_0 = arith.constant 0 : i32
    %c0_i32_1 = arith.constant 0 : i32
    return %c0_i32, %c0_i32_0 : i32, i32
  }
  func.func @transform_3(%arg0: i32, %arg1: i32) -> (i32, i32, i32, i32, i32) {
    %c0_i32 = arith.constant 0 : i32
    %c0_i32_0 = arith.constant 0 : i32
    %c0_i32_1 = arith.constant 0 : i32
    %c0_i32_2 = arith.constant 0 : i32
    return %arg0, %arg1, %c0_i32, %c0_i32_0, %c0_i32_1 : i32, i32, i32, i32, i32
  }
}

</mosaic_0001>

<bundles_post_ra>
// kernel: plain_conv3d_channel_shrink.3
= control target key start
LH: loop header
LB: loop body
LE: loop exit
PB: predicated region body
PF: predicated region fallthrough
CT: control target
= control target key end

     0   :  { %s5813_s12 = smov 0   ;;  %s5815_s13 = smov 0   ;;  %s6683_s0 = inlined_call_operand.vmem [shape: f32[2,10,10,10,4], index: 0, kind: input, shape index: {}]   ;;  %s6684_s1 = inlined_call_operand.vmem [shape: f32[27,4,8], index: 1, kind: input, shape index: {}]   ;;  %s6685_s2 = inlined_call_operand.vmem [shape: f32[1,8], index: 2, kind: input, shape index: {}]   ;;  %s6686_s3 = inlined_call_operand.vmem [shape: f32[2,8,8,8,8], index: 3, kind: output, shape index: {}]  }
   0x1   :  { %s5817_s14 = smov 0   ;;  %s5819_s15 = smov 0  }
   0x2   :  { %s5821_s16 = smov 0  }
   0x3 LB: > { %s22_s17 = sadd.s32 1, %s5783_s14  ;;  %s25_s18 = sadd.s32 1, %s5787_s15  ;;  %s5791_s16 = sphi %s5821_s16, %s13_s16   ;;  %s5787_s15 = sphi %s5819_s15, %s6690_s15   ;;  %s5783_s14 = sphi %s5817_s14, %s6689_s14   ;;  %s5779_s13 = sphi %s5815_s13, %s6688_s13   ;;  %s5775_s12 = sphi %s5813_s12, %s6687_s12  }
   0x4   : > { %p23_p0 = scmp.ge.s32.totalorder %s22_s17, 8  ;;  %p4412_p1 = scmp.ge.s32.totalorder %s5791_s16, 1 }
   0x5   : > { %p151_p2 = scmp.lt.s32.totalorder %s5791_s16, 17 }
   0x6   : > { %s6692_s17 = smov (%p23_p0, %s22_s17), 0  ;;  %s6694_s18 = smov (!%p23_p0, %s25_s18), %s5787_s15 }
   0x7   : > { %p152_p3 = pnand %p4412_p1, %p151_p2  ;;  %p27_p4 = scmp.ge.s32.totalorder %s6694_s18, 2 }
   0x8   : > { %v4417_v0 = vld [vmem:[%s6684_s1 + $0x4] sm:$0xf] (!%p152_p3)  ;;  %vm239_vm0 = vcmask (!%p152_p3), 1043456   ;;  %v5851_v1 = vld [vmem:[%s6684_s1 + $0x34] sm:$0xf] (!%p152_p3)  ;;  %p179_p5 = scmp.lt.s32.totalorder (!%p152_p3), %s5779_s13, 1 }
   0x9   : > { %s6696_s18 = smov (%p27_p4, %s6694_s18), 0  ;;  %155 = sbr.rel (%p152_p3) target bundleno = 456 (0x1c8), region = 32 }
   0xa   : > { %5124 = vmatprep.subr.msk.mxu1 (!%p152_p3), %vm239_vm0, %v4417_v0  ;;  %5306 = vmatprep.subr.msk.mxu0 (!%p152_p3), %vm239_vm0, %v5851_v1  ;;  %v203_v2 = vld [vmem:[%s6684_s1] sm:$0xf] (!%p152_p3)  ;;  %v4652_v3 = vld [vmem:[%s6684_s1 + $0x38] sm:$0xf] (!%p152_p3)  ;;  %s193_s27 = smul.u32 (!%p152_p3), 160, %s5775_s12  ;;  %vm214_vm1 = vcmask (!%p152_p3), 31744  }
   0xb   : > { %5125 = vmatpush3.msk.msra.mxu1 (!%p152_p3), %vm239_vm0, %v4417_v0  ;;  %5307 = vmatpush3.msk.msra.mxu0 (!%p152_p3), %vm239_vm0, %v5851_v1  ;;  %v4670_v10 = vld [vmem:[%s6684_s1 + $0x3c] sm:$0xf] (!%p152_p3)  ;;  %v4436_v11 = vld [vmem:[%s6684_s1 + $0x8] sm:$0xf] (!%p152_p3)  ;;  %v4688_v20 = vld [vmem:[%s6684_s1 + $0x40] sm:$0xf] (!%p152_p3) }
   0xc   : > { %5138 = vmatprep.subr.msk.mxu1 (!%p152_p3), %vm239_vm0, %v203_v2  ;;  %5320 = vmatprep.subr.msk.mxu0 (!%p152_p3), %vm239_vm0, %v4652_v3  ;;  %v4454_v29 = vld [vmem:[%s6684_s1 + $0xc] sm:$0xf] (!%p152_p3)  ;;  %v4706_v38 = vld [vmem:[%s6684_s1 + $0x44] sm:$0xf] (!%p152_p3)  ;;  %v4472_v47 = vld [vmem:[%s6684_s1 + $0x10] sm:$0xf] (!%p152_p3) }
   0xd   : > { %v4724_v53 = vld [vmem:[%s6684_s1 + $0x48] sm:$0xf] (!%p152_p3)  ;;  %v4490_v59 = vld [vmem:[%s6684_s1 + $0x14] sm:$0xf] (!%p152_p3)  ;;  %v4742_v61 = vld [vmem:[%s6684_s1 + $0x4c] sm:$0xf] (!%p152_p3) }
   0xe   : > { %v4508_v63 = vld [vmem:[%s6684_s1 + $0x18] sm:$0xf] (!%p152_p3)  ;;  %p186_p6 = scmp.lt.s32.totalorder (!%p152_p3), %s5775_s12, 7  ;;  %vm4287_vm3 = vcmask (!%p152_p3), 64512  }
  0x10   : > { %s6698_s13 = smov (!%p179_p5, %s5779_s13), 1  ;;  %s6700_s12 = smov (!%p186_p6, %s5775_s12), 7 }
  0x11   : > { %s5712_s28 = smul.u32 1600, %s6698_s13  ;;  %s4414_s21 = sshll.u32 %s6700_s12, 3 }
  0x12   : > { %s4415_s22 = sshll.u32 %s6698_s13, 6 }
  0x13   : > { %s183_s4 = scalar_lea.vmem %s6683_s0, %s5712_s28  ;;  %s190_s23 = sadd.s32 %s4415_s22, %s4414_s21 }
  0x14   : > { %s5874_s5 = scalar_lea.vmem %s183_s4, %s193_s27 }
  0x15   : > { %v204_v4 = vld [vmem:[%s5874_s5 + $0x1] sm:$0xff]  ;;  %v5878_v5 = vld [vmem:[%s5874_s5 + $0xb1] sm:$0xff] }
  0x16   : > { %v5881_v6 = vld [vmem:[%s5874_s5 + $0x11] sm:$0xff]  ;;  %5126 = vmatprep.mubr.msk.f32.mxu1 %vm214_vm1, %v204_v4  ;;  %5308 = vmatprep.mubr.msk.f32.mxu0 %vm214_vm1, %v5878_v5  ;;  %v5887_v7 = vld [vmem:[%s5874_s5 + $0xc1] sm:$0xff] }
  0x17   : > { %v5890_v8 = vld [vmem:[%s5874_s5 + $0x21] sm:$0xff]  ;;  %v5893_v9 = vld [vmem:[%s5874_s5 + $0xd1] sm:$0xff]  ;;  %5127 = vmatmul.mubr.msk.f32.vlgmr.msra.gmra.mrb[0].mxu1 %vm214_vm1, %v5881_v6  ;;  %5309 = vmatmul.mubr.msk.f32.vlgmr.msra.gmra.mrb[0].mxu0 %vm214_vm1, %v5887_v7 }
  0x18   : > { %5139 = vmatpush3.msk.msra.mxu1 %vm239_vm0, %v203_v2  ;;  %5321 = vmatpush3.msk.msra.mxu0 %vm239_vm0, %v4652_v3  ;;  %v5908_v12 = vld [vmem:[%s5874_s5 + $0x31] sm:$0xff]  ;;  %v5911_v13 = vld [vmem:[%s5874_s5 + $0xe1] sm:$0xff] }
  0x19   : > { %5129 = vmatprep.mubr.msk.f32.mxu1 %vm214_vm1, %v5890_v8  ;;  %5311 = vmatprep.mubr.msk.f32.mxu0 %vm214_vm1, %v5893_v9  ;;  %v5918_v14 = vld [vmem:[%s5874_s5 + $0x41] sm:$0xff]  ;;  %v5921_v15 = vld [vmem:[%s5874_s5 + $0xb2] sm:$0xff] }
  0x1a   : > { %5334 = vmatprep.subr.msk.mxu0 %vm239_vm0, %v4670_v10  ;;  %5152 = vmatprep.subr.msk.mxu1 %vm239_vm0, %v4436_v11  ;;  %v5934_v16 = vld [vmem:[%s5874_s5 + $0x51] sm:$0xff]  ;;  %v5937_v17 = vld [vmem:[%s5874_s5 + $0xc2] sm:$0xff] }
  0x1b   : > { %5130 = vmatmul.mubr.msk.f32.gmra.mrb[2].mxu1 %vm214_vm1, %v5908_v12  ;;  %5312 = vmatmul.mubr.msk.f32.gmra.mrb[2].mxu0 %vm214_vm1, %v5911_v13  ;;  %v5940_v18 = vld [vmem:[%s5874_s5 + $0x61] sm:$0xff]  ;;  %v5943_v19 = vld [vmem:[%s5874_s5 + $0xd2] sm:$0xff] }
  0x1c   : > { %5132 = vmatprep.mubr.msk.f32.mxu1 %vm214_vm1, %v5918_v14  ;;  %5322 = vmatprep.mubr.msk.f32.mxu0 %vm214_vm1, %v5921_v15  ;;  %v5956_v21 = vld [vmem:[%s5874_s5 + $0x71] sm:$0xff]  ;;  %v5959_v22 = vld [vmem:[%s5874_s5 + $0xe2] sm:$0xff] }
  0x1d   : > { %v195_v23 = vld [vmem:[%s5874_s5] sm:$0xff]  ;;  %v5965_v24 = vld [vmem:[%s5874_s5 + $0xf2] sm:$0xff] }
  0x1e   : > { %v5976_v25 = vld [vmem:[%s5874_s5 + $0x10] sm:$0xff]  ;;  %v5979_v26 = vld [vmem:[%s5874_s5 + $0x102] sm:$0xff] }
  0x1f   : > { %5133 = vmatmul.mubr.msk.f32.gmra.mrb[4].mxu1 %vm214_vm1, %v5934_v16  ;;  %5323 = vmatmul.mubr.msk.f32.vlgmr.msra.gmra.mrb[0].mxu0 %vm214_vm1, %v5937_v17  ;;  %v5982_v27 = vld [vmem:[%s5874_s5 + $0x20] sm:$0xff]  ;;  %v5985_v28 = vld [vmem:[%s5874_s5 + $0x112] sm:$0xff] }
  0x20   : > { %5335 = vmatpush3.msk.msra.mxu0 %vm239_vm0, %v4670_v10  ;;  %5135 = vmatprep.mubr.msk.f32.mxu1 %vm214_vm1, %v5940_v18  ;;  %v5998_v30 = vld [vmem:[%s5874_s5 + $0x30] sm:$0xff]  ;;  %v6001_v31 = vld [vmem:[%s5874_s5 + $0x122] sm:$0xff] }
  0x21   : > { %5325 = vmatprep.mubr.msk.f32.mxu0 %vm214_vm1, %v5943_v19  ;;  %5348 = vmatprep.subr.msk.mxu0 %vm239_vm0, %v4688_v20  ;;  %v6006_v32 = vld [vmem:[%s5874_s5 + $0x40] sm:$0xff]  ;;  %v6021_v34 = vld [vmem:[%s5874_s5 + $0x50] sm:$0xff] }
  0x22   : > { %v6009_v33 = vld [vmem:[%s5874_s5 + $0xc0] sm:$0xff]  ;;  %v6024_v35 = vld [vmem:[%s5874_s5 + $0xd0] sm:$0xff] }
  0x23   : > { %5136 = vmatmul.mubr.msk.f32.gmra.mrb[6].mxu1 %vm214_vm1, %v5956_v21  ;;  %5326 = vmatmul.mubr.msk.f32.gmra.mrb[2].mxu0 %vm214_vm1, %v5959_v22  ;;  %v6027_v36 = vld [vmem:[%s5874_s5 + $0x60] sm:$0xff]  ;;  %v6043_v39 = vld [vmem:[%s5874_s5 + $0x70] sm:$0xff] }
  0x24   : > { %5140 = vmatprep.mubr.msk.f32.mxu1 %vm214_vm1, %v195_v23  ;;  %5328 = vmatprep.mubr.msk.f32.mxu0 %vm214_vm1, %v5965_v24  ;;  %v6030_v37 = vld [vmem:[%s5874_s5 + $0xe0] sm:$0xff]  ;;  %v6046_v40 = vld [vmem:[%s5874_s5 + $0xf0] sm:$0xff] }
  0x25   : > { %v480_v41 = vld [vmem:[%s5874_s5 + $0x2] sm:$0xff]  ;;  %v6063_v43 = vld [vmem:[%s5874_s5 + $0x12] sm:$0xff] }
  0x26   : > { %v6052_v42 = vld [vmem:[%s5874_s5 + $0x100] sm:$0xff]  ;;  %v6066_v44 = vld [vmem:[%s5874_s5 + $0x110] sm:$0xff] }
  0x27   : > { %5141 = vmatmul.mubr.msk.f32.vlgmr.msra.gmra.mrb[0].mxu1 %vm214_vm1, %v5976_v25  ;;  %5329 = vmatmul.mubr.msk.f32.gmra.mrb[4].mxu0 %vm214_vm1, %v5979_v26  ;;  %v6069_v45 = vld [vmem:[%s5874_s5 + $0x22] sm:$0xff]  ;;  %v6085_v48 = vld [vmem:[%s5874_s5 + $0x32] sm:$0xff] }
  0x28   : > { %5153 = vmatpush3.msk.msra.mxu1 %vm239_vm0, %v4436_v11  ;;  %5143 = vmatprep.mubr.msk.f32.mxu1 %vm214_vm1, %v5982_v27  ;;  %v6072_v46 = vld [vmem:[%s5874_s5 + $0x120] sm:$0xff]  ;;  %v4669_v49 = vld [vmem:[%s5874_s5 + $0x130] sm:$0xff] }
  0x29   : > { %5331 = vmatprep.mubr.msk.f32.mxu0 %vm214_vm1, %v5985_v28  ;;  %5166 = vmatprep.subr.msk.mxu1 %vm239_vm0, %v4454_v29  ;;  %v6091_v50 = vld [vmem:[%s5874_s5 + $0x42] sm:$0xff]  ;;  %v6102_v51 = vld [vmem:[%s5874_s5 + $0x52] sm:$0xff] }
  0x2a   : > { %v6105_v52 = vld [vmem:[%s5874_s5 + $0x62] sm:$0xff]  ;;  %v6118_v54 = vld [vmem:[%s5874_s5 + $0x72] sm:$0xff] }
  0x2b   : > { %5144 = vmatmul.mubr.msk.f32.gmra.mrb[2].mxu1 %vm214_vm1, %v5998_v30  ;;  %5332 = vmatmul.mubr.msk.f32.gmra.mrb[6].mxu0 %vm214_vm1, %v6001_v31  ;;  %v6121_v55 = vld [vmem:[%s5874_s5 + $0xf1] sm:$0xff]  ;;  %v6126_v56 = vld [vmem:[%s5874_s5 + $0x101] sm:$0xff] }
  0x2c   : > { %5146 = vmatprep.mubr.msk.f32.mxu1 %vm214_vm1, %v6006_v32  ;;  %5336 = vmatprep.mubr.msk.f32.mxu0 %vm214_vm1, %v6009_v33  ;;  %v6138_v57 = vld [vmem:[%s5874_s5 + $0x111] sm:$0xff]  ;;  %v6141_v58 = vld [vmem:[%s5874_s5 + $0x121] sm:$0xff] }
  0x2d   : > { %v4687_v60 = vld [vmem:[%s5874_s5 + $0x131] sm:$0xff]  ;;  %v6175_v62 = vld [vmem:[%s5874_s5 + $0x80] sm:$0xff] }
  0x2e   : > { %v4705_v0 = vld [vmem:[%s5874_s5 + $0x132] sm:$0xff]  ;;  %v4716_v2 = vld [vmem:[%s5874_s5 + $0x140] sm:$0xff] }
  0x2f   : > { %5147 = vmatmul.mubr.msk.f32.gmra.mrb[4].mxu1 %vm214_vm1, %v6021_v34  ;;  %5337 = vmatmul.mubr.msk.f32.vlgmr.msra.gmra.mrb[0].mxu0 %vm214_vm1, %v6024_v35  ;;  %v6210_v3 = vld [vmem:[%s5874_s5 + $0x150] sm:$0xff]  ;;  %v6213_v4 = vld [vmem:[%s5874_s5 + $0x160] sm:$0xff] }
  0x30   : > { %5349 = vmatpush3.msk.msra.mxu0 %vm239_vm0, %v4688_v20  ;;  %5149 = vmatprep.mubr.msk.f32.mxu1 %vm214_vm1, %v6027_v36  ;;  %v6226_v10 = vld [vmem:[%s5874_s5 + $0x81] sm:$0xff]  ;;  %v6229_v11 = vld [vmem:[%s5874_s5 + $0x170] sm:$0xff] }
  0x31   : > { %5339 = vmatprep.mubr.msk.f32.mxu0 %vm214_vm1, %v6030_v37  ;;  %5362 = vmatprep.subr.msk.mxu0 %vm239_vm0, %v4706_v38  ;;  %v6234_v20 = vld [vmem:[%s5874_s5 + $0x180] sm:$0xff]  ;;  %v6246_v23 = vld [vmem:[%s5874_s5 + $0x190] sm:$0xff] }
  0x33   : > { %5150 = vmatmul.mubr.msk.f32.gmra.mrb[6].mxu1 %vm214_vm1, %v6043_v39  ;;  %5340 = vmatmul.mubr.msk.f32.gmra.mrb[2].mxu0 %vm214_vm1, %v6046_v40 }
  0x34   : > { %5154 = vmatprep.mubr.msk.f32.mxu1 %vm214_vm1, %v480_v41  ;;  %5342 = vmatprep.mubr.msk.f32.mxu0 %vm214_vm1, %v6052_v42  ;;  %v6276_v41 = vld [vmem:[%s5874_s5 + $0x151] sm:$0xff] }
  0x37   : > { %5155 = vmatmul.mubr.msk.f32.vlgmr.msra.gmra.mrb[0].mxu1 %vm214_vm1, %v6063_v43  ;;  %5343 = vmatmul.mubr.msk.f32.gmra.mrb[4].mxu0 %vm214_vm1, %v6066_v44 }
  0x38   : > { %5167 = vmatpush3.msk.msra.mxu1 %vm239_vm0, %v4454_v29  ;;  %5157 = vmatprep.mubr.msk.f32.mxu1 %vm214_vm1, %v6069_v45  ;;  %v4526_v29 = vld [vmem:[%s6684_s1 + $0x1c] sm:$0xf] }
  0x39   : > { %5345 = vmatprep.mubr.msk.f32.mxu0 %vm214_vm1, %v6072_v46  ;;  %5180 = vmatprep.subr.msk.mxu1 %vm239_vm0, %v4472_v47 }
  0x3b   : > { %5158 = vmatmul.mubr.msk.f32.gmra.mrb[2].mxu1 %vm214_vm1, %v6085_v48  ;;  %5346 = vmatmul.mubr.msk.f32.gmra.mrb[6].mxu0 %vm214_vm1, %v4669_v49  ;;  %v6292_v49 = vld [vmem:[%s5874_s5 + $0x82] sm:$0xff] }
  0x3c   : > { %5160 = vmatprep.mubr.msk.f32.mxu1 %vm214_vm1, %v6091_v50  ;;  %5350 = vmatprep.mubr.msk.f32.mxu0 %vm214_vm1, %v5887_v7 }
  0x3f   : > { %5161 = vmatmul.mubr.msk.f32.gmra.mrb[4].mxu1 %vm214_vm1, %v6102_v51  ;;  %5351 = vmatmul.mubr.msk.f32.vlgmr.msra.gmra.mrb[0].mxu0 %vm214_vm1, %v5893_v9 }
  0x40   : > { %5363 = vmatpush3.msk.msra.mxu0 %vm239_vm0, %v4706_v38  ;;  %5163 = vmatprep.mubr.msk.f32.mxu1 %vm214_vm1, %v6105_v52  ;;  %v4734_v38 = vld [vmem:[%s5874_s5 + $0x141] sm:$0xff] }
  0x41   : > { %5353 = vmatprep.mubr.msk.f32.mxu0 %vm214_vm1, %v5911_v13  ;;  %5376 = vmatprep.subr.msk.mxu0 %vm239_vm0, %v4724_v53 }
  0x43   : > { %5164 = vmatmul.mubr.msk.f32.gmra.mrb[6].mxu1 %vm214_vm1, %v6118_v54  ;;  %5354 = vmatmul.mubr.msk.f32.gmra.mrb[2].mxu0 %vm214_vm1, %v6121_v55 }
  0x44   : > { %5168 = vmatprep.mubr.msk.f32.mxu1 %vm214_vm1, %v5976_v25  ;;  %5356 = vmatprep.mubr.msk.f32.mxu0 %vm214_vm1, %v6126_v56  ;;  %v6249_v25 = vld [vmem:[%s5874_s5 + $0x1a0] sm:$0xff] }
  0x47   : > { %5169 = vmatmul.mubr.msk.f32.vlgmr.msra.gmra.mrb[0].mxu1 %vm214_vm1, %v5982_v27  ;;  %5357 = vmatmul.mubr.msk.f32.gmra.mrb[4].mxu0 %vm214_vm1, %v6138_v57 }
  0x48   : > { %5181 = vmatpush3.msk.msra.mxu1 %vm239_vm0, %v4472_v47  ;;  %5171 = vmatprep.mubr.msk.f32.mxu1 %vm214_vm1, %v5998_v30  ;;  %v4778_v47 = vld [vmem:[%s6684_s1 + $0x54] sm:$0xf] }
  0x49   : > { %5359 = vmatprep.mubr.msk.f32.mxu0 %vm214_vm1, %v6141_v58  ;;  %5194 = vmatprep.subr.msk.mxu1 %vm239_vm0, %v4490_v59 }
  0x4b   : > { %5172 = vmatmul.mubr.msk.f32.gmra.mrb[2].mxu1 %vm214_vm1, %v6006_v32  ;;  %5360 = vmatmul.mubr.msk.f32.gmra.mrb[6].mxu0 %vm214_vm1, %v4687_v60  ;;  %v6312_v60 = vld [vmem:[%s5874_s5 + $0x191] sm:$0xff] }
  0x4c   : > { %5174 = vmatprep.mubr.msk.f32.mxu1 %vm214_vm1, %v6021_v34  ;;  %5364 = vmatprep.mubr.msk.f32.mxu0 %vm214_vm1, %v5937_v17 }
  0x4f   : > { %5175 = vmatmul.mubr.msk.f32.gmra.mrb[4].mxu1 %vm214_vm1, %v6027_v36  ;;  %5365 = vmatmul.mubr.msk.f32.vlgmr.msra.gmra.mrb[0].mxu0 %vm214_vm1, %v5943_v19 }
  0x50   : > { %5377 = vmatpush3.msk.msra.mxu0 %vm239_vm0, %v4724_v53  ;;  %5177 = vmatprep.mubr.msk.f32.mxu1 %vm214_vm1, %v6043_v39  ;;  %v6295_v53 = vld [vmem:[%s5874_s5 + $0x171] sm:$0xff] }
  0x51   : > { %5367 = vmatprep.mubr.msk.f32.mxu0 %vm214_vm1, %v5959_v22  ;;  %5390 = vmatprep.subr.msk.mxu0 %vm239_vm0, %v4742_v61 }
  0x53   : > { %5178 = vmatmul.mubr.msk.f32.gmra.mrb[6].mxu1 %vm214_vm1, %v6175_v62  ;;  %5368 = vmatmul.mubr.msk.f32.gmra.mrb[2].mxu0 %vm214_vm1, %v5965_v24 }
  0x54   : > { %5182 = vmatprep.mubr.msk.f32.mxu1 %vm214_vm1, %v5881_v6  ;;  %5370 = vmatprep.mubr.msk.f32.mxu0 %vm214_vm1, %v5979_v26  ;;  %v4760_v6 = vld [vmem:[%s6684_s1 + $0x50] sm:$0xf] }
  0x57   : > { %5183 = vmatmul.mubr.msk.f32.vlgmr.msra.gmra.mrb[0].mxu1 %vm214_vm1, %v5890_v8  ;;  %5371 = vmatmul.mubr.msk.f32.gmra.mrb[4].mxu0 %vm214_vm1, %v5985_v28 }
  0x58   : > { %5195 = vmatpush3.msk.msra.mxu1 %vm239_vm0, %v4490_v59  ;;  %5185 = vmatprep.mubr.msk.f32.mxu1 %vm214_vm1, %v5908_v12  ;;  %v6300_v59 = vld [vmem:[%s5874_s5 + $0x181] sm:$0xff] }
  0x59   : > { %5373 = vmatprep.mubr.msk.f32.mxu0 %vm214_vm1, %v6001_v31  ;;  %5208 = vmatprep.subr.msk.mxu1 %vm239_vm0, %v4508_v63  ;;  %v6262_v31 = vld [vmem:[%s5874_s5 + $0x1b0] sm:$0xff] }
  0x5b   : > { %5186 = vmatmul.mubr.msk.f32.gmra.mrb[2].mxu1 %vm214_vm1, %v5918_v14  ;;  %5374 = vmatmul.mubr.msk.f32.gmra.mrb[6].mxu0 %vm214_vm1, %v4705_v0  ;;  %v4752_v0 = vld [vmem:[%s5874_s5 + $0x142] sm:$0xff] }
  0x5c   : > { %5188 = vmatprep.mubr.msk.f32.mxu1 %vm214_vm1, %v5934_v16  ;;  %5378 = vmatprep.mubr.msk.f32.mxu0 %vm214_vm1, %v4716_v2  ;;  %v4796_v2 = vld [vmem:[%s6684_s1 + $0x58] sm:$0xf] }
  0x5f   : > { %5189 = vmatmul.mubr.msk.f32.gmra.mrb[4].mxu1 %vm214_vm1, %v5940_v18  ;;  %5379 = vmatmul.mubr.msk.f32.vlgmr.msra.gmra.mrb[0].mxu0 %vm214_vm1, %v6210_v3 }
  0x60   : > { %5391 = vmatpush3.msk.msra.mxu0 %vm239_vm0, %v4742_v61  ;;  %5191 = vmatprep.mubr.msk.f32.mxu1 %vm214_vm1, %v5956_v21  ;;  %v6315_v61 = vld [vmem:[%s5874_s5 + $0x1a1] sm:$0xff] }
  0x61   : > { %5381 = vmatprep.mubr.msk.f32.mxu0 %vm214_vm1, %v6213_v4  ;;  %5404 = vmatprep.subr.msk.mxu0 %vm239_vm0, %v4760_v6 }
  0x63   : > { %5192 = vmatmul.mubr.msk.f32.gmra.mrb[6].mxu1 %vm214_vm1, %v6226_v10  ;;  %5382 = vmatmul.mubr.msk.f32.gmra.mrb[2].mxu0 %vm214_vm1, %v6229_v11 }
  0x64   : > { %5196 = vmatprep.mubr.msk.f32.mxu1 %vm214_vm1, %v6063_v43  ;;  %5384 = vmatprep.mubr.msk.f32.mxu0 %vm214_vm1, %v6234_v20  ;;  %v6279_v43 = vld [vmem:[%s5874_s5 + $0x161] sm:$0xff] }
  0x67   : > { %5197 = vmatmul.mubr.msk.f32.vlgmr.msra.gmra.mrb[0].mxu1 %vm214_vm1, %v6069_v45  ;;  %5385 = vmatmul.mubr.msk.f32.gmra.mrb[4].mxu0 %vm214_vm1, %v6246_v23 }
  0x68   : > { %5209 = vmatpush3.msk.msra.mxu1 %vm239_vm0, %v4508_v63  ;;  %5199 = vmatprep.mubr.msk.f32.mxu1 %vm214_vm1, %v6085_v48  ;;  %v4544_v63 = vld [vmem:[%s6684_s1 + $0x20] sm:$0xf] }
  0x69   : > { %5387 = vmatprep.mubr.msk.f32.mxu0 %vm214_vm1, %v6249_v25  ;;  %5222 = vmatprep.subr.msk.mxu1 %vm239_vm0, %v4526_v29 }
  0x6b   : > { %5200 = vmatmul.mubr.msk.f32.gmra.mrb[2].mxu1 %vm214_vm1, %v6091_v50  ;;  %5388 = vmatmul.mubr.msk.f32.gmra.mrb[6].mxu0 %vm214_vm1, %v6262_v31 }
  0x6c   : > { %5202 = vmatprep.mubr.msk.f32.mxu1 %vm214_vm1, %v6102_v51  ;;  %5392 = vmatprep.mubr.msk.f32.mxu0 %vm214_vm1, %v4734_v38  ;;  %v4813_v38 = vld [vmem:[%s5874_s5 + $0x1c2] sm:$0xff] }
  0x6f   : > { %5203 = vmatmul.mubr.msk.f32.gmra.mrb[4].mxu1 %vm214_vm1, %v6105_v52  ;;  %5393 = vmatmul.mubr.msk.f32.vlgmr.msra.gmra.mrb[0].mxu0 %vm214_vm1, %v6276_v41 }
  0x70   : > { %5405 = vmatpush3.msk.msra.mxu0 %vm239_vm0, %v4760_v6  ;;  %5205 = vmatprep.mubr.msk.f32.mxu1 %vm214_vm1, %v6118_v54  ;;  %v6364_v6 = vld [vmem:[%s5874_s5 + $0x182] sm:$0xff] }
  0x71   : > { %5395 = vmatprep.mubr.msk.f32.mxu0 %vm214_vm1, %v6279_v43  ;;  %5418 = vmatprep.subr.msk.mxu0 %vm239_vm0, %v4778_v47 }
  0x73   : > { %5206 = vmatmul.mubr.msk.f32.gmra.mrb[6].mxu1 %vm214_vm1, %v6292_v49  ;;  %5396 = vmatmul.mubr.msk.f32.gmra.mrb[2].mxu0 %vm214_vm1, %v6295_v53 }
  0x74   : > { %5210 = vmatprep.mubr.msk.f32.mxu1 %vm214_vm1, %v5982_v27  ;;  %5398 = vmatprep.mubr.msk.f32.mxu0 %vm214_vm1, %v6300_v59  ;;  %v6328_v27 = vld [vmem:[%s5874_s5 + $0x1b1] sm:$0xff] }
  0x77   : > { %5211 = vmatmul.mubr.msk.f32.vlgmr.msra.gmra.mrb[0].mxu1 %vm214_vm1, %v5998_v30  ;;  %5399 = vmatmul.mubr.msk.f32.gmra.mrb[4].mxu0 %vm214_vm1, %v6312_v60  ;;  %v6342_v30 = vld [vmem:[%s5874_s5 + $0x152] sm:$0xff] }
  0x78   : > { %5223 = vmatpush3.msk.msra.mxu1 %vm239_vm0, %v4526_v29  ;;  %5213 = vmatprep.mubr.msk.f32.mxu1 %vm214_vm1, %v6006_v32  ;;  %v6345_v32 = vld [vmem:[%s5874_s5 + $0x162] sm:$0xff] }
  0x79   : > { %5401 = vmatprep.mubr.msk.f32.mxu0 %vm214_vm1, %v6315_v61  ;;  %5236 = vmatprep.subr.msk.mxu1 %vm239_vm0, %v4544_v63  ;;  %v4562_v29 = vld [vmem:[%s6684_s1 + $0x24] sm:$0xf] }
  0x7b   : > { %5214 = vmatmul.mubr.msk.f32.gmra.mrb[2].mxu1 %vm214_vm1, %v6021_v34  ;;  %5402 = vmatmul.mubr.msk.f32.gmra.mrb[6].mxu0 %vm214_vm1, %v6328_v27  ;;  %v4507_v34 = vld [vmem:[%s5874_s5 + $0x90] sm:$0xff] }
  0x7c   : > { %5216 = vmatprep.mubr.msk.f32.mxu1 %vm214_vm1, %v6027_v36  ;;  %5406 = vmatprep.mubr.msk.f32.mxu0 %vm214_vm1, %v4752_v0  ;;  %v6359_v36 = vld [vmem:[%s5874_s5 + $0x172] sm:$0xff] }
  0x7f   : > { %5217 = vmatmul.mubr.msk.f32.gmra.mrb[4].mxu1 %vm214_vm1, %v6043_v39  ;;  %5407 = vmatmul.mubr.msk.f32.vlgmr.msra.gmra.mrb[0].mxu0 %vm214_vm1, %v6342_v30  ;;  %v6375_v39 = vld [vmem:[%s5874_s5 + $0x192] sm:$0xff] }
  0x80   : > { %5419 = vmatpush3.msk.msra.mxu0 %vm239_vm0, %v4778_v47  ;;  %5219 = vmatprep.mubr.msk.f32.mxu1 %vm214_vm1, %v6175_v62  ;;  %v6378_v62 = vld [vmem:[%s5874_s5 + $0x1a2] sm:$0xff] }
  0x81   : > { %5409 = vmatprep.mubr.msk.f32.mxu0 %vm214_vm1, %v6345_v32  ;;  %5432 = vmatprep.subr.msk.mxu0 %vm239_vm0, %v4796_v2 }
  0x83   : > { %5220 = vmatmul.mubr.msk.f32.gmra.mrb[6].mxu1 %vm214_vm1, %v4507_v34  ;;  %5410 = vmatmul.mubr.msk.f32.gmra.mrb[2].mxu0 %vm214_vm1, %v6359_v36 }
  0x84   : > { %5224 = vmatprep.mubr.msk.f32.mxu1 %vm214_vm1, %v5890_v8  ;;  %5412 = vmatprep.mubr.msk.f32.mxu0 %vm214_vm1, %v6364_v6  ;;  %v6391_v8 = vld [vmem:[%s5874_s5 + $0x1b2] sm:$0xff] }
  0x87   : > { %5225 = vmatmul.mubr.msk.f32.vlgmr.msra.gmra.mrb[0].mxu1 %vm214_vm1, %v5908_v12  ;;  %5413 = vmatmul.mubr.msk.f32.gmra.mrb[4].mxu0 %vm214_vm1, %v6375_v39  ;;  %v4814_v12 = vld [vmem:[%s6684_s1 + $0x5c] sm:$0xf] }
  0x88   : > { %5237 = vmatpush3.msk.msra.mxu1 %vm239_vm0, %v4544_v63  ;;  %5227 = vmatprep.mubr.msk.f32.mxu1 %vm214_vm1, %v5918_v14  ;;  %v4525_v14 = vld [vmem:[%s5874_s5 + $0x91] sm:$0xff] }
  0x89   : > { %5415 = vmatprep.mubr.msk.f32.mxu0 %vm214_vm1, %v6378_v62  ;;  %5250 = vmatprep.subr.msk.mxu1 %vm239_vm0, %v4562_v29 }
  0x8b   : > { %5228 = vmatmul.mubr.msk.f32.gmra.mrb[2].mxu1 %vm214_vm1, %v5934_v16  ;;  %5416 = vmatmul.mubr.msk.f32.gmra.mrb[6].mxu0 %vm214_vm1, %v6391_v8  ;;  %v4580_v16 = vld [vmem:[%s6684_s1 + $0x28] sm:$0xf] }
  0x8c   : > { %5230 = vmatprep.mubr.msk.f32.mxu1 %vm214_vm1, %v5940_v18  ;;  %5420 = vmatprep.mubr.msk.f32.mxu0 %vm214_vm1, %v6210_v3  ;;  %v6436_v18 = vld [vmem:[%s5874_s5 + $0x1c0] sm:$0xff] }
  0x8d   : > { %v4572_v3 = vld [vmem:[%s5874_s5 + $0xa1] sm:$0xff] }
  0x8f   : > { %5231 = vmatmul.mubr.msk.f32.gmra.mrb[4].mxu1 %vm214_vm1, %v5956_v21  ;;  %5421 = vmatmul.mubr.msk.f32.vlgmr.msra.gmra.mrb[0].mxu0 %vm214_vm1, %v6213_v4  ;;  %v4832_v21 = vld [vmem:[%s6684_s1 + $0x60] sm:$0xf] }
  0x90   : > { %5433 = vmatpush3.msk.msra.mxu0 %vm239_vm0, %v4796_v2  ;;  %5233 = vmatprep.mubr.msk.f32.mxu1 %vm214_vm1, %v6226_v10  ;;  %v4616_v10 = vld [vmem:[%s6684_s1 + $0x30] sm:$0xf] }
  0x91   : > { %5423 = vmatprep.mubr.msk.f32.mxu0 %vm214_vm1, %v6229_v11  ;;  %5446 = vmatprep.subr.msk.mxu0 %vm239_vm0, %v4814_v12 }
  0x93   : > { %5234 = vmatmul.mubr.msk.f32.gmra.mrb[6].mxu1 %vm214_vm1, %v4525_v14  ;;  %5424 = vmatmul.mubr.msk.f32.gmra.mrb[2].mxu0 %vm214_vm1, %v6234_v20 }
  0x94   : > { %5238 = vmatprep.mubr.msk.f32.mxu1 %vm214_vm1, %v6069_v45  ;;  %5426 = vmatprep.mubr.msk.f32.mxu0 %vm214_vm1, %v6246_v23  ;;  %v4543_v45 = vld [vmem:[%s5874_s5 + $0x92] sm:$0xff] }
  0x97   : > { %5239 = vmatmul.mubr.msk.f32.vlgmr.msra.gmra.mrb[0].mxu1 %vm214_vm1, %v6085_v48  ;;  %5427 = vmatmul.mubr.msk.f32.gmra.mrb[4].mxu0 %vm214_vm1, %v6249_v25  ;;  %v4554_v48 = vld [vmem:[%s5874_s5 + $0xa0] sm:$0xff] }
  0x98   : > { %5251 = vmatpush3.msk.msra.mxu1 %vm239_vm0, %v4562_v29  ;;  %5241 = vmatprep.mubr.msk.f32.mxu1 %vm214_vm1, %v6091_v50  ;;  %v6471_v50 = vld [vmem:[%s5874_s5 + $0xb0] sm:$0xff] }
  0x99   : > { %5429 = vmatprep.mubr.msk.f32.mxu0 %vm214_vm1, %v6262_v31  ;;  %5264 = vmatprep.subr.msk.mxu1 %vm239_vm0, %v4580_v16 }
  0x9b   : > { %5242 = vmatmul.mubr.msk.f32.gmra.mrb[2].mxu1 %vm214_vm1, %v6102_v51  ;;  %5430 = vmatmul.mubr.msk.f32.gmra.mrb[6].mxu0 %vm214_vm1, %v6436_v18  ;;  %v4598_v51 = vld [vmem:[%s6684_s1 + $0x2c] sm:$0xf] }
  0x9c   : > { %5244 = vmatprep.mubr.msk.f32.mxu1 %vm214_vm1, %v6105_v52  ;;  %5434 = vmatprep.mubr.msk.f32.mxu0 %vm214_vm1, %v6276_v41  ;;  %v6484_v52 = vld [vmem:[%s5874_s5 + $0x1c1] sm:$0xff] }
  0x9f   : > { %5245 = vmatmul.mubr.msk.f32.gmra.mrb[4].mxu1 %vm214_vm1, %v6118_v54  ;;  %5435 = vmatmul.mubr.msk.f32.vlgmr.msra.gmra.mrb[0].mxu0 %vm214_vm1, %v6279_v43  ;;  %v4850_v54 = vld [vmem:[%s6684_s1 + $0x64] sm:$0xf] }
  0xa0   : > { %5447 = vmatpush3.msk.msra.mxu0 %vm239_vm0, %v4814_v12  ;;  %5247 = vmatprep.mubr.msk.f32.mxu1 %vm214_vm1, %v6292_v49 }
  0xa1   : > { %5437 = vmatprep.mubr.msk.f32.mxu0 %vm214_vm1, %v6295_v53  ;;  %5460 = vmatprep.subr.msk.mxu0 %vm239_vm0, %v4832_v21 }
  0xa3   : > { %5248 = vmatmul.mubr.msk.f32.gmra.mrb[6].mxu1 %vm214_vm1, %v4543_v45  ;;  %5438 = vmatmul.mubr.msk.f32.gmra.mrb[2].mxu0 %vm214_vm1, %v6300_v59 }
  0xa4   : > { %5252 = vmatprep.mubr.msk.f32.mxu1 %vm214_vm1, %v4554_v48  ;;  %5440 = vmatprep.mubr.msk.f32.mxu0 %vm214_vm1, %v6312_v60 }
  0xa7   : > { %5253 = vmatmul.mubr.msk.f32.vlgmr.msra.gmra.mrb[0].mxu1 %vm214_vm1, %v6471_v50  ;;  %5441 = vmatmul.mubr.msk.f32.gmra.mrb[4].mxu0 %vm214_vm1, %v6315_v61 }
  0xa8   : > { %5265 = vmatpush3.msk.msra.mxu1 %vm239_vm0, %v4580_v16  ;;  %5255 = vmatprep.mubr.msk.f32.mxu1 %vm214_vm1, %v6009_v33 }
  0xa9   : > { %5443 = vmatprep.mubr.msk.f32.mxu0 %vm214_vm1, %v6328_v27  ;;  %5278 = vmatprep.subr.msk.mxu1 %vm239_vm0, %v4598_v51 }
  0xab   : > { %5256 = vmatmul.mubr.msk.f32.gmra.mrb[2].mxu1 %vm214_vm1, %v6024_v35  ;;  %5444 = vmatmul.mubr.msk.f32.gmra.mrb[6].mxu0 %vm214_vm1, %v6484_v52 }
  0xac   : > { %5258 = vmatprep.mubr.msk.f32.mxu1 %vm214_vm1, %v6030_v37  ;;  %5448 = vmatprep.mubr.msk.f32.mxu0 %vm214_vm1, %v6342_v30 }
  0xaf   : > { %5259 = vmatmul.mubr.msk.f32.gmra.mrb[4].mxu1 %vm214_vm1, %v6046_v40  ;;  %5449 = vmatmul.mubr.msk.f32.vlgmr.msra.gmra.mrb[0].mxu0 %vm214_vm1, %v6345_v32 }
  0xb0   : > { %5461 = vmatpush3.msk.msra.mxu0 %vm239_vm0, %v4832_v21  ;;  %5261 = vmatprep.mubr.msk.f32.mxu1 %vm214_vm1, %v6052_v42 }
  0xb1   : > { %5451 = vmatprep.mubr.msk.f32.mxu0 %vm214_vm1, %v6359_v36  ;;  %5474 = vmatprep.subr.msk.mxu0 %vm239_vm0, %v4850_v54 }
  0xb3   : > { %5262 = vmatmul.mubr.msk.f32.gmra.mrb[6].mxu1 %vm214_vm1, %v6066_v44  ;;  %5452 = vmatmul.mubr.msk.f32.gmra.mrb[2].mxu0 %vm214_vm1, %v6364_v6 }
  0xb4   : > { %5266 = vmatprep.mubr.msk.f32.mxu1 %vm214_vm1, %v4572_v3  ;;  %5454 = vmatprep.mubr.msk.f32.mxu0 %vm214_vm1, %v6375_v39 }
  0xb7   : > { %5267 = vmatmul.mubr.msk.f32.vlgmr.msra.gmra.mrb[0].mxu1 %vm214_vm1, %v5878_v5  ;;  %5455 = vmatmul.mubr.msk.f32.gmra.mrb[4].mxu0 %vm214_vm1, %v6378_v62  ;;  %v4868_v5 = vld [vmem:[%s6684_s1 + $0x68] sm:$0xf] }
  0xb8   : > { %5279 = vmatpush3.msk.msra.mxu1 %vm239_vm0, %v4598_v51  ;;  %5269 = vmatprep.mubr.msk.f32.mxu1 %vm214_vm1, %v5887_v7  ;;  %v4590_v7 = vld [vmem:[%s5874_s5 + $0xa2] sm:$0xff] }
  0xb9   : > { %5457 = vmatprep.mubr.msk.f32.mxu0 %vm214_vm1, %v6391_v8  ;;  %5292 = vmatprep.subr.msk.mxu1 %vm239_vm0, %v4616_v10 }
  0xbb   : > { %5270 = vmatmul.mubr.msk.f32.gmra.mrb[2].mxu1 %vm214_vm1, %v5893_v9  ;;  %5458 = vmatmul.mubr.msk.f32.gmra.mrb[6].mxu0 %vm214_vm1, %v4813_v38  ;;  %v4831_v9 = vld [vmem:[%s5874_s5 + $0x1d0] sm:$0xff] }
  0xbc   : > { %5272 = vmatprep.mubr.msk.f32.mxu1 %vm214_vm1, %v5911_v13  ;;  %5462 = vmatprep.mubr.msk.f32.mxu0 %vm214_vm1, %v6213_v4  ;;  %v4849_v13 = vld [vmem:[%s5874_s5 + $0x1d1] sm:$0xff] }
  0xbf   : > { %5273 = vmatmul.mubr.msk.f32.gmra.mrb[4].mxu1 %vm214_vm1, %v6121_v55  ;;  %5463 = vmatmul.mubr.msk.f32.vlgmr.msra.gmra.mrb[0].mxu0 %vm214_vm1, %v6229_v11 }
  0xc0   : > { %5475 = vmatpush3.msk.msra.mxu0 %vm239_vm0, %v4850_v54  ;;  %5275 = vmatprep.mubr.msk.f32.mxu1 %vm214_vm1, %v6126_v56 }
  0xc1   : > { %5465 = vmatprep.mubr.msk.f32.mxu0 %vm214_vm1, %v6234_v20  ;;  %5488 = vmatprep.subr.msk.mxu0 %vm239_vm0, %v4868_v5 }
  0xc3   : > { %5276 = vmatmul.mubr.msk.f32.gmra.mrb[6].mxu1 %vm214_vm1, %v6138_v57  ;;  %5466 = vmatmul.mubr.msk.f32.gmra.mrb[2].mxu0 %vm214_vm1, %v6246_v23 }
  0xc4   : > { %5280 = vmatprep.mubr.msk.f32.mxu1 %vm214_vm1, %v4590_v7  ;;  %5468 = vmatprep.mubr.msk.f32.mxu0 %vm214_vm1, %v6249_v25 }
  0xc7   : > { %5281 = vmatmul.mubr.msk.f32.vlgmr.msra.gmra.mrb[0].mxu1 %vm214_vm1, %v5921_v15  ;;  %5469 = vmatmul.mubr.msk.f32.gmra.mrb[4].mxu0 %vm214_vm1, %v6262_v31 }
  0xc8   : > { %5293 = vmatpush3.msk.msra.mxu1 %vm239_vm0, %v4616_v10  ;;  %5283 = vmatprep.mubr.msk.f32.mxu1 %vm214_vm1, %v5937_v17 }
  0xc9   : > { %5471 = vmatprep.mubr.msk.f32.mxu0 %vm214_vm1, %v6436_v18  ;;  %5502 = vmatprep.subr.msk.mxu1 %vm239_vm0, %v5851_v1 }
  0xcb   : > { %5284 = vmatmul.mubr.msk.f32.gmra.mrb[2].mxu1 %vm214_vm1, %v5943_v19  ;;  %5472 = vmatmul.mubr.msk.f32.gmra.mrb[6].mxu0 %vm214_vm1, %v4831_v9 }
  0xcc   : > { %5286 = vmatprep.mubr.msk.f32.mxu1 %vm214_vm1, %v5959_v22  ;;  %5476 = vmatprep.mubr.msk.f32.mxu0 %vm214_vm1, %v6279_v43 }
  0xcf   : > { %5287 = vmatmul.mubr.msk.f32.gmra.mrb[4].mxu1 %vm214_vm1, %v5965_v24  ;;  %5477 = vmatmul.mubr.msk.f32.vlgmr.msra.gmra.mrb[0].mxu0 %vm214_vm1, %v6295_v53 }
  0xd0   : > { %5489 = vmatpush3.msk.msra.mxu0 %vm239_vm0, %v4868_v5  ;;  %5289 = vmatprep.mubr.msk.f32.mxu1 %vm214_vm1, %v5979_v26  ;;  %v4878_v26 = vld [vmem:[%s6685_s2] ss:$0 sm:$0xff] }
  0xd1   : > { %5479 = vmatprep.mubr.msk.f32.mxu0 %vm214_vm1, %v6300_v59 }
  0xd3   : > { %5290 = vmatmul.mubr.msk.f32.gmra.mrb[6].mxu1 %vm214_vm1, %v5985_v28  ;;  %5480 = vmatmul.mubr.msk.f32.gmra.mrb[2].mxu0 %vm214_vm1, %v6312_v60 }
  0xd4   : > { %5294 = vmatprep.mubr.msk.f32.mxu1 %vm214_vm1, %v6471_v50  ;;  %5482 = vmatprep.mubr.msk.f32.mxu0 %vm214_vm1, %v6315_v61 }
  0xd7   : > { %5295 = vmatmul.mubr.msk.f32.vlgmr.msra.gmra.mrb[0].mxu1 %vm214_vm1, %v6009_v33  ;;  %5483 = vmatmul.mubr.msk.f32.gmra.mrb[4].mxu0 %vm214_vm1, %v6328_v27 }
  0xd8   : > { %5503 = vmatpush3.msk.msra.mxu1 %vm239_vm0, %v5851_v1  ;;  %5297 = vmatprep.mubr.msk.f32.mxu1 %vm214_vm1, %v6024_v35  ;;  %v4867_v1 = vld [vmem:[%s5874_s5 + $0x1d2] sm:$0xff]  ;;  %s4416_s5 = sshll.u32 %s190_s23, 3 }
  0xd9   : > { %5485 = vmatprep.mubr.msk.f32.mxu0 %vm214_vm1, %v6484_v52  ;;  %s6650_s28 = scalar_lea.vmem %s6686_s3, %s4416_s5 }
  0xdb   : > { %5298 = vmatmul.mubr.msk.f32.gmra.mrb[2].mxu1 %vm214_vm1, %v6030_v37  ;;  %5486 = vmatmul.mubr.msk.f32.gmra.mrb[6].mxu0 %vm214_vm1, %v4849_v13 }
  0xdc   : > { %5300 = vmatprep.mubr.msk.f32.mxu1 %vm214_vm1, %v6046_v40  ;;  %5490 = vmatprep.mubr.msk.f32.mxu0 %vm214_vm1, %v6345_v32 }
  0xdf   : > { %5301 = vmatmul.mubr.msk.f32.gmra.mrb[4].mxu1 %vm214_vm1, %v6052_v42  ;;  %5491 = vmatmul.mubr.msk.f32.vlgmr.msra.gmra.mrb[0].mxu0 %vm214_vm1, %v6359_v36 }
  0xe0   : > { %5303 = vmatprep.mubr.msk.f32.mxu1 %vm214_vm1, %v6066_v44  ;;  %5493 = vmatprep.mubr.msk.f32.mxu0 %vm214_vm1, %v6364_v6 }
  0xe3   : > { %5304 = vmatmul.mubr.msk.f32.gmra.mrb[6].mxu1 %vm214_vm1, %v6072_v46  ;;  %5494 = vmatmul.mubr.msk.f32.gmra.mrb[2].mxu0 %vm214_vm1, %v6375_v39 }
  0xe4   : > { %5314 = vmatprep.mubr.msk.f32.mxu1 %vm214_vm1, %v6121_v55  ;;  %5496 = vmatprep.mubr.msk.f32.mxu0 %vm214_vm1, %v6378_v62 }
  0xe7   : > { %5315 = vmatmul.mubr.msk.f32.vlgmr.msra.gmra.mrb[4].mxu1 %vm214_vm1, %v6126_v56  ;;  %5497 = vmatmul.mubr.msk.f32.gmra.mrb[4].mxu0 %vm214_vm1, %v6391_v8 }
  0xe8   : > { %5317 = vmatprep.mubr.msk.f32.mxu1 %vm214_vm1, %v6138_v57  ;;  %5499 = vmatprep.mubr.msk.f32.mxu0 %vm214_vm1, %v4813_v38 }
  0xeb   : > { %5318 = vmatmul.mubr.msk.f32.gmra.mrb[6].mxu1 %vm214_vm1, %v6141_v58  ;;  %5500 = vmatmul.mubr.msk.f32.gmra.mrb[6].mxu0 %vm214_vm1, %v4867_v1 }
 0x1aa   : > { %v5296_v15 = vpop.f32.mrb[0].mxu1 }
 0x1ab   : > { %v2092_v17 = vpop.f32.mrb[1].mxu1 }
 0x1ae   : > { %v5299_v19 = vpop.f32.mrb[2].mxu1 }
 0x1af   : > { %v2102_v22 = vpop.f32.mrb[3].mxu1 }
 0x1b2   : > { %v5492_v24 = vpop.f32.mrb[0].mxu0 }
 0x1b3   : > { %v5504_v28 = vadd.f32 %v5492_v24, %v5296_v15  ;;  %v4201_v33 = vpop.f32.mrb[1].mxu0 }
 0x1b4   : > { %v5505_v35 = vadd.f32 %v4201_v33, %v2092_v17 }
 0x1b5   : > { %v4256_v37 = vadd.f32 %v5504_v28, %v4878_v26 }
 0x1b6   : > { %v4255_v40 = vadd.f32 %v5505_v35, %v4878_v26  ;;  %v5495_v42 = vpop.f32.mrb[2].mxu0 }
 0x1b7   : > { %vm4264_vm2 = vcmp.ge.f32.partialorder %v4256_v37, 0.0  ;;  %v4272_v44 = vmul.f32 0.01, %v4256_v37  ;;  %v5506_v46 = vadd.f32 %v5495_v42, %v5299_v19  ;;  %v4211_v55 = vpop.f32.mrb[3].mxu0 }
 0x1b8   : > { %vm4263_vm4 = vcmp.ge.f32.partialorder %v4255_v40, 0.0  ;;  %v4271_v56 = vmul.f32 0.01, %v4255_v40  ;;  %v5507_v57 = vadd.f32 %v4211_v55, %v2102_v22 }
 0x1b9   : > { %v4280_v58 = vsel %vm4264_vm2, %v4256_v37, %v4272_v44  ;;  %v4258_v4 = vadd.f32 %v5506_v46, %v4878_v26 }
 0x1ba   : > { %4289 = vst.msk [vmem:[%s6650_s28 + $0x8] sm:$0xff] %vm4287_vm3, %v4280_v58  ;;  %v4279_v11 = vsel %vm4263_vm4, %v4255_v40, %v4271_v56  ;;  %v4257_v20 = vadd.f32 %v5507_v57, %v4878_v26  ;;  %v5316_v23 = vpop.f32.mrb[4].mxu1  ;;  %v5498_v25 = vpop.f32.mrb[4].mxu0 }
 0x1bb   : > { %4288 = vst.msk [vmem:[%s6650_s28] sm:$0xff] %vm4287_vm3, %v4279_v11  ;;  %vm4266_vm5 = vcmp.ge.f32.partialorder %v4258_v4, 0.0  ;;  %v4274_v31 = vmul.f32 0.01, %v4258_v4  ;;  %v5508_v41 = vadd.f32 %v5498_v25, %v5316_v23  ;;  %v2262_v43 = vpop.f32.mrb[5].mxu1  ;;  %v4221_v47 = vpop.f32.mrb[5].mxu0 }
 0x1bc   : > { %vm4265_vm6 = vcmp.ge.f32.partialorder %v4257_v20, 0.0  ;;  %v4273_v49 = vmul.f32 0.01, %v4257_v20  ;;  %v5509_v53 = vadd.f32 %v4221_v47, %v2262_v43 }
 0x1bd   : > { %v4282_v59 = vsel %vm4266_vm5, %v4258_v4, %v4274_v31  ;;  %v4260_v60 = vadd.f32 %v5508_v41, %v4878_v26 }
 0x1be   : > { %4291 = vst.msk [vmem:[%s6650_s28 + $0x18] sm:$0xff] %vm4287_vm3, %v4282_v59  ;;  %v4281_v61 = vsel %vm4265_vm6, %v4257_v20, %v4273_v49  ;;  %v4259_v63 = vadd.f32 %v5509_v53, %v4878_v26  ;;  %v5319_v27 = vpop.f32.mrb[6].mxu1  ;;  %v5501_v0 = vpop.f32.mrb[6].mxu0 }
 0x1bf   : > { %4290 = vst.msk [vmem:[%s6650_s28 + $0x10] sm:$0xff] %vm4287_vm3, %v4281_v61  ;;  %vm4268_vm7 = vcmp.ge.f32.partialorder %v4260_v60, 0.0  ;;  %v4276_v30 = vmul.f32 0.01, %v4260_v60  ;;  %v5510_v32 = vadd.f32 %v5501_v0, %v5319_v27  ;;  %v2272_v2 = vpop.f32.mrb[7].mxu1  ;;  %v4231_v34 = vpop.f32.mrb[7].mxu0 }
 0x1c0   : > { %vm4267_vm8 = vcmp.ge.f32.partialorder %v4259_v63, 0.0  ;;  %v4275_v36 = vmul.f32 0.01, %v4259_v63  ;;  %v5511_v6 = vadd.f32 %v4231_v34, %v2272_v2 }
 0x1c1   : > { %v4284_v39 = vsel %vm4268_vm7, %v4260_v60, %v4276_v30  ;;  %v4262_v62 = vadd.f32 %v5510_v32, %v4878_v26 }
 0x1c2   : > { %4293 = vst.msk [vmem:[%s6650_s28 + $0x28] sm:$0xff] %vm4287_vm3, %v4284_v39  ;;  %v4283_v29 = vsel %vm4267_vm8, %v4259_v63, %v4275_v36  ;;  %v4261_v8 = vadd.f32 %v5511_v6, %v4878_v26 }
 0x1c3   : > { %4292 = vst.msk [vmem:[%s6650_s28 + $0x20] sm:$0xff] %vm4287_vm3, %v4283_v29  ;;  %vm4270_vm9 = vcmp.ge.f32.partialorder %v4262_v62, 0.0  ;;  %v4278_v12 = vmul.f32 0.01, %v4262_v62 }
 0x1c4   : > { %vm4269_vm10 = vcmp.ge.f32.partialorder %v4261_v8, 0.0  ;;  %v4277_v14 = vmul.f32 0.01, %v4261_v8 }
 0x1c5   : > { %v4286_v16 = vsel %vm4270_vm9, %v4262_v62, %v4278_v12 }
 0x1c6   : > { %4295 = vst.msk [vmem:[%s6650_s28 + $0x38] sm:$0xff] %vm4287_vm3, %v4286_v16  ;;  %v4285_v18 = vsel %vm4269_vm10, %v4261_v8, %v4277_v14 }
 0x1c7   : > { %4294 = vst.msk [vmem:[%s6650_s28 + $0x30] sm:$0xff] %vm4287_vm3, %v4285_v18 }
 0x1c8 PF: > { %s13_s16 = sadd.s32 1, %s5791_s16   ;;  %s6687_s12 = smov %s5783_s14 }
 0x1c9   : > { %p10_p7 = scmp.ge.s32.totalorder %s13_s16, 18   ;;  %s6688_s13 = smov %s5787_s15 }
 0x1ca   : > { %s6689_s14 = smov %s6692_s17  ;;  %s6690_s15 = smov %s6696_s18 }
 0x1cb   :  { %12 = sbr.rel (!%p10_p7) target bundleno = 3 (0x3), region = 97 }

// kernel: plain_conv3d_channel_shrink.4
= control target key start
LH: loop header
LB: loop body
LE: loop exit
PB: predicated region body
PF: predicated region fallthrough
CT: control target
= control target key end

     0   :  { %s5703_s12 = smov 0   ;;  %s5705_s13 = smov 0   ;;  %s6517_s0 = inlined_call_operand.vmem [shape: f32[2,10,10,10,8], index: 0, kind: input, shape index: {}]   ;;  %s6518_s1 = inlined_call_operand.vmem [shape: f32[27,8,8], index: 1, kind: input, shape index: {}]   ;;  %s6519_s2 = inlined_call_operand.vmem [shape: f32[1,8], index: 2, kind: input, shape index: {}]   ;;  %s6520_s3 = inlined_call_operand.vmem [shape: f32[2,8,8,8,8], index: 3, kind: output, shape index: {}]  }
   0x1   :  { %s5707_s14 = smov 0   ;;  %s5709_s15 = smov 0  }
   0x2   :  { %s5711_s16 = smov 0  }
   0x3 LB: > { %s22_s17 = sadd.s32 1, %s5673_s14  ;;  %s25_s18 = sadd.s32 1, %s5677_s15  ;;  %s5681_s16 = sphi %s5711_s16, %s13_s16   ;;  %s5677_s15 = sphi %s5709_s15, %s6524_s15   ;;  %s5673_s14 = sphi %s5707_s14, %s6523_s14   ;;  %s5669_s13 = sphi %s5705_s13, %s6522_s13   ;;  %s5665_s12 = sphi %s5703_s12, %s6521_s12  }
   0x4   : > { %p23_p0 = scmp.ge.s32.totalorder %s22_s17, 8  ;;  %p4329_p1 = scmp.ge.s32.totalorder %s5681_s16, 1 }
   0x5   : > { %p151_p2 = scmp.lt.s32.totalorder %s5681_s16, 17 }
   0x6   : > { %s6526_s17 = smov (%p23_p0, %s22_s17), 0  ;;  %s6528_s18 = smov (!%p23_p0, %s25_s18), %s5677_s15 }
   0x7   : > { %p152_p3 = pnand %p4329_p1, %p151_p2  ;;  %p27_p4 = scmp.ge.s32.totalorder %s6528_s18, 2 }
   0x8   : > { %v4334_v0 = vld [vmem:[%s6518_s1 + $0x8] sm:$0xff] (!%p152_p3)  ;;  %p179_p5 = scmp.lt.s32.totalorder (!%p152_p3), %s5669_s13, 1  ;;  %v203_v2 = vld [vmem:[%s6518_s1] sm:$0xff] (!%p152_p3)  ;;  %v4555_v3 = vld [vmem:[%s6518_s1 + $0x70] sm:$0xff] (!%p152_p3)  ;;  %s193_s27 = smul.u32 (!%p152_p3), 160, %s5665_s12  ;;  %vm214_vm0 = vcmask (!%p152_p3), 64512  }
   0x9   : > { %s6530_s18 = smov (%p27_p4, %s6528_s18), 0  ;;  %155 = sbr.rel (%p152_p3) target bundleno = 456 (0x1c8), region = 32 }
   0xa   : > { %v5741_v1 = vld [vmem:[%s6518_s1 + $0x68] sm:$0xff] (!%p152_p3)  ;;  %5014 = vmatprep.subr.mxu1 (!%p152_p3), %v4334_v0  ;;  %v4572_v10 = vld [vmem:[%s6518_s1 + $0x78] sm:$0xff] (!%p152_p3)  ;;  %v4351_v11 = vld [vmem:[%s6518_s1 + $0x10] sm:$0xff] (!%p152_p3)  ;;  %p186_p6 = scmp.lt.s32.totalorder (!%p152_p3), %s5665_s12, 7 }
   0xb   : > { %5196 = vmatprep.subr.mxu0 (!%p152_p3), %v5741_v1  ;;  %5015 = vmatpush3.msra.mxu1 (!%p152_p3), %v4334_v0  ;;  %v4589_v20 = vld [vmem:[%s6518_s1 + $0x80] sm:$0xff] (!%p152_p3)  ;;  %v4368_v29 = vld [vmem:[%s6518_s1 + $0x18] sm:$0xff] (!%p152_p3)  ;;  %v4606_v38 = vld [vmem:[%s6518_s1 + $0x88] sm:$0xff] (!%p152_p3) }
   0xc   : > { %5197 = vmatpush3.msra.mxu0 (!%p152_p3), %v5741_v1  ;;  %5028 = vmatprep.subr.mxu1 (!%p152_p3), %v203_v2  ;;  %v4385_v47 = vld [vmem:[%s6518_s1 + $0x20] sm:$0xff] (!%p152_p3)  ;;  %v4623_v53 = vld [vmem:[%s6518_s1 + $0x90] sm:$0xff] (!%p152_p3)  ;;  %v4402_v59 = vld [vmem:[%s6518_s1 + $0x28] sm:$0xff] (!%p152_p3) }
   0xd   : > { %5210 = vmatprep.subr.mxu0 (!%p152_p3), %v4555_v3  ;;  %v4640_v61 = vld [vmem:[%s6518_s1 + $0x98] sm:$0xff] (!%p152_p3)  ;;  %v4419_v63 = vld [vmem:[%s6518_s1 + $0x30] sm:$0xff] (!%p152_p3) }
  0x10   : > { %s6532_s13 = smov (!%p179_p5, %s5669_s13), 1  ;;  %s6534_s12 = smov (!%p186_p6, %s5665_s12), 7 }
  0x11   : > { %s5602_s28 = smul.u32 1600, %s6532_s13  ;;  %s4331_s21 = sshll.u32 %s6534_s12, 3 }
  0x12   : > { %s4332_s22 = sshll.u32 %s6532_s13, 6 }
  0x13   : > { %s183_s4 = scalar_lea.vmem %s6517_s0, %s5602_s28  ;;  %s190_s23 = sadd.s32 %s4332_s22, %s4331_s21 }
  0x14   : > { %s5758_s5 = scalar_lea.vmem %s183_s4, %s193_s27 }
  0x15   : > { %v204_v4 = vld [vmem:[%s5758_s5 + $0x1] sm:$0xff]  ;;  %v5762_v5 = vld [vmem:[%s5758_s5 + $0xb1] sm:$0xff] }
  0x16   : > { %v5765_v6 = vld [vmem:[%s5758_s5 + $0x11] sm:$0xff]  ;;  %5016 = vmatprep.mubr.msk.f32.mxu1 %vm214_vm0, %v204_v4  ;;  %5198 = vmatprep.mubr.msk.f32.mxu0 %vm214_vm0, %v5762_v5  ;;  %v5771_v7 = vld [vmem:[%s5758_s5 + $0xc1] sm:$0xff] }
  0x17   : > { %v5774_v8 = vld [vmem:[%s5758_s5 + $0x21] sm:$0xff]  ;;  %v5777_v9 = vld [vmem:[%s5758_s5 + $0xd1] sm:$0xff]  ;;  %5017 = vmatmul.mubr.msk.f32.vlgmr.msra.gmra.mrb[0].mxu1 %vm214_vm0, %v5765_v6  ;;  %5199 = vmatmul.mubr.msk.f32.vlgmr.msra.gmra.mrb[0].mxu0 %vm214_vm0, %v5771_v7 }
  0x18   : > { %5029 = vmatpush3.msra.mxu1 %v203_v2  ;;  %5211 = vmatpush3.msra.mxu0 %v4555_v3  ;;  %v5790_v12 = vld [vmem:[%s5758_s5 + $0x31] sm:$0xff]  ;;  %v5793_v13 = vld [vmem:[%s5758_s5 + $0xe1] sm:$0xff] }
  0x19   : > { %5019 = vmatprep.mubr.msk.f32.mxu1 %vm214_vm0, %v5774_v8  ;;  %5201 = vmatprep.mubr.msk.f32.mxu0 %vm214_vm0, %v5777_v9  ;;  %v5800_v14 = vld [vmem:[%s5758_s5 + $0x41] sm:$0xff]  ;;  %v5803_v15 = vld [vmem:[%s5758_s5 + $0xb2] sm:$0xff] }
  0x1a   : > { %5224 = vmatprep.subr.mxu0 %v4572_v10  ;;  %5042 = vmatprep.subr.mxu1 %v4351_v11  ;;  %v5814_v16 = vld [vmem:[%s5758_s5 + $0x51] sm:$0xff]  ;;  %v5817_v17 = vld [vmem:[%s5758_s5 + $0xc2] sm:$0xff] }
  0x1b   : > { %5020 = vmatmul.mubr.msk.f32.gmra.mrb[2].mxu1 %vm214_vm0, %v5790_v12  ;;  %5202 = vmatmul.mubr.msk.f32.gmra.mrb[2].mxu0 %vm214_vm0, %v5793_v13  ;;  %v5820_v18 = vld [vmem:[%s5758_s5 + $0x61] sm:$0xff]  ;;  %v5823_v19 = vld [vmem:[%s5758_s5 + $0xd2] sm:$0xff] }
  0x1c   : > { %5022 = vmatprep.mubr.msk.f32.mxu1 %vm214_vm0, %v5800_v14  ;;  %5212 = vmatprep.mubr.msk.f32.mxu0 %vm214_vm0, %v5803_v15  ;;  %v5835_v21 = vld [vmem:[%s5758_s5 + $0x71] sm:$0xff]  ;;  %v5838_v22 = vld [vmem:[%s5758_s5 + $0xe2] sm:$0xff] }
  0x1d   : > { %v195_v23 = vld [vmem:[%s5758_s5] sm:$0xff]  ;;  %v5844_v24 = vld [vmem:[%s5758_s5 + $0xf2] sm:$0xff] }
  0x1e   : > { %v5854_v25 = vld [vmem:[%s5758_s5 + $0x10] sm:$0xff]  ;;  %v5857_v26 = vld [vmem:[%s5758_s5 + $0x102] sm:$0xff] }
  0x1f   : > { %5023 = vmatmul.mubr.msk.f32.gmra.mrb[4].mxu1 %vm214_vm0, %v5814_v16  ;;  %5213 = vmatmul.mubr.msk.f32.vlgmr.msra.gmra.mrb[0].mxu0 %vm214_vm0, %v5817_v17  ;;  %v5860_v27 = vld [vmem:[%s5758_s5 + $0x20] sm:$0xff]  ;;  %v5863_v28 = vld [vmem:[%s5758_s5 + $0x112] sm:$0xff] }
  0x20   : > { %5225 = vmatpush3.msra.mxu0 %v4572_v10  ;;  %5025 = vmatprep.mubr.msk.f32.mxu1 %vm214_vm0, %v5820_v18  ;;  %v5875_v30 = vld [vmem:[%s5758_s5 + $0x30] sm:$0xff]  ;;  %v5878_v31 = vld [vmem:[%s5758_s5 + $0x122] sm:$0xff] }
  0x21   : > { %5215 = vmatprep.mubr.msk.f32.mxu0 %vm214_vm0, %v5823_v19  ;;  %5238 = vmatprep.subr.mxu0 %v4589_v20  ;;  %v5883_v32 = vld [vmem:[%s5758_s5 + $0x40] sm:$0xff]  ;;  %v5897_v34 = vld [vmem:[%s5758_s5 + $0x50] sm:$0xff] }
  0x22   : > { %v5886_v33 = vld [vmem:[%s5758_s5 + $0xc0] sm:$0xff]  ;;  %v5900_v35 = vld [vmem:[%s5758_s5 + $0xd0] sm:$0xff] }
  0x23   : > { %5026 = vmatmul.mubr.msk.f32.gmra.mrb[6].mxu1 %vm214_vm0, %v5835_v21  ;;  %5216 = vmatmul.mubr.msk.f32.gmra.mrb[2].mxu0 %vm214_vm0, %v5838_v22  ;;  %v5903_v36 = vld [vmem:[%s5758_s5 + $0x60] sm:$0xff]  ;;  %v5918_v39 = vld [vmem:[%s5758_s5 + $0x70] sm:$0xff] }
  0x24   : > { %5030 = vmatprep.mubr.msk.f32.mxu1 %vm214_vm0, %v195_v23  ;;  %5218 = vmatprep.mubr.msk.f32.mxu0 %vm214_vm0, %v5844_v24  ;;  %v5906_v37 = vld [vmem:[%s5758_s5 + $0xe0] sm:$0xff]  ;;  %v5921_v40 = vld [vmem:[%s5758_s5 + $0xf0] sm:$0xff] }
  0x25   : > { %v473_v41 = vld [vmem:[%s5758_s5 + $0x2] sm:$0xff]  ;;  %v5937_v43 = vld [vmem:[%s5758_s5 + $0x12] sm:$0xff] }
  0x26   : > { %v5927_v42 = vld [vmem:[%s5758_s5 + $0x100] sm:$0xff]  ;;  %v5940_v44 = vld [vmem:[%s5758_s5 + $0x110] sm:$0xff] }
  0x27   : > { %5031 = vmatmul.mubr.msk.f32.vlgmr.msra.gmra.mrb[0].mxu1 %vm214_vm0, %v5854_v25  ;;  %5219 = vmatmul.mubr.msk.f32.gmra.mrb[4].mxu0 %vm214_vm0, %v5857_v26  ;;  %v5943_v45 = vld [vmem:[%s5758_s5 + $0x22] sm:$0xff]  ;;  %v5958_v48 = vld [vmem:[%s5758_s5 + $0x32] sm:$0xff] }
  0x28   : > { %5043 = vmatpush3.msra.mxu1 %v4351_v11  ;;  %5033 = vmatprep.mubr.msk.f32.mxu1 %vm214_vm0, %v5860_v27  ;;  %v5946_v46 = vld [vmem:[%s5758_s5 + $0x120] sm:$0xff]  ;;  %v4571_v49 = vld [vmem:[%s5758_s5 + $0x130] sm:$0xff] }
  0x29   : > { %5221 = vmatprep.mubr.msk.f32.mxu0 %vm214_vm0, %v5863_v28  ;;  %5056 = vmatprep.subr.mxu1 %v4368_v29  ;;  %v5964_v50 = vld [vmem:[%s5758_s5 + $0x42] sm:$0xff]  ;;  %v5974_v51 = vld [vmem:[%s5758_s5 + $0x52] sm:$0xff] }
  0x2a   : > { %v5977_v52 = vld [vmem:[%s5758_s5 + $0x62] sm:$0xff]  ;;  %v5989_v54 = vld [vmem:[%s5758_s5 + $0x72] sm:$0xff] }
  0x2b   : > { %5034 = vmatmul.mubr.msk.f32.gmra.mrb[2].mxu1 %vm214_vm0, %v5875_v30  ;;  %5222 = vmatmul.mubr.msk.f32.gmra.mrb[6].mxu0 %vm214_vm0, %v5878_v31  ;;  %v5992_v55 = vld [vmem:[%s5758_s5 + $0xf1] sm:$0xff]  ;;  %v5997_v56 = vld [vmem:[%s5758_s5 + $0x101] sm:$0xff] }
  0x2c   : > { %5036 = vmatprep.mubr.msk.f32.mxu1 %vm214_vm0, %v5883_v32  ;;  %5226 = vmatprep.mubr.msk.f32.mxu0 %vm214_vm0, %v5886_v33  ;;  %v6008_v57 = vld [vmem:[%s5758_s5 + $0x111] sm:$0xff]  ;;  %v6011_v58 = vld [vmem:[%s5758_s5 + $0x121] sm:$0xff] }
  0x2d   : > { %v4588_v60 = vld [vmem:[%s5758_s5 + $0x131] sm:$0xff]  ;;  %v6042_v62 = vld [vmem:[%s5758_s5 + $0x80] sm:$0xff] }
  0x2e   : > { %v4605_v0 = vld [vmem:[%s5758_s5 + $0x132] sm:$0xff]  ;;  %v4615_v2 = vld [vmem:[%s5758_s5 + $0x140] sm:$0xff] }
  0x2f   : > { %5037 = vmatmul.mubr.msk.f32.gmra.mrb[4].mxu1 %vm214_vm0, %v5897_v34  ;;  %5227 = vmatmul.mubr.msk.f32.vlgmr.msra.gmra.mrb[0].mxu0 %vm214_vm0, %v5900_v35  ;;  %v6074_v3 = vld [vmem:[%s5758_s5 + $0x150] sm:$0xff]  ;;  %v6077_v4 = vld [vmem:[%s5758_s5 + $0x160] sm:$0xff] }
  0x30   : > { %5239 = vmatpush3.msra.mxu0 %v4589_v20  ;;  %5039 = vmatprep.mubr.msk.f32.mxu1 %vm214_vm0, %v5903_v36  ;;  %v6089_v10 = vld [vmem:[%s5758_s5 + $0x81] sm:$0xff]  ;;  %v6092_v11 = vld [vmem:[%s5758_s5 + $0x170] sm:$0xff] }
  0x31   : > { %5229 = vmatprep.mubr.msk.f32.mxu0 %vm214_vm0, %v5906_v37  ;;  %5252 = vmatprep.subr.mxu0 %v4606_v38  ;;  %v6097_v20 = vld [vmem:[%s5758_s5 + $0x180] sm:$0xff]  ;;  %v6108_v23 = vld [vmem:[%s5758_s5 + $0x190] sm:$0xff] }
  0x33   : > { %5040 = vmatmul.mubr.msk.f32.gmra.mrb[6].mxu1 %vm214_vm0, %v5918_v39  ;;  %5230 = vmatmul.mubr.msk.f32.gmra.mrb[2].mxu0 %vm214_vm0, %v5921_v40 }
  0x34   : > { %5044 = vmatprep.mubr.msk.f32.mxu1 %vm214_vm0, %v473_v41  ;;  %5232 = vmatprep.mubr.msk.f32.mxu0 %vm214_vm0, %v5927_v42  ;;  %v6136_v41 = vld [vmem:[%s5758_s5 + $0x151] sm:$0xff] }
  0x37   : > { %5045 = vmatmul.mubr.msk.f32.vlgmr.msra.gmra.mrb[0].mxu1 %vm214_vm0, %v5937_v43  ;;  %5233 = vmatmul.mubr.msk.f32.gmra.mrb[4].mxu0 %vm214_vm0, %v5940_v44 }
  0x38   : > { %5057 = vmatpush3.msra.mxu1 %v4368_v29  ;;  %5047 = vmatprep.mubr.msk.f32.mxu1 %vm214_vm0, %v5943_v45  ;;  %v4436_v29 = vld [vmem:[%s6518_s1 + $0x38] sm:$0xff] }
  0x39   : > { %5235 = vmatprep.mubr.msk.f32.mxu0 %vm214_vm0, %v5946_v46  ;;  %5070 = vmatprep.subr.mxu1 %v4385_v47 }
  0x3b   : > { %5048 = vmatmul.mubr.msk.f32.gmra.mrb[2].mxu1 %vm214_vm0, %v5958_v48  ;;  %5236 = vmatmul.mubr.msk.f32.gmra.mrb[6].mxu0 %vm214_vm0, %v4571_v49  ;;  %v6151_v49 = vld [vmem:[%s5758_s5 + $0x82] sm:$0xff] }
  0x3c   : > { %5050 = vmatprep.mubr.msk.f32.mxu1 %vm214_vm0, %v5964_v50  ;;  %5240 = vmatprep.mubr.msk.f32.mxu0 %vm214_vm0, %v5771_v7 }
  0x3f   : > { %5051 = vmatmul.mubr.msk.f32.gmra.mrb[4].mxu1 %vm214_vm0, %v5974_v51  ;;  %5241 = vmatmul.mubr.msk.f32.vlgmr.msra.gmra.mrb[0].mxu0 %vm214_vm0, %v5777_v9 }
  0x40   : > { %5253 = vmatpush3.msra.mxu0 %v4606_v38  ;;  %5053 = vmatprep.mubr.msk.f32.mxu1 %vm214_vm0, %v5977_v52  ;;  %v4632_v38 = vld [vmem:[%s5758_s5 + $0x141] sm:$0xff] }
  0x41   : > { %5243 = vmatprep.mubr.msk.f32.mxu0 %vm214_vm0, %v5793_v13  ;;  %5266 = vmatprep.subr.mxu0 %v4623_v53 }
  0x43   : > { %5054 = vmatmul.mubr.msk.f32.gmra.mrb[6].mxu1 %vm214_vm0, %v5989_v54  ;;  %5244 = vmatmul.mubr.msk.f32.gmra.mrb[2].mxu0 %vm214_vm0, %v5992_v55 }
  0x44   : > { %5058 = vmatprep.mubr.msk.f32.mxu1 %vm214_vm0, %v5854_v25  ;;  %5246 = vmatprep.mubr.msk.f32.mxu0 %vm214_vm0, %v5997_v56  ;;  %v6111_v25 = vld [vmem:[%s5758_s5 + $0x1a0] sm:$0xff] }
  0x47   : > { %5059 = vmatmul.mubr.msk.f32.vlgmr.msra.gmra.mrb[0].mxu1 %vm214_vm0, %v5860_v27  ;;  %5247 = vmatmul.mubr.msk.f32.gmra.mrb[4].mxu0 %vm214_vm0, %v6008_v57 }
  0x48   : > { %5071 = vmatpush3.msra.mxu1 %v4385_v47  ;;  %5061 = vmatprep.mubr.msk.f32.mxu1 %vm214_vm0, %v5875_v30  ;;  %v4674_v47 = vld [vmem:[%s6518_s1 + $0xa8] sm:$0xff] }
  0x49   : > { %5249 = vmatprep.mubr.msk.f32.mxu0 %vm214_vm0, %v6011_v58  ;;  %5084 = vmatprep.subr.mxu1 %v4402_v59 }
  0x4b   : > { %5062 = vmatmul.mubr.msk.f32.gmra.mrb[2].mxu1 %vm214_vm0, %v5883_v32  ;;  %5250 = vmatmul.mubr.msk.f32.gmra.mrb[6].mxu0 %vm214_vm0, %v4588_v60  ;;  %v6170_v60 = vld [vmem:[%s5758_s5 + $0x191] sm:$0xff] }
  0x4c   : > { %5064 = vmatprep.mubr.msk.f32.mxu1 %vm214_vm0, %v5897_v34  ;;  %5254 = vmatprep.mubr.msk.f32.mxu0 %vm214_vm0, %v5817_v17 }
  0x4f   : > { %5065 = vmatmul.mubr.msk.f32.gmra.mrb[4].mxu1 %vm214_vm0, %v5903_v36  ;;  %5255 = vmatmul.mubr.msk.f32.vlgmr.msra.gmra.mrb[0].mxu0 %vm214_vm0, %v5823_v19 }
  0x50   : > { %5267 = vmatpush3.msra.mxu0 %v4623_v53  ;;  %5067 = vmatprep.mubr.msk.f32.mxu1 %vm214_vm0, %v5918_v39  ;;  %v6154_v53 = vld [vmem:[%s5758_s5 + $0x171] sm:$0xff] }
  0x51   : > { %5257 = vmatprep.mubr.msk.f32.mxu0 %vm214_vm0, %v5838_v22  ;;  %5280 = vmatprep.subr.mxu0 %v4640_v61 }
  0x53   : > { %5068 = vmatmul.mubr.msk.f32.gmra.mrb[6].mxu1 %vm214_vm0, %v6042_v62  ;;  %5258 = vmatmul.mubr.msk.f32.gmra.mrb[2].mxu0 %vm214_vm0, %v5844_v24 }
  0x54   : > { %5072 = vmatprep.mubr.msk.f32.mxu1 %vm214_vm0, %v5765_v6  ;;  %5260 = vmatprep.mubr.msk.f32.mxu0 %vm214_vm0, %v5857_v26  ;;  %v4657_v6 = vld [vmem:[%s6518_s1 + $0xa0] sm:$0xff] }
  0x57   : > { %5073 = vmatmul.mubr.msk.f32.vlgmr.msra.gmra.mrb[0].mxu1 %vm214_vm0, %v5774_v8  ;;  %5261 = vmatmul.mubr.msk.f32.gmra.mrb[4].mxu0 %vm214_vm0, %v5863_v28 }
  0x58   : > { %5085 = vmatpush3.msra.mxu1 %v4402_v59  ;;  %5075 = vmatprep.mubr.msk.f32.mxu1 %vm214_vm0, %v5790_v12  ;;  %v6159_v59 = vld [vmem:[%s5758_s5 + $0x181] sm:$0xff] }
  0x59   : > { %5263 = vmatprep.mubr.msk.f32.mxu0 %vm214_vm0, %v5878_v31  ;;  %5098 = vmatprep.subr.mxu1 %v4419_v63  ;;  %v6123_v31 = vld [vmem:[%s5758_s5 + $0x1b0] sm:$0xff] }
  0x5b   : > { %5076 = vmatmul.mubr.msk.f32.gmra.mrb[2].mxu1 %vm214_vm0, %v5800_v14  ;;  %5264 = vmatmul.mubr.msk.f32.gmra.mrb[6].mxu0 %vm214_vm0, %v4605_v0  ;;  %v4649_v0 = vld [vmem:[%s5758_s5 + $0x142] sm:$0xff] }
  0x5c   : > { %5078 = vmatprep.mubr.msk.f32.mxu1 %vm214_vm0, %v5814_v16  ;;  %5268 = vmatprep.mubr.msk.f32.mxu0 %vm214_vm0, %v4615_v2  ;;  %v4691_v2 = vld [vmem:[%s6518_s1 + $0xb0] sm:$0xff] }
  0x5f   : > { %5079 = vmatmul.mubr.msk.f32.gmra.mrb[4].mxu1 %vm214_vm0, %v5820_v18  ;;  %5269 = vmatmul.mubr.msk.f32.vlgmr.msra.gmra.mrb[0].mxu0 %vm214_vm0, %v6074_v3 }
  0x60   : > { %5281 = vmatpush3.msra.mxu0 %v4640_v61  ;;  %5081 = vmatprep.mubr.msk.f32.mxu1 %vm214_vm0, %v5835_v21  ;;  %v6173_v61 = vld [vmem:[%s5758_s5 + $0x1a1] sm:$0xff] }
  0x61   : > { %5271 = vmatprep.mubr.msk.f32.mxu0 %vm214_vm0, %v6077_v4  ;;  %5294 = vmatprep.subr.mxu0 %v4657_v6 }
  0x63   : > { %5082 = vmatmul.mubr.msk.f32.gmra.mrb[6].mxu1 %vm214_vm0, %v6089_v10  ;;  %5272 = vmatmul.mubr.msk.f32.gmra.mrb[2].mxu0 %vm214_vm0, %v6092_v11 }
  0x64   : > { %5086 = vmatprep.mubr.msk.f32.mxu1 %vm214_vm0, %v5937_v43  ;;  %5274 = vmatprep.mubr.msk.f32.mxu0 %vm214_vm0, %v6097_v20  ;;  %v6139_v43 = vld [vmem:[%s5758_s5 + $0x161] sm:$0xff] }
  0x67   : > { %5087 = vmatmul.mubr.msk.f32.vlgmr.msra.gmra.mrb[0].mxu1 %vm214_vm0, %v5943_v45  ;;  %5275 = vmatmul.mubr.msk.f32.gmra.mrb[4].mxu0 %vm214_vm0, %v6108_v23 }
  0x68   : > { %5099 = vmatpush3.msra.mxu1 %v4419_v63  ;;  %5089 = vmatprep.mubr.msk.f32.mxu1 %vm214_vm0, %v5958_v48  ;;  %v4453_v63 = vld [vmem:[%s6518_s1 + $0x40] sm:$0xff] }
  0x69   : > { %5277 = vmatprep.mubr.msk.f32.mxu0 %vm214_vm0, %v6111_v25  ;;  %5112 = vmatprep.subr.mxu1 %v4436_v29 }
  0x6b   : > { %5090 = vmatmul.mubr.msk.f32.gmra.mrb[2].mxu1 %vm214_vm0, %v5964_v50  ;;  %5278 = vmatmul.mubr.msk.f32.gmra.mrb[6].mxu0 %vm214_vm0, %v6123_v31 }
  0x6c   : > { %5092 = vmatprep.mubr.msk.f32.mxu1 %vm214_vm0, %v5974_v51  ;;  %5282 = vmatprep.mubr.msk.f32.mxu0 %vm214_vm0, %v4632_v38  ;;  %v4707_v38 = vld [vmem:[%s5758_s5 + $0x1c2] sm:$0xff] }
  0x6f   : > { %5093 = vmatmul.mubr.msk.f32.gmra.mrb[4].mxu1 %vm214_vm0, %v5977_v52  ;;  %5283 = vmatmul.mubr.msk.f32.vlgmr.msra.gmra.mrb[0].mxu0 %vm214_vm0, %v6136_v41 }
  0x70   : > { %5295 = vmatpush3.msra.mxu0 %v4657_v6  ;;  %5095 = vmatprep.mubr.msk.f32.mxu1 %vm214_vm0, %v5989_v54  ;;  %v6219_v6 = vld [vmem:[%s5758_s5 + $0x182] sm:$0xff] }
  0x71   : > { %5285 = vmatprep.mubr.msk.f32.mxu0 %vm214_vm0, %v6139_v43  ;;  %5308 = vmatprep.subr.mxu0 %v4674_v47 }
  0x73   : > { %5096 = vmatmul.mubr.msk.f32.gmra.mrb[6].mxu1 %vm214_vm0, %v6151_v49  ;;  %5286 = vmatmul.mubr.msk.f32.gmra.mrb[2].mxu0 %vm214_vm0, %v6154_v53 }
  0x74   : > { %5100 = vmatprep.mubr.msk.f32.mxu1 %vm214_vm0, %v5860_v27  ;;  %5288 = vmatprep.mubr.msk.f32.mxu0 %vm214_vm0, %v6159_v59  ;;  %v6185_v27 = vld [vmem:[%s5758_s5 + $0x1b1] sm:$0xff] }
  0x77   : > { %5101 = vmatmul.mubr.msk.f32.vlgmr.msra.gmra.mrb[0].mxu1 %vm214_vm0, %v5875_v30  ;;  %5289 = vmatmul.mubr.msk.f32.gmra.mrb[4].mxu0 %vm214_vm0, %v6170_v60  ;;  %v6198_v30 = vld [vmem:[%s5758_s5 + $0x152] sm:$0xff] }
  0x78   : > { %5113 = vmatpush3.msra.mxu1 %v4436_v29  ;;  %5103 = vmatprep.mubr.msk.f32.mxu1 %vm214_vm0, %v5883_v32  ;;  %v6201_v32 = vld [vmem:[%s5758_s5 + $0x162] sm:$0xff] }
  0x79   : > { %5291 = vmatprep.mubr.msk.f32.mxu0 %vm214_vm0, %v6173_v61  ;;  %5126 = vmatprep.subr.mxu1 %v4453_v63  ;;  %v4470_v29 = vld [vmem:[%s6518_s1 + $0x48] sm:$0xff] }
  0x7b   : > { %5104 = vmatmul.mubr.msk.f32.gmra.mrb[2].mxu1 %vm214_vm0, %v5897_v34  ;;  %5292 = vmatmul.mubr.msk.f32.gmra.mrb[6].mxu0 %vm214_vm0, %v6185_v27  ;;  %v4418_v34 = vld [vmem:[%s5758_s5 + $0x90] sm:$0xff] }
  0x7c   : > { %5106 = vmatprep.mubr.msk.f32.mxu1 %vm214_vm0, %v5903_v36  ;;  %5296 = vmatprep.mubr.msk.f32.mxu0 %vm214_vm0, %v4649_v0  ;;  %v6214_v36 = vld [vmem:[%s5758_s5 + $0x172] sm:$0xff] }
  0x7f   : > { %5107 = vmatmul.mubr.msk.f32.gmra.mrb[4].mxu1 %vm214_vm0, %v5918_v39  ;;  %5297 = vmatmul.mubr.msk.f32.vlgmr.msra.gmra.mrb[0].mxu0 %vm214_vm0, %v6198_v30  ;;  %v6229_v39 = vld [vmem:[%s5758_s5 + $0x192] sm:$0xff] }
  0x80   : > { %5309 = vmatpush3.msra.mxu0 %v4674_v47  ;;  %5109 = vmatprep.mubr.msk.f32.mxu1 %vm214_vm0, %v6042_v62  ;;  %v6232_v62 = vld [vmem:[%s5758_s5 + $0x1a2] sm:$0xff] }
  0x81   : > { %5299 = vmatprep.mubr.msk.f32.mxu0 %vm214_vm0, %v6201_v32  ;;  %5322 = vmatprep.subr.mxu0 %v4691_v2 }
  0x83   : > { %5110 = vmatmul.mubr.msk.f32.gmra.mrb[6].mxu1 %vm214_vm0, %v4418_v34  ;;  %5300 = vmatmul.mubr.msk.f32.gmra.mrb[2].mxu0 %vm214_vm0, %v6214_v36 }
  0x84   : > { %5114 = vmatprep.mubr.msk.f32.mxu1 %vm214_vm0, %v5774_v8  ;;  %5302 = vmatprep.mubr.msk.f32.mxu0 %vm214_vm0, %v6219_v6  ;;  %v6244_v8 = vld [vmem:[%s5758_s5 + $0x1b2] sm:$0xff] }
  0x87   : > { %5115 = vmatmul.mubr.msk.f32.vlgmr.msra.gmra.mrb[0].mxu1 %vm214_vm0, %v5790_v12  ;;  %5303 = vmatmul.mubr.msk.f32.gmra.mrb[4].mxu0 %vm214_vm0, %v6229_v39  ;;  %v4708_v12 = vld [vmem:[%s6518_s1 + $0xb8] sm:$0xff] }
  0x88   : > { %5127 = vmatpush3.msra.mxu1 %v4453_v63  ;;  %5117 = vmatprep.mubr.msk.f32.mxu1 %vm214_vm0, %v5800_v14  ;;  %v4435_v14 = vld [vmem:[%s5758_s5 + $0x91] sm:$0xff] }
  0x89   : > { %5305 = vmatprep.mubr.msk.f32.mxu0 %vm214_vm0, %v6232_v62  ;;  %5140 = vmatprep.subr.mxu1 %v4470_v29 }
  0x8b   : > { %5118 = vmatmul.mubr.msk.f32.gmra.mrb[2].mxu1 %vm214_vm0, %v5814_v16  ;;  %5306 = vmatmul.mubr.msk.f32.gmra.mrb[6].mxu0 %vm214_vm0, %v6244_v8  ;;  %v4487_v16 = vld [vmem:[%s6518_s1 + $0x50] sm:$0xff] }
  0x8c   : > { %5120 = vmatprep.mubr.msk.f32.mxu1 %vm214_vm0, %v5820_v18  ;;  %5310 = vmatprep.mubr.msk.f32.mxu0 %vm214_vm0, %v6074_v3  ;;  %v6285_v18 = vld [vmem:[%s5758_s5 + $0x1c0] sm:$0xff] }
  0x8d   : > { %v4479_v3 = vld [vmem:[%s5758_s5 + $0xa1] sm:$0xff] }
  0x8f   : > { %5121 = vmatmul.mubr.msk.f32.gmra.mrb[4].mxu1 %vm214_vm0, %v5835_v21  ;;  %5311 = vmatmul.mubr.msk.f32.vlgmr.msra.gmra.mrb[0].mxu0 %vm214_vm0, %v6077_v4  ;;  %v4725_v21 = vld [vmem:[%s6518_s1 + $0xc0] sm:$0xff] }
  0x90   : > { %5323 = vmatpush3.msra.mxu0 %v4691_v2  ;;  %5123 = vmatprep.mubr.msk.f32.mxu1 %vm214_vm0, %v6089_v10  ;;  %v4521_v10 = vld [vmem:[%s6518_s1 + $0x60] sm:$0xff] }
  0x91   : > { %5313 = vmatprep.mubr.msk.f32.mxu0 %vm214_vm0, %v6092_v11  ;;  %5336 = vmatprep.subr.mxu0 %v4708_v12 }
  0x93   : > { %5124 = vmatmul.mubr.msk.f32.gmra.mrb[6].mxu1 %vm214_vm0, %v4435_v14  ;;  %5314 = vmatmul.mubr.msk.f32.gmra.mrb[2].mxu0 %vm214_vm0, %v6097_v20 }
  0x94   : > { %5128 = vmatprep.mubr.msk.f32.mxu1 %vm214_vm0, %v5943_v45  ;;  %5316 = vmatprep.mubr.msk.f32.mxu0 %vm214_vm0, %v6108_v23  ;;  %v4452_v45 = vld [vmem:[%s5758_s5 + $0x92] sm:$0xff] }
  0x97   : > { %5129 = vmatmul.mubr.msk.f32.vlgmr.msra.gmra.mrb[0].mxu1 %vm214_vm0, %v5958_v48  ;;  %5317 = vmatmul.mubr.msk.f32.gmra.mrb[4].mxu0 %vm214_vm0, %v6111_v25  ;;  %v4462_v48 = vld [vmem:[%s5758_s5 + $0xa0] sm:$0xff] }
  0x98   : > { %5141 = vmatpush3.msra.mxu1 %v4470_v29  ;;  %5131 = vmatprep.mubr.msk.f32.mxu1 %vm214_vm0, %v5964_v50  ;;  %v6317_v50 = vld [vmem:[%s5758_s5 + $0xb0] sm:$0xff] }
  0x99   : > { %5319 = vmatprep.mubr.msk.f32.mxu0 %vm214_vm0, %v6123_v31  ;;  %5154 = vmatprep.subr.mxu1 %v4487_v16 }
  0x9b   : > { %5132 = vmatmul.mubr.msk.f32.gmra.mrb[2].mxu1 %vm214_vm0, %v5974_v51  ;;  %5320 = vmatmul.mubr.msk.f32.gmra.mrb[6].mxu0 %vm214_vm0, %v6285_v18  ;;  %v4504_v51 = vld [vmem:[%s6518_s1 + $0x58] sm:$0xff] }
  0x9c   : > { %5134 = vmatprep.mubr.msk.f32.mxu1 %vm214_vm0, %v5977_v52  ;;  %5324 = vmatprep.mubr.msk.f32.mxu0 %vm214_vm0, %v6136_v41  ;;  %v6329_v52 = vld [vmem:[%s5758_s5 + $0x1c1] sm:$0xff] }
  0x9f   : > { %5135 = vmatmul.mubr.msk.f32.gmra.mrb[4].mxu1 %vm214_vm0, %v5989_v54  ;;  %5325 = vmatmul.mubr.msk.f32.vlgmr.msra.gmra.mrb[0].mxu0 %vm214_vm0, %v6139_v43  ;;  %v4742_v54 = vld [vmem:[%s6518_s1 + $0xc8] sm:$0xff] }
  0xa0   : > { %5337 = vmatpush3.msra.mxu0 %v4708_v12  ;;  %5137 = vmatprep.mubr.msk.f32.mxu1 %vm214_vm0, %v6151_v49 }
  0xa1   : > { %5327 = vmatprep.mubr.msk.f32.mxu0 %vm214_vm0, %v6154_v53  ;;  %5350 = vmatprep.subr.mxu0 %v4725_v21 }
  0xa3   : > { %5138 = vmatmul.mubr.msk.f32.gmra.mrb[6].mxu1 %vm214_vm0, %v4452_v45  ;;  %5328 = vmatmul.mubr.msk.f32.gmra.mrb[2].mxu0 %vm214_vm0, %v6159_v59 }
  0xa4   : > { %5142 = vmatprep.mubr.msk.f32.mxu1 %vm214_vm0, %v4462_v48  ;;  %5330 = vmatprep.mubr.msk.f32.mxu0 %vm214_vm0, %v6170_v60 }
  0xa7   : > { %5143 = vmatmul.mubr.msk.f32.vlgmr.msra.gmra.mrb[0].mxu1 %vm214_vm0, %v6317_v50  ;;  %5331 = vmatmul.mubr.msk.f32.gmra.mrb[4].mxu0 %vm214_vm0, %v6173_v61 }
  0xa8   : > { %5155 = vmatpush3.msra.mxu1 %v4487_v16  ;;  %5145 = vmatprep.mubr.msk.f32.mxu1 %vm214_vm0, %v5886_v33 }
  0xa9   : > { %5333 = vmatprep.mubr.msk.f32.mxu0 %vm214_vm0, %v6185_v27  ;;  %5168 = vmatprep.subr.mxu1 %v4504_v51 }
  0xab   : > { %5146 = vmatmul.mubr.msk.f32.gmra.mrb[2].mxu1 %vm214_vm0, %v5900_v35  ;;  %5334 = vmatmul.mubr.msk.f32.gmra.mrb[6].mxu0 %vm214_vm0, %v6329_v52 }
  0xac   : > { %5148 = vmatprep.mubr.msk.f32.mxu1 %vm214_vm0, %v5906_v37  ;;  %5338 = vmatprep.mubr.msk.f32.mxu0 %vm214_vm0, %v6198_v30 }
  0xaf   : > { %5149 = vmatmul.mubr.msk.f32.gmra.mrb[4].mxu1 %vm214_vm0, %v5921_v40  ;;  %5339 = vmatmul.mubr.msk.f32.vlgmr.msra.gmra.mrb[0].mxu0 %vm214_vm0, %v6201_v32 }
  0xb0   : > { %5351 = vmatpush3.msra.mxu0 %v4725_v21  ;;  %5151 = vmatprep.mubr.msk.f32.mxu1 %vm214_vm0, %v5927_v42 }
  0xb1   : > { %5341 = vmatprep.mubr.msk.f32.mxu0 %vm214_vm0, %v6214_v36  ;;  %5364 = vmatprep.subr.mxu0 %v4742_v54 }
  0xb3   : > { %5152 = vmatmul.mubr.msk.f32.gmra.mrb[6].mxu1 %vm214_vm0, %v5940_v44  ;;  %5342 = vmatmul.mubr.msk.f32.gmra.mrb[2].mxu0 %vm214_vm0, %v6219_v6 }
  0xb4   : > { %5156 = vmatprep.mubr.msk.f32.mxu1 %vm214_vm0, %v4479_v3  ;;  %5344 = vmatprep.mubr.msk.f32.mxu0 %vm214_vm0, %v6229_v39 }
  0xb7   : > { %5157 = vmatmul.mubr.msk.f32.vlgmr.msra.gmra.mrb[0].mxu1 %vm214_vm0, %v5762_v5  ;;  %5345 = vmatmul.mubr.msk.f32.gmra.mrb[4].mxu0 %vm214_vm0, %v6232_v62  ;;  %v4759_v5 = vld [vmem:[%s6518_s1 + $0xd0] sm:$0xff] }
  0xb8   : > { %5169 = vmatpush3.msra.mxu1 %v4504_v51  ;;  %5159 = vmatprep.mubr.msk.f32.mxu1 %vm214_vm0, %v5771_v7  ;;  %v4496_v7 = vld [vmem:[%s5758_s5 + $0xa2] sm:$0xff] }
  0xb9   : > { %5347 = vmatprep.mubr.msk.f32.mxu0 %vm214_vm0, %v6244_v8  ;;  %5182 = vmatprep.subr.mxu1 %v4521_v10 }
  0xbb   : > { %5160 = vmatmul.mubr.msk.f32.gmra.mrb[2].mxu1 %vm214_vm0, %v5777_v9  ;;  %5348 = vmatmul.mubr.msk.f32.gmra.mrb[6].mxu0 %vm214_vm0, %v4707_v38  ;;  %v4724_v9 = vld [vmem:[%s5758_s5 + $0x1d0] sm:$0xff] }
  0xbc   : > { %5162 = vmatprep.mubr.msk.f32.mxu1 %vm214_vm0, %v5793_v13  ;;  %5352 = vmatprep.mubr.msk.f32.mxu0 %vm214_vm0, %v6077_v4  ;;  %v4741_v13 = vld [vmem:[%s5758_s5 + $0x1d1] sm:$0xff] }
  0xbf   : > { %5163 = vmatmul.mubr.msk.f32.gmra.mrb[4].mxu1 %vm214_vm0, %v5992_v55  ;;  %5353 = vmatmul.mubr.msk.f32.vlgmr.msra.gmra.mrb[0].mxu0 %vm214_vm0, %v6092_v11 }
  0xc0   : > { %5365 = vmatpush3.msra.mxu0 %v4742_v54  ;;  %5165 = vmatprep.mubr.msk.f32.mxu1 %vm214_vm0, %v5997_v56 }
  0xc1   : > { %5355 = vmatprep.mubr.msk.f32.mxu0 %vm214_vm0, %v6097_v20  ;;  %5378 = vmatprep.subr.mxu0 %v4759_v5 }
  0xc3   : > { %5166 = vmatmul.mubr.msk.f32.gmra.mrb[6].mxu1 %vm214_vm0, %v6008_v57  ;;  %5356 = vmatmul.mubr.msk.f32.gmra.mrb[2].mxu0 %vm214_vm0, %v6108_v23 }
  0xc4   : > { %5170 = vmatprep.mubr.msk.f32.mxu1 %vm214_vm0, %v4496_v7  ;;  %5358 = vmatprep.mubr.msk.f32.mxu0 %vm214_vm0, %v6111_v25 }
  0xc7   : > { %5171 = vmatmul.mubr.msk.f32.vlgmr.msra.gmra.mrb[0].mxu1 %vm214_vm0, %v5803_v15  ;;  %5359 = vmatmul.mubr.msk.f32.gmra.mrb[4].mxu0 %vm214_vm0, %v6123_v31 }
  0xc8   : > { %5183 = vmatpush3.msra.mxu1 %v4521_v10  ;;  %5173 = vmatprep.mubr.msk.f32.mxu1 %vm214_vm0, %v5817_v17 }
  0xc9   : > { %5361 = vmatprep.mubr.msk.f32.mxu0 %vm214_vm0, %v6285_v18  ;;  %5392 = vmatprep.subr.mxu1 %v5741_v1 }
  0xcb   : > { %5174 = vmatmul.mubr.msk.f32.gmra.mrb[2].mxu1 %vm214_vm0, %v5823_v19  ;;  %5362 = vmatmul.mubr.msk.f32.gmra.mrb[6].mxu0 %vm214_vm0, %v4724_v9 }
  0xcc   : > { %5176 = vmatprep.mubr.msk.f32.mxu1 %vm214_vm0, %v5838_v22  ;;  %5366 = vmatprep.mubr.msk.f32.mxu0 %vm214_vm0, %v6139_v43 }
  0xcf   : > { %5177 = vmatmul.mubr.msk.f32.gmra.mrb[4].mxu1 %vm214_vm0, %v5844_v24  ;;  %5367 = vmatmul.mubr.msk.f32.vlgmr.msra.gmra.mrb[0].mxu0 %vm214_vm0, %v6154_v53 }
  0xd0   : > { %5379 = vmatpush3.msra.mxu0 %v4759_v5  ;;  %5179 = vmatprep.mubr.msk.f32.mxu1 %vm214_vm0, %v5857_v26  ;;  %v4768_v26 = vld [vmem:[%s6519_s2] ss:$0 sm:$0xff] }
  0xd1   : > { %5369 = vmatprep.mubr.msk.f32.mxu0 %vm214_vm0, %v6159_v59 }
  0xd3   : > { %5180 = vmatmul.mubr.msk.f32.gmra.mrb[6].mxu1 %vm214_vm0, %v5863_v28  ;;  %5370 = vmatmul.mubr.msk.f32.gmra.mrb[2].mxu0 %vm214_vm0, %v6170_v60 }
  0xd4   : > { %5184 = vmatprep.mubr.msk.f32.mxu1 %vm214_vm0, %v6317_v50  ;;  %5372 = vmatprep.mubr.msk.f32.mxu0 %vm214_vm0, %v6173_v61 }
  0xd7   : > { %5185 = vmatmul.mubr.msk.f32.vlgmr.msra.gmra.mrb[0].mxu1 %vm214_vm0, %v5886_v33  ;;  %5373 = vmatmul.mubr.msk.f32.gmra.mrb[4].mxu0 %vm214_vm0, %v6185_v27 }
  0xd8   : > { %5393 = vmatpush3.msra.mxu1 %v5741_v1  ;;  %5187 = vmatprep.mubr.msk.f32.mxu1 %vm214_vm0, %v5900_v35  ;;  %v4758_v1 = vld [vmem:[%s5758_s5 + $0x1d2] sm:$0xff]  ;;  %s4333_s5 = sshll.u32 %s190_s23, 3 }
  0xd9   : > { %5375 = vmatprep.mubr.msk.f32.mxu0 %vm214_vm0, %v6329_v52  ;;  %s6484_s28 = scalar_lea.vmem %s6520_s3, %s4333_s5 }
  0xdb   : > { %5188 = vmatmul.mubr.msk.f32.gmra.mrb[2].mxu1 %vm214_vm0, %v5906_v37  ;;  %5376 = vmatmul.mubr.msk.f32.gmra.mrb[6].mxu0 %vm214_vm0, %v4741_v13 }
  0xdc   : > { %5190 = vmatprep.mubr.msk.f32.mxu1 %vm214_vm0, %v5921_v40  ;;  %5380 = vmatprep.mubr.msk.f32.mxu0 %vm214_vm0, %v6201_v32 }
  0xdf   : > { %5191 = vmatmul.mubr.msk.f32.gmra.mrb[4].mxu1 %vm214_vm0, %v5927_v42  ;;  %5381 = vmatmul.mubr.msk.f32.vlgmr.msra.gmra.mrb[0].mxu0 %vm214_vm0, %v6214_v36 }
  0xe0   : > { %5193 = vmatprep.mubr.msk.f32.mxu1 %vm214_vm0, %v5940_v44  ;;  %5383 = vmatprep.mubr.msk.f32.mxu0 %vm214_vm0, %v6219_v6 }
  0xe3   : > { %5194 = vmatmul.mubr.msk.f32.gmra.mrb[6].mxu1 %vm214_vm0, %v5946_v46  ;;  %5384 = vmatmul.mubr.msk.f32.gmra.mrb[2].mxu0 %vm214_vm0, %v6229_v39 }
  0xe4   : > { %5204 = vmatprep.mubr.msk.f32.mxu1 %vm214_vm0, %v5992_v55  ;;  %5386 = vmatprep.mubr.msk.f32.mxu0 %vm214_vm0, %v6232_v62 }
  0xe7   : > { %5205 = vmatmul.mubr.msk.f32.vlgmr.msra.gmra.mrb[4].mxu1 %vm214_vm0, %v5997_v56  ;;  %5387 = vmatmul.mubr.msk.f32.gmra.mrb[4].mxu0 %vm214_vm0, %v6244_v8 }
  0xe8   : > { %5207 = vmatprep.mubr.msk.f32.mxu1 %vm214_vm0, %v6008_v57  ;;  %5389 = vmatprep.mubr.msk.f32.mxu0 %vm214_vm0, %v4707_v38 }
  0xeb   : > { %5208 = vmatmul.mubr.msk.f32.gmra.mrb[6].mxu1 %vm214_vm0, %v6011_v58  ;;  %5390 = vmatmul.mubr.msk.f32.gmra.mrb[6].mxu0 %vm214_vm0, %v4758_v1 }
 0x1aa   : > { %v5186_v15 = vpop.f32.mrb[0].mxu1 }
 0x1ab   : > { %v2052_v17 = vpop.f32.mrb[1].mxu1 }
 0x1ae   : > { %v5189_v19 = vpop.f32.mrb[2].mxu1 }
 0x1af   : > { %v2062_v22 = vpop.f32.mrb[3].mxu1 }
 0x1b2   : > { %v5382_v24 = vpop.f32.mrb[0].mxu0 }
 0x1b3   : > { %v5394_v28 = vadd.f32 %v5382_v24, %v5186_v15  ;;  %v4119_v33 = vpop.f32.mrb[1].mxu0 }
 0x1b4   : > { %v5395_v35 = vadd.f32 %v4119_v33, %v2052_v17 }
 0x1b5   : > { %v4174_v37 = vadd.f32 %v5394_v28, %v4768_v26 }
 0x1b6   : > { %v4173_v40 = vadd.f32 %v5395_v35, %v4768_v26  ;;  %v5385_v42 = vpop.f32.mrb[2].mxu0 }
 0x1b7   : > { %vm4182_vm1 = vcmp.ge.f32.partialorder %v4174_v37, 0.0  ;;  %v4190_v44 = vmul.f32 0.01, %v4174_v37  ;;  %v5396_v46 = vadd.f32 %v5385_v42, %v5189_v19  ;;  %v4129_v55 = vpop.f32.mrb[3].mxu0 }
 0x1b8   : > { %vm4181_vm2 = vcmp.ge.f32.partialorder %v4173_v40, 0.0  ;;  %v4189_v56 = vmul.f32 0.01, %v4173_v40  ;;  %v5397_v57 = vadd.f32 %v4129_v55, %v2062_v22 }
 0x1b9   : > { %v4198_v58 = vsel %vm4182_vm1, %v4174_v37, %v4190_v44  ;;  %v4176_v4 = vadd.f32 %v5396_v46, %v4768_v26 }
 0x1ba   : > { %4206 = vst.msk [vmem:[%s6484_s28 + $0x8] sm:$0xff] %vm214_vm0, %v4198_v58  ;;  %v4197_v11 = vsel %vm4181_vm2, %v4173_v40, %v4189_v56  ;;  %v4175_v20 = vadd.f32 %v5397_v57, %v4768_v26  ;;  %v5206_v23 = vpop.f32.mrb[4].mxu1  ;;  %v5388_v25 = vpop.f32.mrb[4].mxu0 }
 0x1bb   : > { %4205 = vst.msk [vmem:[%s6484_s28] sm:$0xff] %vm214_vm0, %v4197_v11  ;;  %vm4184_vm3 = vcmp.ge.f32.partialorder %v4176_v4, 0.0  ;;  %v4192_v31 = vmul.f32 0.01, %v4176_v4  ;;  %v5398_v41 = vadd.f32 %v5388_v25, %v5206_v23  ;;  %v2219_v43 = vpop.f32.mrb[5].mxu1  ;;  %v4139_v47 = vpop.f32.mrb[5].mxu0 }
 0x1bc   : > { %vm4183_vm4 = vcmp.ge.f32.partialorder %v4175_v20, 0.0  ;;  %v4191_v49 = vmul.f32 0.01, %v4175_v20  ;;  %v5399_v53 = vadd.f32 %v4139_v47, %v2219_v43 }
 0x1bd   : > { %v4200_v59 = vsel %vm4184_vm3, %v4176_v4, %v4192_v31  ;;  %v4178_v60 = vadd.f32 %v5398_v41, %v4768_v26 }
 0x1be   : > { %4208 = vst.msk [vmem:[%s6484_s28 + $0x18] sm:$0xff] %vm214_vm0, %v4200_v59  ;;  %v4199_v61 = vsel %vm4183_vm4, %v4175_v20, %v4191_v49  ;;  %v4177_v63 = vadd.f32 %v5399_v53, %v4768_v26  ;;  %v5209_v27 = vpop.f32.mrb[6].mxu1  ;;  %v5391_v0 = vpop.f32.mrb[6].mxu0 }
 0x1bf   : > { %4207 = vst.msk [vmem:[%s6484_s28 + $0x10] sm:$0xff] %vm214_vm0, %v4199_v61  ;;  %vm4186_vm5 = vcmp.ge.f32.partialorder %v4178_v60, 0.0  ;;  %v4194_v30 = vmul.f32 0.01, %v4178_v60  ;;  %v5400_v32 = vadd.f32 %v5391_v0, %v5209_v27  ;;  %v2229_v2 = vpop.f32.mrb[7].mxu1  ;;  %v4149_v34 = vpop.f32.mrb[7].mxu0 }
 0x1c0   : > { %vm4185_vm6 = vcmp.ge.f32.partialorder %v4177_v63, 0.0  ;;  %v4193_v36 = vmul.f32 0.01, %v4177_v63  ;;  %v5401_v6 = vadd.f32 %v4149_v34, %v2229_v2 }
 0x1c1   : > { %v4202_v39 = vsel %vm4186_vm5, %v4178_v60, %v4194_v30  ;;  %v4180_v62 = vadd.f32 %v5400_v32, %v4768_v26 }
 0x1c2   : > { %4210 = vst.msk [vmem:[%s6484_s28 + $0x28] sm:$0xff] %vm214_vm0, %v4202_v39  ;;  %v4201_v29 = vsel %vm4185_vm6, %v4177_v63, %v4193_v36  ;;  %v4179_v8 = vadd.f32 %v5401_v6, %v4768_v26 }
 0x1c3   : > { %4209 = vst.msk [vmem:[%s6484_s28 + $0x20] sm:$0xff] %vm214_vm0, %v4201_v29  ;;  %vm4188_vm7 = vcmp.ge.f32.partialorder %v4180_v62, 0.0  ;;  %v4196_v12 = vmul.f32 0.01, %v4180_v62 }
 0x1c4   : > { %vm4187_vm8 = vcmp.ge.f32.partialorder %v4179_v8, 0.0  ;;  %v4195_v14 = vmul.f32 0.01, %v4179_v8 }
 0x1c5   : > { %v4204_v16 = vsel %vm4188_vm7, %v4180_v62, %v4196_v12 }
 0x1c6   : > { %4212 = vst.msk [vmem:[%s6484_s28 + $0x38] sm:$0xff] %vm214_vm0, %v4204_v16  ;;  %v4203_v18 = vsel %vm4187_vm8, %v4179_v8, %v4195_v14 }
 0x1c7   : > { %4211 = vst.msk [vmem:[%s6484_s28 + $0x30] sm:$0xff] %vm214_vm0, %v4203_v18 }
 0x1c8 PF: > { %s13_s16 = sadd.s32 1, %s5681_s16   ;;  %s6521_s12 = smov %s5673_s14 }
 0x1c9   : > { %p10_p7 = scmp.ge.s32.totalorder %s13_s16, 18   ;;  %s6522_s13 = smov %s5677_s15 }
 0x1ca   : > { %s6523_s14 = smov %s6526_s17  ;;  %s6524_s15 = smov %s6530_s18 }
 0x1cb   :  { %12 = sbr.rel (!%p10_p7) target bundleno = 3 (0x3), region = 97 }

// kernel: plain_conv3d_channel_shrink.5
= control target key start
LH: loop header
LB: loop body
LE: loop exit
PB: predicated region body
PF: predicated region fallthrough
CT: control target
= control target key end

     0   :  { %8 = vsyncpa [#allocation3], 0  ;;  %s6667_s0 = inlined_call_operand.vmem [shape: f32[2,10,10,10,8], index: 0, kind: input, shape index: {}]   ;;  %s6668_s1 = inlined_call_operand.vmem [shape: f32[27,8,8], index: 1, kind: input, shape index: {}]   ;;  %s6669_s2 = inlined_call_operand.vmem [shape: f32[1,8], index: 2, kind: input, shape index: {}]   ;;  %s6670_s3 = inlined_call_operand.hbm [shape: f32[2,8,8,8,8], index: 3, kind: output, shape index: {}]  }
   0x1   :  { %10 = vsyncpa [#allocation3 + $0x1], 0  ;;  %s5769_s12 = smov 0   ;;  %s5771_s13 = smov 0  }
   0x2   :  { %s5773_s14 = smov 0   ;;  %s5775_s15 = smov 0  }
   0x3   :  { %s5777_s16 = smov 0   ;;  %s5779_s17 = smov 0  }
   0x4   :  { %s5781_s18 = smov 0   ;;  %s5783_s19 = smov 0  }
   0x5 LB: > { %s4297_s20 = sadd.s32 4294967295, %s5744_s19   ;;  %s4298_s21 = sadd.s32 4294967294, %s5744_s19   ;;  %s5744_s19 = sphi %s5783_s19, %s16_s19   ;;  %s5740_s18 = sphi %s5781_s18, %s6679_s18   ;;  %s5736_s17 = sphi %s5779_s17, %s6678_s17   ;;  %s5732_s16 = sphi %s5777_s16, %s6677_s16   ;;  %s5728_s15 = sphi %s5775_s15, %s6676_s15   ;;  %s5724_s14 = sphi %s5773_s14, %s6675_s14   ;;  %s5720_s13 = sphi %s5771_s13, %s6674_s13   ;;  %s5716_s12 = sphi %s5769_s12, %s6673_s12  }
   0x6   : > { %s25_s22 = sadd.s32 1, %s5736_s17  ;;  %s28_s23 = sadd.s32 1, %s5740_s18 }
   0x7   : > { %p26_p0 = scmp.ge.s32.totalorder %s25_s22, 8  ;;  %p115_p1 = scmp.ne.s32.totalorder %s5724_s14, %s5720_s13 }
   0x8   : > { %p116_p2 = scmp.eq.s32.totalorder %s4297_s20, 15  ;;  %p121_p5 = scmp.ne.s32.totalorder %s5720_s13, %s5716_s12 }
   0x9   : > { %s6681_s22 = smov (%p26_p0, %s25_s22), 0  ;;  %s6683_s23 = smov (!%p26_p0, %s28_s23), %s5740_s18 }
   0xa   : > { %s101_s24 = ssub.s32 %s5736_s17, %s6681_s22  ;;  %p5820_p3 = por %p116_p2, %p115_p1 }
   0xb   : > { %p30_p4 = scmp.ge.s32.totalorder %s6683_s23, 2  ;;  %p122_p6 = scmp.eq.s32.totalorder %s4298_s21, 15 }
   0xc   : > { %p4301_p7 = scmp.ge.s32.totalorder %s5744_s19, 1  ;;  %p154_p9 = scmp.lt.s32.totalorder %s5744_s19, 17 }
   0xd   : > { %s6685_s23 = smov (%p30_p4, %s6683_s23), 0  ;;  %p5829_p8 = por %p122_p6, %p121_p5 }
   0xe   : > { %s100_s27 = ssub.s32 %s5740_s18, %s6685_s23  ;;  %s105_s28 = sadd.s32 1, %s5724_s14 }
   0xf   : > { %s102_s29 = sor.u32 %s101_s24, %s100_s27  ;;  %p155_p10 = pnand %p4301_p7, %p154_p9 }
  0x10   : > { %p103_p11 = scmp.eq.s32.totalorder %s102_s29, 0  ;;  %v4304_v0 = vld [vmem:[%s6668_s1 + $0x8] sm:$0xff] (!%p155_p10)  ;;  %p178_p12 = scmp.lt.s32.totalorder (!%p155_p10), %s5732_s16, 1  ;;  %v193_v2 = vld [vmem:[%s6668_s1] sm:$0xff] (!%p155_p10)  ;;  %v4525_v3 = vld [vmem:[%s6668_s1 + $0x70] sm:$0xff] (!%p155_p10)  ;;  %vm204_vm0 = vcmask (!%p155_p10), 64512  }
  0x11   : > { %158 = sbr.rel (%p155_p10) target bundleno = 476 (0x1dc), region = 32  ;;  %v5846_v1 = vld [vmem:[%s6668_s1 + $0x68] sm:$0xff] (!%p155_p10)  ;;  %4988 = vmatprep.subr.mxu1 (!%p155_p10), %v4304_v0  ;;  %v4542_v10 = vld [vmem:[%s6668_s1 + $0x78] sm:$0xff] (!%p155_p10)  ;;  %v4321_v11 = vld [vmem:[%s6668_s1 + $0x10] sm:$0xff] (!%p155_p10)  ;;  %s5746_s11 = smov (!%p155_p10), [#allocation2]  }
  0x12   : > { %s5838_s30 = scalar_select %p103_p11, %s5724_s14, %s105_s28  }
  0x13   : > { %5170 = vmatprep.subr.mxu0 (!%p155_p10), %v5846_v1  ;;  %4989 = vmatpush3.msra.mxu1 (!%p155_p10), %v4304_v0  ;;  %s183_s21 = smul.u32 (!%p155_p10), 160, %s5728_s15  ;;  %v4559_v20 = vld [vmem:[%s6668_s1 + $0x80] sm:$0xff] (!%p155_p10)  ;;  %v4338_v29 = vld [vmem:[%s6668_s1 + $0x18] sm:$0xff] (!%p155_p10)  ;;  %v4576_v38 = vld [vmem:[%s6668_s1 + $0x88] sm:$0xff] (!%p155_p10)  ;;  %s4740_s28 = sshll.u32 (!%p155_p10), %s5728_s15, 3 }
  0x14   : > { %5171 = vmatpush3.msra.mxu0 (!%p155_p10), %v5846_v1  ;;  %5002 = vmatprep.subr.mxu1 (!%p155_p10), %v193_v2  ;;  %v4355_v47 = vld [vmem:[%s6668_s1 + $0x20] sm:$0xff] (!%p155_p10)  ;;  %v4593_v53 = vld [vmem:[%s6668_s1 + $0x90] sm:$0xff] (!%p155_p10)  ;;  %v4372_v59 = vld [vmem:[%s6668_s1 + $0x28] sm:$0xff] (!%p155_p10) }
  0x15   : > { %5184 = vmatprep.subr.mxu0 (!%p155_p10), %v4525_v3  ;;  %v4610_v61 = vld [vmem:[%s6668_s1 + $0x98] sm:$0xff] (!%p155_p10)  ;;  %v4389_v63 = vld [vmem:[%s6668_s1 + $0x30] sm:$0xff] (!%p155_p10) }
  0x18   : > { %s179_s20 = scalar_select %p178_p12, %s5732_s16, 1 }
  0x1a   : > { %s5576_s24 = smul.u32 1600, %s179_s20  ;;  %s175_s20 = sand.u32 1, %s5720_s13  }
  0x1b   : > { %s6615_s9 = scalar_lea.sflag [#allocation3], %s175_s20 }
  0x1c   : > { %s182_s29 = scalar_lea.vmem %s6667_s0, %s5576_s24 }
  0x1d   : > { %s5862_s4 = scalar_lea.vmem %s182_s29, %s183_s21  ;;  %s4302_s21 = sshll.u32 %s175_s20, 6 }
  0x1e   : > { %v194_v4 = vld [vmem:[%s5862_s4 + $0x1] sm:$0xff]  ;;  %v5866_v5 = vld [vmem:[%s5862_s4 + $0xb1] sm:$0xff]  ;;  %s4741_s29 = sshll.u32 %s5732_s16, 6 }
  0x1f   : > { %v5869_v6 = vld [vmem:[%s5862_s4 + $0x11] sm:$0xff]  ;;  %4990 = vmatprep.mubr.msk.f32.mxu1 %vm204_vm0, %v194_v4  ;;  %5172 = vmatprep.mubr.msk.f32.mxu0 %vm204_vm0, %v5866_v5  ;;  %v5875_v7 = vld [vmem:[%s5862_s4 + $0xc1] sm:$0xff]  ;;  %s4192_s5 = sadd.s32 %s4741_s29, %s4740_s28 }
  0x20   : > { %v5878_v8 = vld [vmem:[%s5862_s4 + $0x21] sm:$0xff]  ;;  %v5881_v9 = vld [vmem:[%s5862_s4 + $0xd1] sm:$0xff]  ;;  %4991 = vmatmul.mubr.msk.f32.vlgmr.msra.gmra.mrb[0].mxu1 %vm204_vm0, %v5869_v6  ;;  %5173 = vmatmul.mubr.msk.f32.vlgmr.msra.gmra.mrb[0].mxu0 %vm204_vm0, %v5875_v7  ;;  %s4742_s15 = sshll.u32 %s4192_s5, 7 }
  0x21   : > { %5003 = vmatpush3.msra.mxu1 %v193_v2  ;;  %5185 = vmatpush3.msra.mxu0 %v4525_v3  ;;  %v5894_v12 = vld [vmem:[%s5862_s4 + $0x31] sm:$0xff]  ;;  %v5897_v13 = vld [vmem:[%s5862_s4 + $0xe1] sm:$0xff]  ;;  %s6605_s8 = scalar_lea.hbm %s6670_s3, %s4742_s15 }
  0x22   : > { %4993 = vmatprep.mubr.msk.f32.mxu1 %vm204_vm0, %v5878_v8  ;;  %5175 = vmatprep.mubr.msk.f32.mxu0 %vm204_vm0, %v5881_v9  ;;  %v5904_v14 = vld [vmem:[%s5862_s4 + $0x41] sm:$0xff]  ;;  %v5907_v15 = vld [vmem:[%s5862_s4 + $0xb2] sm:$0xff] }
  0x23   : > { %5198 = vmatprep.subr.mxu0 %v4542_v10  ;;  %5016 = vmatprep.subr.mxu1 %v4321_v11  ;;  %v5918_v16 = vld [vmem:[%s5862_s4 + $0x51] sm:$0xff]  ;;  %v5921_v17 = vld [vmem:[%s5862_s4 + $0xc2] sm:$0xff] }
  0x24   : > { %4994 = vmatmul.mubr.msk.f32.gmra.mrb[2].mxu1 %vm204_vm0, %v5894_v12  ;;  %5176 = vmatmul.mubr.msk.f32.gmra.mrb[2].mxu0 %vm204_vm0, %v5897_v13  ;;  %v5924_v18 = vld [vmem:[%s5862_s4 + $0x61] sm:$0xff]  ;;  %v5927_v19 = vld [vmem:[%s5862_s4 + $0xd2] sm:$0xff] }
  0x25   : > { %4996 = vmatprep.mubr.msk.f32.mxu1 %vm204_vm0, %v5904_v14  ;;  %5186 = vmatprep.mubr.msk.f32.mxu0 %vm204_vm0, %v5907_v15  ;;  %v5939_v21 = vld [vmem:[%s5862_s4 + $0x71] sm:$0xff]  ;;  %v5942_v22 = vld [vmem:[%s5862_s4 + $0xe2] sm:$0xff] }
  0x26   : > { %v185_v23 = vld [vmem:[%s5862_s4] sm:$0xff]  ;;  %v5948_v24 = vld [vmem:[%s5862_s4 + $0xf2] sm:$0xff] }
  0x27   : > { %v5958_v25 = vld [vmem:[%s5862_s4 + $0x10] sm:$0xff]  ;;  %v5961_v26 = vld [vmem:[%s5862_s4 + $0x102] sm:$0xff] }
  0x28   : > { %4997 = vmatmul.mubr.msk.f32.gmra.mrb[4].mxu1 %vm204_vm0, %v5918_v16  ;;  %5187 = vmatmul.mubr.msk.f32.vlgmr.msra.gmra.mrb[0].mxu0 %vm204_vm0, %v5921_v17  ;;  %v5964_v27 = vld [vmem:[%s5862_s4 + $0x20] sm:$0xff]  ;;  %v5967_v28 = vld [vmem:[%s5862_s4 + $0x112] sm:$0xff] }
  0x29   : > { %5199 = vmatpush3.msra.mxu0 %v4542_v10  ;;  %4999 = vmatprep.mubr.msk.f32.mxu1 %vm204_vm0, %v5924_v18  ;;  %v5979_v30 = vld [vmem:[%s5862_s4 + $0x30] sm:$0xff]  ;;  %v5982_v31 = vld [vmem:[%s5862_s4 + $0x122] sm:$0xff] }
  0x2a   : > { %5189 = vmatprep.mubr.msk.f32.mxu0 %vm204_vm0, %v5927_v19  ;;  %5212 = vmatprep.subr.mxu0 %v4559_v20  ;;  %v5987_v32 = vld [vmem:[%s5862_s4 + $0x40] sm:$0xff]  ;;  %v6001_v34 = vld [vmem:[%s5862_s4 + $0x50] sm:$0xff] }
  0x2b   : > { %v5990_v33 = vld [vmem:[%s5862_s4 + $0xc0] sm:$0xff]  ;;  %v6004_v35 = vld [vmem:[%s5862_s4 + $0xd0] sm:$0xff] }
  0x2c   : > { %5000 = vmatmul.mubr.msk.f32.gmra.mrb[6].mxu1 %vm204_vm0, %v5939_v21  ;;  %5190 = vmatmul.mubr.msk.f32.gmra.mrb[2].mxu0 %vm204_vm0, %v5942_v22  ;;  %v6007_v36 = vld [vmem:[%s5862_s4 + $0x60] sm:$0xff]  ;;  %v6022_v39 = vld [vmem:[%s5862_s4 + $0x70] sm:$0xff] }
  0x2d   : > { %5004 = vmatprep.mubr.msk.f32.mxu1 %vm204_vm0, %v185_v23  ;;  %5192 = vmatprep.mubr.msk.f32.mxu0 %vm204_vm0, %v5948_v24  ;;  %v6010_v37 = vld [vmem:[%s5862_s4 + $0xe0] sm:$0xff]  ;;  %v6025_v40 = vld [vmem:[%s5862_s4 + $0xf0] sm:$0xff] }
  0x2e   : > { %v463_v41 = vld [vmem:[%s5862_s4 + $0x2] sm:$0xff]  ;;  %v6041_v43 = vld [vmem:[%s5862_s4 + $0x12] sm:$0xff] }
  0x2f   : > { %v6031_v42 = vld [vmem:[%s5862_s4 + $0x100] sm:$0xff]  ;;  %v6044_v44 = vld [vmem:[%s5862_s4 + $0x110] sm:$0xff] }
  0x30   : > { %5005 = vmatmul.mubr.msk.f32.vlgmr.msra.gmra.mrb[0].mxu1 %vm204_vm0, %v5958_v25  ;;  %5193 = vmatmul.mubr.msk.f32.gmra.mrb[4].mxu0 %vm204_vm0, %v5961_v26  ;;  %v6047_v45 = vld [vmem:[%s5862_s4 + $0x22] sm:$0xff]  ;;  %v6062_v48 = vld [vmem:[%s5862_s4 + $0x32] sm:$0xff] }
  0x31   : > { %5017 = vmatpush3.msra.mxu1 %v4321_v11  ;;  %5007 = vmatprep.mubr.msk.f32.mxu1 %vm204_vm0, %v5964_v27  ;;  %v6050_v46 = vld [vmem:[%s5862_s4 + $0x120] sm:$0xff]  ;;  %v4541_v49 = vld [vmem:[%s5862_s4 + $0x130] sm:$0xff] }
  0x32   : > { %5195 = vmatprep.mubr.msk.f32.mxu0 %vm204_vm0, %v5967_v28  ;;  %5030 = vmatprep.subr.mxu1 %v4338_v29  ;;  %v6068_v50 = vld [vmem:[%s5862_s4 + $0x42] sm:$0xff]  ;;  %v6078_v51 = vld [vmem:[%s5862_s4 + $0x52] sm:$0xff] }
  0x33   : > { %v6081_v52 = vld [vmem:[%s5862_s4 + $0x62] sm:$0xff]  ;;  %v6093_v54 = vld [vmem:[%s5862_s4 + $0x72] sm:$0xff] }
  0x34   : > { %5008 = vmatmul.mubr.msk.f32.gmra.mrb[2].mxu1 %vm204_vm0, %v5979_v30  ;;  %5196 = vmatmul.mubr.msk.f32.gmra.mrb[6].mxu0 %vm204_vm0, %v5982_v31  ;;  %v6096_v55 = vld [vmem:[%s5862_s4 + $0xf1] sm:$0xff]  ;;  %v6101_v56 = vld [vmem:[%s5862_s4 + $0x101] sm:$0xff] }
  0x35   : > { %5010 = vmatprep.mubr.msk.f32.mxu1 %vm204_vm0, %v5987_v32  ;;  %5200 = vmatprep.mubr.msk.f32.mxu0 %vm204_vm0, %v5990_v33  ;;  %v6112_v57 = vld [vmem:[%s5862_s4 + $0x111] sm:$0xff]  ;;  %v6115_v58 = vld [vmem:[%s5862_s4 + $0x121] sm:$0xff] }
  0x36   : > { %v4558_v60 = vld [vmem:[%s5862_s4 + $0x131] sm:$0xff]  ;;  %v6146_v62 = vld [vmem:[%s5862_s4 + $0x80] sm:$0xff] }
  0x37   : > { %v4575_v0 = vld [vmem:[%s5862_s4 + $0x132] sm:$0xff]  ;;  %v4585_v2 = vld [vmem:[%s5862_s4 + $0x140] sm:$0xff] }
  0x38   : > { %5011 = vmatmul.mubr.msk.f32.gmra.mrb[4].mxu1 %vm204_vm0, %v6001_v34  ;;  %5201 = vmatmul.mubr.msk.f32.vlgmr.msra.gmra.mrb[0].mxu0 %vm204_vm0, %v6004_v35  ;;  %v6178_v3 = vld [vmem:[%s5862_s4 + $0x150] sm:$0xff]  ;;  %v6181_v4 = vld [vmem:[%s5862_s4 + $0x160] sm:$0xff] }
  0x39   : > { %5213 = vmatpush3.msra.mxu0 %v4559_v20  ;;  %5013 = vmatprep.mubr.msk.f32.mxu1 %vm204_vm0, %v6007_v36  ;;  %v6193_v10 = vld [vmem:[%s5862_s4 + $0x81] sm:$0xff]  ;;  %v6196_v11 = vld [vmem:[%s5862_s4 + $0x170] sm:$0xff] }
  0x3a   : > { %5203 = vmatprep.mubr.msk.f32.mxu0 %vm204_vm0, %v6010_v37  ;;  %5226 = vmatprep.subr.mxu0 %v4576_v38  ;;  %v6201_v20 = vld [vmem:[%s5862_s4 + $0x180] sm:$0xff]  ;;  %v6212_v23 = vld [vmem:[%s5862_s4 + $0x190] sm:$0xff] }
  0x3c   : > { %5014 = vmatmul.mubr.msk.f32.gmra.mrb[6].mxu1 %vm204_vm0, %v6022_v39  ;;  %5204 = vmatmul.mubr.msk.f32.gmra.mrb[2].mxu0 %vm204_vm0, %v6025_v40 }
  0x3d   : > { %5018 = vmatprep.mubr.msk.f32.mxu1 %vm204_vm0, %v463_v41  ;;  %5206 = vmatprep.mubr.msk.f32.mxu0 %vm204_vm0, %v6031_v42  ;;  %v6240_v41 = vld [vmem:[%s5862_s4 + $0x151] sm:$0xff] }
  0x40   : > { %5019 = vmatmul.mubr.msk.f32.vlgmr.msra.gmra.mrb[0].mxu1 %vm204_vm0, %v6041_v43  ;;  %5207 = vmatmul.mubr.msk.f32.gmra.mrb[4].mxu0 %vm204_vm0, %v6044_v44 }
  0x41   : > { %5031 = vmatpush3.msra.mxu1 %v4338_v29  ;;  %5021 = vmatprep.mubr.msk.f32.mxu1 %vm204_vm0, %v6047_v45  ;;  %v4406_v29 = vld [vmem:[%s6668_s1 + $0x38] sm:$0xff] }
  0x42   : > { %5209 = vmatprep.mubr.msk.f32.mxu0 %vm204_vm0, %v6050_v46  ;;  %5044 = vmatprep.subr.mxu1 %v4355_v47 }
  0x44   : > { %5022 = vmatmul.mubr.msk.f32.gmra.mrb[2].mxu1 %vm204_vm0, %v6062_v48  ;;  %5210 = vmatmul.mubr.msk.f32.gmra.mrb[6].mxu0 %vm204_vm0, %v4541_v49  ;;  %v6255_v49 = vld [vmem:[%s5862_s4 + $0x82] sm:$0xff] }
  0x45   : > { %5024 = vmatprep.mubr.msk.f32.mxu1 %vm204_vm0, %v6068_v50  ;;  %5214 = vmatprep.mubr.msk.f32.mxu0 %vm204_vm0, %v5875_v7 }
  0x48   : > { %5025 = vmatmul.mubr.msk.f32.gmra.mrb[4].mxu1 %vm204_vm0, %v6078_v51  ;;  %5215 = vmatmul.mubr.msk.f32.vlgmr.msra.gmra.mrb[0].mxu0 %vm204_vm0, %v5881_v9 }
  0x49   : > { %5227 = vmatpush3.msra.mxu0 %v4576_v38  ;;  %5027 = vmatprep.mubr.msk.f32.mxu1 %vm204_vm0, %v6081_v52  ;;  %v4602_v38 = vld [vmem:[%s5862_s4 + $0x141] sm:$0xff] }
  0x4a   : > { %5217 = vmatprep.mubr.msk.f32.mxu0 %vm204_vm0, %v5897_v13  ;;  %5240 = vmatprep.subr.mxu0 %v4593_v53 }
  0x4c   : > { %5028 = vmatmul.mubr.msk.f32.gmra.mrb[6].mxu1 %vm204_vm0, %v6093_v54  ;;  %5218 = vmatmul.mubr.msk.f32.gmra.mrb[2].mxu0 %vm204_vm0, %v6096_v55 }
  0x4d   : > { %5032 = vmatprep.mubr.msk.f32.mxu1 %vm204_vm0, %v5958_v25  ;;  %5220 = vmatprep.mubr.msk.f32.mxu0 %vm204_vm0, %v6101_v56  ;;  %v6215_v25 = vld [vmem:[%s5862_s4 + $0x1a0] sm:$0xff] }
  0x50   : > { %5033 = vmatmul.mubr.msk.f32.vlgmr.msra.gmra.mrb[0].mxu1 %vm204_vm0, %v5964_v27  ;;  %5221 = vmatmul.mubr.msk.f32.gmra.mrb[4].mxu0 %vm204_vm0, %v6112_v57 }
  0x51   : > { %5045 = vmatpush3.msra.mxu1 %v4355_v47  ;;  %5035 = vmatprep.mubr.msk.f32.mxu1 %vm204_vm0, %v5979_v30  ;;  %v4644_v47 = vld [vmem:[%s6668_s1 + $0xa8] sm:$0xff] }
  0x52   : > { %5223 = vmatprep.mubr.msk.f32.mxu0 %vm204_vm0, %v6115_v58  ;;  %5058 = vmatprep.subr.mxu1 %v4372_v59 }
  0x54   : > { %5036 = vmatmul.mubr.msk.f32.gmra.mrb[2].mxu1 %vm204_vm0, %v5987_v32  ;;  %5224 = vmatmul.mubr.msk.f32.gmra.mrb[6].mxu0 %vm204_vm0, %v4558_v60  ;;  %v6274_v60 = vld [vmem:[%s5862_s4 + $0x191] sm:$0xff] }
  0x55   : > { %5038 = vmatprep.mubr.msk.f32.mxu1 %vm204_vm0, %v6001_v34  ;;  %5228 = vmatprep.mubr.msk.f32.mxu0 %vm204_vm0, %v5921_v17 }
  0x58   : > { %5039 = vmatmul.mubr.msk.f32.gmra.mrb[4].mxu1 %vm204_vm0, %v6007_v36  ;;  %5229 = vmatmul.mubr.msk.f32.vlgmr.msra.gmra.mrb[0].mxu0 %vm204_vm0, %v5927_v19 }
  0x59   : > { %5241 = vmatpush3.msra.mxu0 %v4593_v53  ;;  %5041 = vmatprep.mubr.msk.f32.mxu1 %vm204_vm0, %v6022_v39  ;;  %v6258_v53 = vld [vmem:[%s5862_s4 + $0x171] sm:$0xff] }
  0x5a   : > { %5231 = vmatprep.mubr.msk.f32.mxu0 %vm204_vm0, %v5942_v22  ;;  %5254 = vmatprep.subr.mxu0 %v4610_v61 }
  0x5c   : > { %5042 = vmatmul.mubr.msk.f32.gmra.mrb[6].mxu1 %vm204_vm0, %v6146_v62  ;;  %5232 = vmatmul.mubr.msk.f32.gmra.mrb[2].mxu0 %vm204_vm0, %v5948_v24 }
  0x5d   : > { %5046 = vmatprep.mubr.msk.f32.mxu1 %vm204_vm0, %v5869_v6  ;;  %5234 = vmatprep.mubr.msk.f32.mxu0 %vm204_vm0, %v5961_v26  ;;  %v4627_v6 = vld [vmem:[%s6668_s1 + $0xa0] sm:$0xff] }
  0x60   : > { %5047 = vmatmul.mubr.msk.f32.vlgmr.msra.gmra.mrb[0].mxu1 %vm204_vm0, %v5878_v8  ;;  %5235 = vmatmul.mubr.msk.f32.gmra.mrb[4].mxu0 %vm204_vm0, %v5967_v28 }
  0x61   : > { %5059 = vmatpush3.msra.mxu1 %v4372_v59  ;;  %5049 = vmatprep.mubr.msk.f32.mxu1 %vm204_vm0, %v5894_v12  ;;  %v6263_v59 = vld [vmem:[%s5862_s4 + $0x181] sm:$0xff] }
  0x62   : > { %5237 = vmatprep.mubr.msk.f32.mxu0 %vm204_vm0, %v5982_v31  ;;  %5072 = vmatprep.subr.mxu1 %v4389_v63  ;;  %v6227_v31 = vld [vmem:[%s5862_s4 + $0x1b0] sm:$0xff] }
  0x64   : > { %5050 = vmatmul.mubr.msk.f32.gmra.mrb[2].mxu1 %vm204_vm0, %v5904_v14  ;;  %5238 = vmatmul.mubr.msk.f32.gmra.mrb[6].mxu0 %vm204_vm0, %v4575_v0  ;;  %v4619_v0 = vld [vmem:[%s5862_s4 + $0x142] sm:$0xff] }
  0x65   : > { %5052 = vmatprep.mubr.msk.f32.mxu1 %vm204_vm0, %v5918_v16  ;;  %5242 = vmatprep.mubr.msk.f32.mxu0 %vm204_vm0, %v4585_v2  ;;  %v4661_v2 = vld [vmem:[%s6668_s1 + $0xb0] sm:$0xff] }
  0x68   : > { %5053 = vmatmul.mubr.msk.f32.gmra.mrb[4].mxu1 %vm204_vm0, %v5924_v18  ;;  %5243 = vmatmul.mubr.msk.f32.vlgmr.msra.gmra.mrb[0].mxu0 %vm204_vm0, %v6178_v3 }
  0x69   : > { %5255 = vmatpush3.msra.mxu0 %v4610_v61  ;;  %5055 = vmatprep.mubr.msk.f32.mxu1 %vm204_vm0, %v5939_v21  ;;  %v6277_v61 = vld [vmem:[%s5862_s4 + $0x1a1] sm:$0xff] }
  0x6a   : > { %5245 = vmatprep.mubr.msk.f32.mxu0 %vm204_vm0, %v6181_v4  ;;  %5268 = vmatprep.subr.mxu0 %v4627_v6 }
  0x6c   : > { %5056 = vmatmul.mubr.msk.f32.gmra.mrb[6].mxu1 %vm204_vm0, %v6193_v10  ;;  %5246 = vmatmul.mubr.msk.f32.gmra.mrb[2].mxu0 %vm204_vm0, %v6196_v11 }
  0x6d   : > { %5060 = vmatprep.mubr.msk.f32.mxu1 %vm204_vm0, %v6041_v43  ;;  %5248 = vmatprep.mubr.msk.f32.mxu0 %vm204_vm0, %v6201_v20  ;;  %v6243_v43 = vld [vmem:[%s5862_s4 + $0x161] sm:$0xff] }
  0x70   : > { %5061 = vmatmul.mubr.msk.f32.vlgmr.msra.gmra.mrb[0].mxu1 %vm204_vm0, %v6047_v45  ;;  %5249 = vmatmul.mubr.msk.f32.gmra.mrb[4].mxu0 %vm204_vm0, %v6212_v23 }
  0x71   : > { %5073 = vmatpush3.msra.mxu1 %v4389_v63  ;;  %5063 = vmatprep.mubr.msk.f32.mxu1 %vm204_vm0, %v6062_v48  ;;  %v4423_v63 = vld [vmem:[%s6668_s1 + $0x40] sm:$0xff] }
  0x72   : > { %5251 = vmatprep.mubr.msk.f32.mxu0 %vm204_vm0, %v6215_v25  ;;  %5086 = vmatprep.subr.mxu1 %v4406_v29 }
  0x74   : > { %5064 = vmatmul.mubr.msk.f32.gmra.mrb[2].mxu1 %vm204_vm0, %v6068_v50  ;;  %5252 = vmatmul.mubr.msk.f32.gmra.mrb[6].mxu0 %vm204_vm0, %v6227_v31 }
  0x75   : > { %5066 = vmatprep.mubr.msk.f32.mxu1 %vm204_vm0, %v6078_v51  ;;  %5256 = vmatprep.mubr.msk.f32.mxu0 %vm204_vm0, %v4602_v38  ;;  %v4677_v38 = vld [vmem:[%s5862_s4 + $0x1c2] sm:$0xff] }
  0x78   : > { %5067 = vmatmul.mubr.msk.f32.gmra.mrb[4].mxu1 %vm204_vm0, %v6081_v52  ;;  %5257 = vmatmul.mubr.msk.f32.vlgmr.msra.gmra.mrb[0].mxu0 %vm204_vm0, %v6240_v41 }
  0x79   : > { %5269 = vmatpush3.msra.mxu0 %v4627_v6  ;;  %5069 = vmatprep.mubr.msk.f32.mxu1 %vm204_vm0, %v6093_v54  ;;  %v6323_v6 = vld [vmem:[%s5862_s4 + $0x182] sm:$0xff] }
  0x7a   : > { %5259 = vmatprep.mubr.msk.f32.mxu0 %vm204_vm0, %v6243_v43  ;;  %5282 = vmatprep.subr.mxu0 %v4644_v47 }
  0x7c   : > { %5070 = vmatmul.mubr.msk.f32.gmra.mrb[6].mxu1 %vm204_vm0, %v6255_v49  ;;  %5260 = vmatmul.mubr.msk.f32.gmra.mrb[2].mxu0 %vm204_vm0, %v6258_v53 }
  0x7d   : > { %5074 = vmatprep.mubr.msk.f32.mxu1 %vm204_vm0, %v5964_v27  ;;  %5262 = vmatprep.mubr.msk.f32.mxu0 %vm204_vm0, %v6263_v59  ;;  %v6289_v27 = vld [vmem:[%s5862_s4 + $0x1b1] sm:$0xff] }
  0x80   : > { %5075 = vmatmul.mubr.msk.f32.vlgmr.msra.gmra.mrb[0].mxu1 %vm204_vm0, %v5979_v30  ;;  %5263 = vmatmul.mubr.msk.f32.gmra.mrb[4].mxu0 %vm204_vm0, %v6274_v60  ;;  %v6302_v30 = vld [vmem:[%s5862_s4 + $0x152] sm:$0xff] }
  0x81   : > { %5087 = vmatpush3.msra.mxu1 %v4406_v29  ;;  %5077 = vmatprep.mubr.msk.f32.mxu1 %vm204_vm0, %v5987_v32  ;;  %v6305_v32 = vld [vmem:[%s5862_s4 + $0x162] sm:$0xff] }
  0x82   : > { %5265 = vmatprep.mubr.msk.f32.mxu0 %vm204_vm0, %v6277_v61  ;;  %5100 = vmatprep.subr.mxu1 %v4423_v63  ;;  %v4440_v29 = vld [vmem:[%s6668_s1 + $0x48] sm:$0xff] }
  0x84   : > { %5078 = vmatmul.mubr.msk.f32.gmra.mrb[2].mxu1 %vm204_vm0, %v6001_v34  ;;  %5266 = vmatmul.mubr.msk.f32.gmra.mrb[6].mxu0 %vm204_vm0, %v6289_v27  ;;  %v4388_v34 = vld [vmem:[%s5862_s4 + $0x90] sm:$0xff] }
  0x85   : > { %5080 = vmatprep.mubr.msk.f32.mxu1 %vm204_vm0, %v6007_v36  ;;  %5270 = vmatprep.mubr.msk.f32.mxu0 %vm204_vm0, %v4619_v0  ;;  %v6318_v36 = vld [vmem:[%s5862_s4 + $0x172] sm:$0xff] }
  0x88   : > { %5081 = vmatmul.mubr.msk.f32.gmra.mrb[4].mxu1 %vm204_vm0, %v6022_v39  ;;  %5271 = vmatmul.mubr.msk.f32.vlgmr.msra.gmra.mrb[0].mxu0 %vm204_vm0, %v6302_v30  ;;  %v6333_v39 = vld [vmem:[%s5862_s4 + $0x192] sm:$0xff] }
  0x89   : > { %5283 = vmatpush3.msra.mxu0 %v4644_v47  ;;  %5083 = vmatprep.mubr.msk.f32.mxu1 %vm204_vm0, %v6146_v62  ;;  %v6336_v62 = vld [vmem:[%s5862_s4 + $0x1a2] sm:$0xff] }
  0x8a   : > { %5273 = vmatprep.mubr.msk.f32.mxu0 %vm204_vm0, %v6305_v32  ;;  %5296 = vmatprep.subr.mxu0 %v4661_v2 }
  0x8c   : > { %5084 = vmatmul.mubr.msk.f32.gmra.mrb[6].mxu1 %vm204_vm0, %v4388_v34  ;;  %5274 = vmatmul.mubr.msk.f32.gmra.mrb[2].mxu0 %vm204_vm0, %v6318_v36 }
  0x8d   : > { %5088 = vmatprep.mubr.msk.f32.mxu1 %vm204_vm0, %v5878_v8  ;;  %5276 = vmatprep.mubr.msk.f32.mxu0 %vm204_vm0, %v6323_v6  ;;  %v6348_v8 = vld [vmem:[%s5862_s4 + $0x1b2] sm:$0xff] }
  0x90   : > { %5089 = vmatmul.mubr.msk.f32.vlgmr.msra.gmra.mrb[0].mxu1 %vm204_vm0, %v5894_v12  ;;  %5277 = vmatmul.mubr.msk.f32.gmra.mrb[4].mxu0 %vm204_vm0, %v6333_v39  ;;  %v4678_v12 = vld [vmem:[%s6668_s1 + $0xb8] sm:$0xff] }
  0x91   : > { %5101 = vmatpush3.msra.mxu1 %v4423_v63  ;;  %5091 = vmatprep.mubr.msk.f32.mxu1 %vm204_vm0, %v5904_v14  ;;  %v4405_v14 = vld [vmem:[%s5862_s4 + $0x91] sm:$0xff] }
  0x92   : > { %5279 = vmatprep.mubr.msk.f32.mxu0 %vm204_vm0, %v6336_v62  ;;  %5114 = vmatprep.subr.mxu1 %v4440_v29 }
  0x94   : > { %5092 = vmatmul.mubr.msk.f32.gmra.mrb[2].mxu1 %vm204_vm0, %v5918_v16  ;;  %5280 = vmatmul.mubr.msk.f32.gmra.mrb[6].mxu0 %vm204_vm0, %v6348_v8  ;;  %v4457_v16 = vld [vmem:[%s6668_s1 + $0x50] sm:$0xff] }
  0x95   : > { %5094 = vmatprep.mubr.msk.f32.mxu1 %vm204_vm0, %v5924_v18  ;;  %5284 = vmatprep.mubr.msk.f32.mxu0 %vm204_vm0, %v6178_v3  ;;  %v6389_v18 = vld [vmem:[%s5862_s4 + $0x1c0] sm:$0xff] }
  0x96   : > { %v4449_v3 = vld [vmem:[%s5862_s4 + $0xa1] sm:$0xff] }
  0x98   : > { %5095 = vmatmul.mubr.msk.f32.gmra.mrb[4].mxu1 %vm204_vm0, %v5939_v21  ;;  %5285 = vmatmul.mubr.msk.f32.vlgmr.msra.gmra.mrb[0].mxu0 %vm204_vm0, %v6181_v4  ;;  %v4695_v21 = vld [vmem:[%s6668_s1 + $0xc0] sm:$0xff] }
  0x99   : > { %5297 = vmatpush3.msra.mxu0 %v4661_v2  ;;  %5097 = vmatprep.mubr.msk.f32.mxu1 %vm204_vm0, %v6193_v10  ;;  %v4491_v10 = vld [vmem:[%s6668_s1 + $0x60] sm:$0xff] }
  0x9a   : > { %5287 = vmatprep.mubr.msk.f32.mxu0 %vm204_vm0, %v6196_v11  ;;  %5310 = vmatprep.subr.mxu0 %v4678_v12 }
  0x9c   : > { %5098 = vmatmul.mubr.msk.f32.gmra.mrb[6].mxu1 %vm204_vm0, %v4405_v14  ;;  %5288 = vmatmul.mubr.msk.f32.gmra.mrb[2].mxu0 %vm204_vm0, %v6201_v20 }
  0x9d   : > { %5102 = vmatprep.mubr.msk.f32.mxu1 %vm204_vm0, %v6047_v45  ;;  %5290 = vmatprep.mubr.msk.f32.mxu0 %vm204_vm0, %v6212_v23  ;;  %v4422_v45 = vld [vmem:[%s5862_s4 + $0x92] sm:$0xff] }
  0xa0   : > { %5103 = vmatmul.mubr.msk.f32.vlgmr.msra.gmra.mrb[0].mxu1 %vm204_vm0, %v6062_v48  ;;  %5291 = vmatmul.mubr.msk.f32.gmra.mrb[4].mxu0 %vm204_vm0, %v6215_v25  ;;  %v4432_v48 = vld [vmem:[%s5862_s4 + $0xa0] sm:$0xff] }
  0xa1   : > { %5115 = vmatpush3.msra.mxu1 %v4440_v29  ;;  %5105 = vmatprep.mubr.msk.f32.mxu1 %vm204_vm0, %v6068_v50  ;;  %v6421_v50 = vld [vmem:[%s5862_s4 + $0xb0] sm:$0xff] }
  0xa2   : > { %5293 = vmatprep.mubr.msk.f32.mxu0 %vm204_vm0, %v6227_v31  ;;  %5128 = vmatprep.subr.mxu1 %v4457_v16 }
  0xa4   : > { %5106 = vmatmul.mubr.msk.f32.gmra.mrb[2].mxu1 %vm204_vm0, %v6078_v51  ;;  %5294 = vmatmul.mubr.msk.f32.gmra.mrb[6].mxu0 %vm204_vm0, %v6389_v18  ;;  %v4474_v51 = vld [vmem:[%s6668_s1 + $0x58] sm:$0xff] }
  0xa5   : > { %5108 = vmatprep.mubr.msk.f32.mxu1 %vm204_vm0, %v6081_v52  ;;  %5298 = vmatprep.mubr.msk.f32.mxu0 %vm204_vm0, %v6240_v41  ;;  %v6433_v52 = vld [vmem:[%s5862_s4 + $0x1c1] sm:$0xff] }
  0xa8   : > { %5109 = vmatmul.mubr.msk.f32.gmra.mrb[4].mxu1 %vm204_vm0, %v6093_v54  ;;  %5299 = vmatmul.mubr.msk.f32.vlgmr.msra.gmra.mrb[0].mxu0 %vm204_vm0, %v6243_v43  ;;  %v4712_v54 = vld [vmem:[%s6668_s1 + $0xc8] sm:$0xff] }
  0xa9   : > { %5311 = vmatpush3.msra.mxu0 %v4678_v12  ;;  %5111 = vmatprep.mubr.msk.f32.mxu1 %vm204_vm0, %v6255_v49 }
  0xaa   : > { %5301 = vmatprep.mubr.msk.f32.mxu0 %vm204_vm0, %v6258_v53  ;;  %5324 = vmatprep.subr.mxu0 %v4695_v21 }
  0xac   : > { %5112 = vmatmul.mubr.msk.f32.gmra.mrb[6].mxu1 %vm204_vm0, %v4422_v45  ;;  %5302 = vmatmul.mubr.msk.f32.gmra.mrb[2].mxu0 %vm204_vm0, %v6263_v59 }
  0xad   : > { %5116 = vmatprep.mubr.msk.f32.mxu1 %vm204_vm0, %v4432_v48  ;;  %5304 = vmatprep.mubr.msk.f32.mxu0 %vm204_vm0, %v6274_v60 }
  0xb0   : > { %5117 = vmatmul.mubr.msk.f32.vlgmr.msra.gmra.mrb[0].mxu1 %vm204_vm0, %v6421_v50  ;;  %5305 = vmatmul.mubr.msk.f32.gmra.mrb[4].mxu0 %vm204_vm0, %v6277_v61 }
  0xb1   : > { %5129 = vmatpush3.msra.mxu1 %v4457_v16  ;;  %5119 = vmatprep.mubr.msk.f32.mxu1 %vm204_vm0, %v5990_v33 }
  0xb2   : > { %5307 = vmatprep.mubr.msk.f32.mxu0 %vm204_vm0, %v6289_v27  ;;  %5142 = vmatprep.subr.mxu1 %v4474_v51 }
  0xb4   : > { %5120 = vmatmul.mubr.msk.f32.gmra.mrb[2].mxu1 %vm204_vm0, %v6004_v35  ;;  %5308 = vmatmul.mubr.msk.f32.gmra.mrb[6].mxu0 %vm204_vm0, %v6433_v52 }
  0xb5   : > { %5122 = vmatprep.mubr.msk.f32.mxu1 %vm204_vm0, %v6010_v37  ;;  %5312 = vmatprep.mubr.msk.f32.mxu0 %vm204_vm0, %v6302_v30 }
  0xb8   : > { %5123 = vmatmul.mubr.msk.f32.gmra.mrb[4].mxu1 %vm204_vm0, %v6025_v40  ;;  %5313 = vmatmul.mubr.msk.f32.vlgmr.msra.gmra.mrb[0].mxu0 %vm204_vm0, %v6305_v32 }
  0xb9   : > { %5325 = vmatpush3.msra.mxu0 %v4695_v21  ;;  %5125 = vmatprep.mubr.msk.f32.mxu1 %vm204_vm0, %v6031_v42 }
  0xba   : > { %5315 = vmatprep.mubr.msk.f32.mxu0 %vm204_vm0, %v6318_v36  ;;  %5338 = vmatprep.subr.mxu0 %v4712_v54 }
  0xbc   : > { %5126 = vmatmul.mubr.msk.f32.gmra.mrb[6].mxu1 %vm204_vm0, %v6044_v44  ;;  %5316 = vmatmul.mubr.msk.f32.gmra.mrb[2].mxu0 %vm204_vm0, %v6323_v6 }
  0xbd   : > { %5130 = vmatprep.mubr.msk.f32.mxu1 %vm204_vm0, %v4449_v3  ;;  %5318 = vmatprep.mubr.msk.f32.mxu0 %vm204_vm0, %v6333_v39 }
  0xc0   : > { %5131 = vmatmul.mubr.msk.f32.vlgmr.msra.gmra.mrb[0].mxu1 %vm204_vm0, %v5866_v5  ;;  %5319 = vmatmul.mubr.msk.f32.gmra.mrb[4].mxu0 %vm204_vm0, %v6336_v62  ;;  %v4729_v5 = vld [vmem:[%s6668_s1 + $0xd0] sm:$0xff] }
  0xc1   : > { %5143 = vmatpush3.msra.mxu1 %v4474_v51  ;;  %5133 = vmatprep.mubr.msk.f32.mxu1 %vm204_vm0, %v5875_v7  ;;  %v4466_v7 = vld [vmem:[%s5862_s4 + $0xa2] sm:$0xff] }
  0xc2   : > { %5321 = vmatprep.mubr.msk.f32.mxu0 %vm204_vm0, %v6348_v8  ;;  %5156 = vmatprep.subr.mxu1 %v4491_v10 }
  0xc4   : > { %5134 = vmatmul.mubr.msk.f32.gmra.mrb[2].mxu1 %vm204_vm0, %v5881_v9  ;;  %5322 = vmatmul.mubr.msk.f32.gmra.mrb[6].mxu0 %vm204_vm0, %v4677_v38  ;;  %v4694_v9 = vld [vmem:[%s5862_s4 + $0x1d0] sm:$0xff] }
  0xc5   : > { %5136 = vmatprep.mubr.msk.f32.mxu1 %vm204_vm0, %v5897_v13  ;;  %5326 = vmatprep.mubr.msk.f32.mxu0 %vm204_vm0, %v6181_v4  ;;  %v4711_v13 = vld [vmem:[%s5862_s4 + $0x1d1] sm:$0xff] }
  0xc8   : > { %5137 = vmatmul.mubr.msk.f32.gmra.mrb[4].mxu1 %vm204_vm0, %v6096_v55  ;;  %5327 = vmatmul.mubr.msk.f32.vlgmr.msra.gmra.mrb[0].mxu0 %vm204_vm0, %v6196_v11 }
  0xc9   : > { %5339 = vmatpush3.msra.mxu0 %v4712_v54  ;;  %5139 = vmatprep.mubr.msk.f32.mxu1 %vm204_vm0, %v6101_v56 }
  0xca   : > { %5329 = vmatprep.mubr.msk.f32.mxu0 %vm204_vm0, %v6201_v20  ;;  %5352 = vmatprep.subr.mxu0 %v4729_v5 }
  0xcc   : > { %5140 = vmatmul.mubr.msk.f32.gmra.mrb[6].mxu1 %vm204_vm0, %v6112_v57  ;;  %5330 = vmatmul.mubr.msk.f32.gmra.mrb[2].mxu0 %vm204_vm0, %v6212_v23 }
  0xcd   : > { %5144 = vmatprep.mubr.msk.f32.mxu1 %vm204_vm0, %v4466_v7  ;;  %5332 = vmatprep.mubr.msk.f32.mxu0 %vm204_vm0, %v6215_v25 }
  0xd0   : > { %5145 = vmatmul.mubr.msk.f32.vlgmr.msra.gmra.mrb[0].mxu1 %vm204_vm0, %v5907_v15  ;;  %5333 = vmatmul.mubr.msk.f32.gmra.mrb[4].mxu0 %vm204_vm0, %v6227_v31 }
  0xd1   : > { %5157 = vmatpush3.msra.mxu1 %v4491_v10  ;;  %5147 = vmatprep.mubr.msk.f32.mxu1 %vm204_vm0, %v5921_v17 }
  0xd2   : > { %5335 = vmatprep.mubr.msk.f32.mxu0 %vm204_vm0, %v6389_v18  ;;  %5366 = vmatprep.subr.mxu1 %v5846_v1 }
  0xd4   : > { %5148 = vmatmul.mubr.msk.f32.gmra.mrb[2].mxu1 %vm204_vm0, %v5927_v19  ;;  %5336 = vmatmul.mubr.msk.f32.gmra.mrb[6].mxu0 %vm204_vm0, %v4694_v9 }
  0xd5   : > { %5150 = vmatprep.mubr.msk.f32.mxu1 %vm204_vm0, %v5942_v22  ;;  %5340 = vmatprep.mubr.msk.f32.mxu0 %vm204_vm0, %v6243_v43 }
  0xd8   : > { %5151 = vmatmul.mubr.msk.f32.gmra.mrb[4].mxu1 %vm204_vm0, %v5948_v24  ;;  %5341 = vmatmul.mubr.msk.f32.vlgmr.msra.gmra.mrb[0].mxu0 %vm204_vm0, %v6258_v53 }
  0xd9   : > { %5353 = vmatpush3.msra.mxu0 %v4729_v5  ;;  %5153 = vmatprep.mubr.msk.f32.mxu1 %vm204_vm0, %v5961_v26  ;;  %v4738_v26 = vld [vmem:[%s6669_s2] ss:$0 sm:$0xff] }
  0xda   : > { %5343 = vmatprep.mubr.msk.f32.mxu0 %vm204_vm0, %v6263_v59 }
  0xdc   : > { %5154 = vmatmul.mubr.msk.f32.gmra.mrb[6].mxu1 %vm204_vm0, %v5967_v28  ;;  %5344 = vmatmul.mubr.msk.f32.gmra.mrb[2].mxu0 %vm204_vm0, %v6274_v60 }
  0xdd   : > { %5158 = vmatprep.mubr.msk.f32.mxu1 %vm204_vm0, %v6421_v50  ;;  %5346 = vmatprep.mubr.msk.f32.mxu0 %vm204_vm0, %v6277_v61 }
  0xe0   : > { %5159 = vmatmul.mubr.msk.f32.vlgmr.msra.gmra.mrb[0].mxu1 %vm204_vm0, %v5990_v33  ;;  %5347 = vmatmul.mubr.msk.f32.gmra.mrb[4].mxu0 %vm204_vm0, %v6289_v27 }
  0xe1   : > { %5367 = vmatpush3.msra.mxu1 %v5846_v1  ;;  %5161 = vmatprep.mubr.msk.f32.mxu1 %vm204_vm0, %v6004_v35  ;;  %v4728_v1 = vld [vmem:[%s5862_s4 + $0x1d2] sm:$0xff]  ;;  %s6585_s4 = scalar_lea.vmem [#allocation2], %s4302_s21  ;;  %s5654_s21 = sshll.u32 %s5746_s11, 4  ;;  %s5655_s21 = int_to_ptr.vmem [resolvable:$false] %s5654_s21 }
  0xe2   : > { %5349 = vmatprep.mubr.msk.f32.mxu0 %vm204_vm0, %v6433_v52  ;;  %s4195_s16 = sshll.u32 %s6585_s4, 4  ;;  %s5656_s24 = scalar_lea.vmem %s5655_s21, 2048  ;;  %s6607_s16 = int_to_ptr.vmem [resolvable:$true] %s4195_s16 }
  0xe3   : > { %s5650_s10 = scalar_lea.vmem %s6607_s16, 1024  ;;  %p5657_p2 = scmp.lt.s32.totalorder %s6607_s16, %s5655_s21 }
  0xe4   : > { %5162 = vmatmul.mubr.msk.f32.gmra.mrb[2].mxu1 %vm204_vm0, %v6010_v37  ;;  %5350 = vmatmul.mubr.msk.f32.gmra.mrb[6].mxu0 %vm204_vm0, %v4711_v13  ;;  %p5651_p13 = scmp.ne.s32.totalorder %s6607_s16, %s5650_s10  ;;  %p5658_p4 = scmp.lt.s32.totalorder %s5656_s24, %s5650_s10 }
  0xe5   : > { %5164 = vmatprep.mubr.msk.f32.mxu1 %vm204_vm0, %v6025_v40  ;;  %5354 = vmatprep.mubr.msk.f32.mxu0 %vm204_vm0, %v6305_v32 }
  0xe6   : > { %p5652_p0 = pnand %p5651_p13, %p5820_p3  ;;  %p5659_p5 = por %p5658_p4, %p5657_p2 }
  0xe8   : > { %5165 = vmatmul.mubr.msk.f32.gmra.mrb[4].mxu1 %vm204_vm0, %v6031_v42  ;;  %5355 = vmatmul.mubr.msk.f32.vlgmr.msra.gmra.mrb[0].mxu0 %vm204_vm0, %v6318_v36  ;;  %p5653_p1 = pneg %p5652_p0 }
  0xe9   : > { %5167 = vmatprep.mubr.msk.f32.mxu1 %vm204_vm0, %v6044_v44  ;;  %5357 = vmatprep.mubr.msk.f32.mxu0 %vm204_vm0, %v6323_v6 }
  0xea   : > { %p5660_p6 = pnand %p5659_p5, %p5653_p1 }
  0xec   : > { %5168 = vmatmul.mubr.msk.f32.gmra.mrb[6].mxu1 %vm204_vm0, %v6050_v46  ;;  %5358 = vmatmul.mubr.msk.f32.gmra.mrb[2].mxu0 %vm204_vm0, %v6333_v39 }
  0xed   : > { %5178 = vmatprep.mubr.msk.f32.mxu1 %vm204_vm0, %v6096_v55  ;;  %5360 = vmatprep.mubr.msk.f32.mxu0 %vm204_vm0, %v6336_v62 }
  0xf0   : > { %5179 = vmatmul.mubr.msk.f32.vlgmr.msra.gmra.mrb[4].mxu1 %vm204_vm0, %v6101_v56  ;;  %5361 = vmatmul.mubr.msk.f32.gmra.mrb[4].mxu0 %vm204_vm0, %v6348_v8 }
  0xf1   : > { %5181 = vmatprep.mubr.msk.f32.mxu1 %vm204_vm0, %v6112_v57  ;;  %5363 = vmatprep.mubr.msk.f32.mxu0 %vm204_vm0, %v4677_v38 }
  0xf4   : > { %5182 = vmatmul.mubr.msk.f32.gmra.mrb[6].mxu1 %vm204_vm0, %v6115_v58  ;;  %5364 = vmatmul.mubr.msk.f32.gmra.mrb[6].mxu0 %vm204_vm0, %v4728_v1 }
 0x1b3   : > { %v5160_v15 = vpop.f32.mrb[0].mxu1 }
 0x1b4   : > { %v2042_v17 = vpop.f32.mrb[1].mxu1 }
 0x1b7   : > { %v5163_v19 = vpop.f32.mrb[2].mxu1 }
 0x1b8   : > { %v2052_v22 = vpop.f32.mrb[3].mxu1 }
 0x1bb   : > { %v5356_v24 = vpop.f32.mrb[0].mxu0 }
 0x1bc   : > { %v5368_v28 = vadd.f32 %v5356_v24, %v5160_v15  ;;  %v4109_v33 = vpop.f32.mrb[1].mxu0 }
 0x1bd   : > { %v5369_v35 = vadd.f32 %v4109_v33, %v2042_v17 }
 0x1be   : > { %v4164_v37 = vadd.f32 %v5368_v28, %v4738_v26 }
 0x1bf   : > { %v4163_v40 = vadd.f32 %v5369_v35, %v4738_v26  ;;  %v5359_v42 = vpop.f32.mrb[2].mxu0 }
 0x1c0   : > { %4172 = vst.msk [vmem:[%s6585_s4 + $0x8] sm:$0xff] %vm204_vm0, %v4164_v37  ;;  %v5370_v44 = vadd.f32 %v5359_v42, %v5163_v19  ;;  %v4119_v46 = vpop.f32.mrb[3].mxu0 }
 0x1c1   : > { %4171 = vst.msk [vmem:[%s6585_s4] sm:$0xff] %vm204_vm0, %v4163_v40  ;;  %v5371_v55 = vadd.f32 %v4119_v46, %v2052_v22 }
 0x1c2   : > { %v4166_v56 = vadd.f32 %v5370_v44, %v4738_v26 }
 0x1c3   : > { %v4165_v57 = vadd.f32 %v5371_v55, %v4738_v26  ;;  %v5180_v58 = vpop.f32.mrb[4].mxu1  ;;  %v5362_v4 = vpop.f32.mrb[4].mxu0 }
 0x1c4   : > { %4174 = vst.msk [vmem:[%s6585_s4 + $0x18] sm:$0xff] %vm204_vm0, %v4166_v56  ;;  %v5372_v11 = vadd.f32 %v5362_v4, %v5180_v58  ;;  %v2209_v20 = vpop.f32.mrb[5].mxu1  ;;  %v4129_v23 = vpop.f32.mrb[5].mxu0 }
 0x1c5   : > { %4173 = vst.msk [vmem:[%s6585_s4 + $0x10] sm:$0xff] %vm204_vm0, %v4165_v57  ;;  %v5373_v25 = vadd.f32 %v4129_v23, %v2209_v20 }
 0x1c6   : > { %v4168_v31 = vadd.f32 %v5372_v11, %v4738_v26 }
 0x1c7   : > { %v4167_v41 = vadd.f32 %v5373_v25, %v4738_v26  ;;  %v5183_v43 = vpop.f32.mrb[6].mxu1  ;;  %v5365_v47 = vpop.f32.mrb[6].mxu0 }
 0x1c8   : > { %4176 = vst.msk [vmem:[%s6585_s4 + $0x28] sm:$0xff] %vm204_vm0, %v4168_v31  ;;  %v5374_v49 = vadd.f32 %v5365_v47, %v5183_v43  ;;  %v2219_v53 = vpop.f32.mrb[7].mxu1  ;;  %v4139_v59 = vpop.f32.mrb[7].mxu0 }
 0x1c9   : > { %4175 = vst.msk [vmem:[%s6585_s4 + $0x20] sm:$0xff] %vm204_vm0, %v4167_v41  ;;  %v5375_v60 = vadd.f32 %v4139_v59, %v2219_v53 }
 0x1ca   : > { %v4170_v61 = vadd.f32 %v5374_v49, %v4738_v26 }
 0x1cb   : > { %v4169_v63 = vadd.f32 %v5375_v60, %v4738_v26 }
 0x1cc   : > { %4178 = vst.msk [vmem:[%s6585_s4 + $0x38] sm:$0xff] %vm204_vm0, %v4170_v61 }
 0x1cd   : > { %4177 = vst.msk [vmem:[%s6585_s4 + $0x30] sm:$0xff] %vm204_vm0, %v4169_v63 }
 0x1ce   : > { %5663 = shalt.err (!%p5660_p6)
}
 0x1cf   : > { %s5664_s20 = scalar_lea.hbm %s6605_s8, 1024  ;;  %s5668_s28 = scalar_lea.hbm %s6670_s3, 16384 }
 0x1d0   : > { %p5665_p7 = scmp.ne.s32.totalorder %s6605_s8, %s5664_s20  ;;  %p5669_p11 = scmp.lt.u32.totalorder %s6605_s8, %s6670_s3 }
 0x1d1   : > { %p5670_p12 = scmp.lt.u32.totalorder %s5668_s28, %s5664_s20  ;;  %p5672_p0 = scmp.lt.u32.totalorder %s5664_s20, %s6605_s8 }
 0x1d2   : > { %p5666_p9 = pnand %p5665_p7, %p5820_p3 }
 0x1d3   : > { %p5671_p13 = por %p5670_p12, %p5669_p11 }
 0x1d4   : > { %p5667_p10 = pneg %p5666_p9 }
 0x1d5   : > { %p5673_p1 = por %p5672_p0, %p5671_p13 }
 0x1d7   : > { %p5674_p2 = pnand %p5673_p1, %p5667_p10 }
 0x1d9   : > { %5677 = shalt.err (!%p5674_p2)
}
 0x1da   : > { %s5747_s15 = smov 128   ;;  %s5748_s6 = smov 8  }
 0x1db   : > { %5577 = dma.vmem_to_hbm [thread:$0]  (%p5820_p3), %s6607_s16, 1024, %s6605_s8, %s6615_s9, %s5747_s15, %s5747_s15, %s5748_s6  }
 0x1dc PF: > { %p5583_p4 = scmp.ge.s32.totalorder %s5744_s19, 2  ;;  %s4210_s7 = sand.u32 1, %s5716_s12  }
 0x1dd   : > { %s4211_s10 = scalar_lea.sflag [#allocation3], %s4210_s7 }
 0x1de   : > { %p5580_p5 = pnand %p5583_p4, %p5829_p8 }
 0x1e0   : > { %5711 = dma.done.wait (!%p5580_p5), %s4211_s10, 1024  }
 0x1e1   : > { %5713 = vsyncadd (!%p5580_p5), %s4211_s10, 4294966272  ;;  %s16_s19 = sadd.s32 1, %s5744_s19   ;;  %s6673_s12 = smov %s5720_s13 }
 0x1e2   : > { %p13_p6 = scmp.ge.s32.totalorder %s16_s19, 18   ;;  %s6674_s13 = smov %s5724_s14 }
 0x1e3   : > { %s6675_s14 = smov %s5838_s30  ;;  %s6676_s15 = smov %s5736_s17 }
 0x1e4   : > { %s6677_s16 = smov %s5740_s18  ;;  %s6678_s17 = smov %s6681_s22 }
 0x1e5   : > { %s6679_s18 = smov %s6685_s23  ;;  %15 = sbr.rel (!%p13_p6) target bundleno = 5 (0x5), region = 102 }
 0x1ec   :  { %4216 = vsyncpa [#allocation3], 1 }
 0x1ed   :  { %4218 = vsyncpa [#allocation3 + $0x1], 1 }

</bundles_post_ra>
